<compile_context>
chip_gen: v5e
topology: v5e:2x2
jax: 0.10.0
libtpu: 0.0.40
codegen_flags: <defaults>
</compile_context>

<pallas_src>
import math

import jax
import jax.numpy as jnp
import numpy as np
from jax.experimental import pallas as pl
from jax.experimental.pallas import tpu as pltpu


def _round_up(a: int, b: int) -> int:
    return (a + b - 1) // b * b


# ----------------------------------------------------------------------------
# Fused Gabor kernel: one M-tile of
#   out = sin(x @ W^T + b) * exp(-0.5 * (||x||^2 + ||mu||^2 - 2 x mu^T) * gamma)
# ----------------------------------------------------------------------------
def _gabor_kernel(x_ref, mu_t_ref, w_t_ref, b_ref, gamma_ref, musq_ref, o_ref):
    x = x_ref[...]                                                       # (tm, K)
    xsq = jnp.sum(x * x, axis=-1, keepdims=True)                         # (tm, 1)
    xmu = jnp.dot(x, mu_t_ref[...], preferred_element_type=jnp.float32)  # (tm, N)
    lin = jnp.dot(x, w_t_ref[...], preferred_element_type=jnp.float32)   # (tm, N)
    d = xsq + musq_ref[...] - 2.0 * xmu
    env = jnp.exp(-0.5 * d * gamma_ref[...])
    o_ref[...] = (jnp.sin(lin + b_ref[...]) * env).astype(o_ref.dtype)


def gabor_forward_pallas(x, mu, weight, bias, gamma, *, tm=128):
    """GaborLayer forward. x: (..., K); mu/weight: (N, K); bias/gamma: (N,)."""
    *lead, K = x.shape
    N = mu.shape[0]
    x2 = x.reshape(-1, K).astype(jnp.float32)
    M = x2.shape[0]

    # Row tiling: tm | M_pad, and with the demo shapes the grid has 2 steps
    # so both v7x TensorCores get work.
    tm = max(8, min(tm, _round_up(M, 8)))
    M_pad = _round_up(M, tm)
    # Lane-dense output: out_features sits on the 128-lane axis.
    N_pad = _round_up(N, 128)

    if M_pad != M:
        x2 = jnp.pad(x2, ((0, M_pad - M), (0, 0)))

    mu_t = mu.T.astype(jnp.float32)                                  # (K, N)
    w_t = weight.T.astype(jnp.float32)                               # (K, N)
    musq = jnp.sum(mu.astype(jnp.float32) ** 2, axis=-1)[None, :]    # (1, N)
    b2 = bias.astype(jnp.float32)[None, :]
    g2 = gamma.astype(jnp.float32)[None, :]
    if N_pad != N:
        pad_n = N_pad - N
        mu_t = jnp.pad(mu_t, ((0, 0), (0, pad_n)))
        w_t = jnp.pad(w_t, ((0, 0), (0, pad_n)))
        musq = jnp.pad(musq, ((0, 0), (0, pad_n)))
        b2 = jnp.pad(b2, ((0, 0), (0, pad_n)))
        g2 = jnp.pad(g2, ((0, 0), (0, pad_n)))

    out = pl.pallas_call(
        _gabor_kernel,
        out_shape=jax.ShapeDtypeStruct((M_pad, N_pad), jnp.float32),
        grid=(M_pad // tm,),
        in_specs=[
            pl.BlockSpec((tm, K), lambda i: (i, 0)),      # x row tile
            pl.BlockSpec((K, N_pad), lambda i: (0, 0)),   # mu^T   (VMEM-resident)
            pl.BlockSpec((K, N_pad), lambda i: (0, 0)),   # W^T    (VMEM-resident)
            pl.BlockSpec((1, N_pad), lambda i: (0, 0)),   # bias
            pl.BlockSpec((1, N_pad), lambda i: (0, 0)),   # gamma
            pl.BlockSpec((1, N_pad), lambda i: (0, 0)),   # ||mu||^2
        ],
        out_specs=pl.BlockSpec((tm, N_pad), lambda i: (i, 0)),
        compiler_params=pltpu.CompilerParams(dimension_semantics=("parallel",)),
    )(x2, mu_t, w_t, b2, g2, musq)

    out = out[:M, :N]
    return out.reshape(*lead, N)


# ----------------------------------------------------------------------------
# Parameter init mirroring the PyTorch module
# ----------------------------------------------------------------------------
def init_gabor_params(key, in_features, out_features, weight_scale,
                      alpha=1.0, beta=1.0):
    k_mu, k_g, k_w, k_b = jax.random.split(key, 4)
    mu = 2.0 * jax.random.uniform(k_mu, (out_features, in_features), jnp.float32) - 1.0
    # torch.distributions.Gamma(alpha, beta) == Gamma(shape=alpha, rate=beta)
    gamma = jax.random.gamma(k_g, alpha, (out_features,), jnp.float32) / beta
    bound = 1.0 / math.sqrt(in_features)                 # nn.Linear default init
    weight = jax.random.uniform(k_w, (out_features, in_features), jnp.float32,
                                -bound, bound)
    weight = weight * weight_scale * jnp.sqrt(gamma)[:, None]
    bias = jax.random.uniform(k_b, (out_features,), jnp.float32, -np.pi, np.pi)
    return {"mu": mu, "gamma": gamma, "weight": weight, "bias": bias}


# ----------------------------------------------------------------------------
# Pure-JAX reference (matches the PyTorch forward)
# ----------------------------------------------------------------------------
def gabor_forward_ref(x, mu, weight, bias, gamma):
    D = (x ** 2).sum(-1)[..., None] + (mu ** 2).sum(-1)[None, :] - 2.0 * x @ mu.T
    lin = x @ weight.T + bias
    return jnp.sin(lin) * jnp.exp(-0.5 * D * gamma[None, :])


if __name__ == "__main__":
    in_features, out_features = 32, 128
    weight_scale = 1.0

    key = jax.random.PRNGKey(0)
    k_p, k_x = jax.random.split(key)
    params = init_gabor_params(k_p, in_features, out_features, weight_scale)

    # (batch=2, seq=128, in_features=32) -> 256 flattened rows, 2 grid steps.
    x = 0.25 * jax.random.normal(k_x, (2, 128, in_features), jnp.float32)

    fwd = jax.jit(lambda xx: gabor_forward_pallas(
        xx, params["mu"], params["weight"], params["bias"], params["gamma"]))
    y = jax.block_until_ready(fwd(x))
    assert y.shape == (2, 128, out_features)

    y_ref = jax.block_until_ready(gabor_forward_ref(
        x, params["mu"], params["weight"], params["bias"], params["gamma"]))
    np.testing.assert_allclose(np.asarray(y), np.asarray(y_ref),
                               rtol=2e-2, atol=1e-5)

    print("KERNEL_OK")
</pallas_src>

<mosaic_0001>
module attributes {stable_mosaic.version = 11 : i64} {
  func.func @_gabor_kernel(%arg0: i32, %arg1: memref<128x32xf32, #tpu.memory_space<vmem>>, %arg2: memref<32x128xf32, #tpu.memory_space<vmem>>, %arg3: memref<32x128xf32, #tpu.memory_space<vmem>>, %arg4: memref<1x128xf32, #tpu.memory_space<vmem>>, %arg5: memref<1x128xf32, #tpu.memory_space<vmem>>, %arg6: memref<1x128xf32, #tpu.memory_space<vmem>>, %arg7: memref<128x128xf32, #tpu.memory_space<vmem>>) attributes {dimension_semantics = [#tpu.dimension_semantics<parallel>], iteration_bounds = array<i64: 2>, scalar_prefetch = 0 : i64, scratch_operands = 0 : i64, tpu.core_type = #tpu.core_type<tc>, window_params = [{transform_indices = @transform_0, window_bounds = array<i64: 128, 32>}, {pipeline_mode = #tpu.pipeline_mode<synchronous>, transform_indices = @transform_1, window_bounds = array<i64: 32, 128>}, {pipeline_mode = #tpu.pipeline_mode<synchronous>, transform_indices = @transform_2, window_bounds = array<i64: 32, 128>}, {pipeline_mode = #tpu.pipeline_mode<synchronous>, transform_indices = @transform_3, window_bounds = array<i64: 1, 128>}, {pipeline_mode = #tpu.pipeline_mode<synchronous>, transform_indices = @transform_4, window_bounds = array<i64: 1, 128>}, {pipeline_mode = #tpu.pipeline_mode<synchronous>, transform_indices = @transform_5, window_bounds = array<i64: 1, 128>}, {transform_indices = @transform_6, window_bounds = array<i64: 128, 128>}]} {
    %c0 = arith.constant 0 : index
    %c0_0 = arith.constant 0 : index
    %0 = vector.load %arg1[%c0, %c0_0] : memref<128x32xf32, #tpu.memory_space<vmem>>, vector<128x32xf32>
    %1 = arith.mulf %0, %0 : vector<128x32xf32>
    %cst = arith.constant dense<0.000000e+00> : vector<128xf32>
    %2 = vector.multi_reduction <add>, %1, %cst [1] : vector<128x32xf32> to vector<128xf32>
    %3 = vector.shape_cast %2 : vector<128xf32> to vector<128x1xf32>
    %c0_1 = arith.constant 0 : index
    %c0_2 = arith.constant 0 : index
    %4 = vector.load %arg2[%c0_1, %c0_2] : memref<32x128xf32, #tpu.memory_space<vmem>>, vector<32x128xf32>
    %cst_3 = arith.constant dense<0.000000e+00> : vector<128x128xf32>
    %5 = tpu.matmul %0, %4, %cst_3 {dimension_numbers = #tpu.dot_dimension_numbers<[1], [0], [0], [1], [0, 0, 1, 1], [], []>} : vector<128x32xf32>, vector<32x128xf32>, vector<128x128xf32> -> vector<128x128xf32>
    %c0_4 = arith.constant 0 : index
    %c0_5 = arith.constant 0 : index
    %6 = vector.load %arg3[%c0_4, %c0_5] : memref<32x128xf32, #tpu.memory_space<vmem>>, vector<32x128xf32>
    %cst_6 = arith.constant dense<0.000000e+00> : vector<128x128xf32>
    %7 = tpu.matmul %0, %6, %cst_6 {dimension_numbers = #tpu.dot_dimension_numbers<[1], [0], [0], [1], [0, 0, 1, 1], [], []>} : vector<128x32xf32>, vector<32x128xf32>, vector<128x128xf32> -> vector<128x128xf32>
    %c0_7 = arith.constant 0 : index
    %c0_8 = arith.constant 0 : index
    %8 = vector.load %arg6[%c0_7, %c0_8] : memref<1x128xf32, #tpu.memory_space<vmem>>, vector<1x128xf32>
    %9 = vector.broadcast %3 : vector<128x1xf32> to vector<128x128xf32>
    %10 = vector.broadcast %8 : vector<1x128xf32> to vector<128x128xf32>
    %11 = arith.addf %9, %10 : vector<128x128xf32>
    %cst_9 = arith.constant 2.000000e+00 : f32
    %12 = vector.broadcast %cst_9 : f32 to vector<128x128xf32>
    %13 = arith.mulf %12, %5 : vector<128x128xf32>
    %14 = arith.subf %11, %13 : vector<128x128xf32>
    %cst_10 = arith.constant -5.000000e-01 : f32
    %15 = vector.broadcast %cst_10 : f32 to vector<128x128xf32>
    %16 = arith.mulf %15, %14 : vector<128x128xf32>
    %c0_11 = arith.constant 0 : index
    %c0_12 = arith.constant 0 : index
    %17 = vector.load %arg5[%c0_11, %c0_12] : memref<1x128xf32, #tpu.memory_space<vmem>>, vector<1x128xf32>
    %18 = vector.broadcast %17 : vector<1x128xf32> to vector<128x128xf32>
    %19 = arith.mulf %16, %18 : vector<128x128xf32>
    %20 = math.exp %19 : vector<128x128xf32>
    %c0_13 = arith.constant 0 : index
    %c0_14 = arith.constant 0 : index
    %21 = vector.load %arg4[%c0_13, %c0_14] : memref<1x128xf32, #tpu.memory_space<vmem>>, vector<1x128xf32>
    %22 = vector.broadcast %21 : vector<1x128xf32> to vector<128x128xf32>
    %23 = arith.addf %7, %22 : vector<128x128xf32>
    %24 = math.sin %23 : vector<128x128xf32>
    %25 = arith.mulf %24, %20 : vector<128x128xf32>
    %c0_15 = arith.constant 0 : index
    %c0_16 = arith.constant 0 : index
    %26 = vector.load %arg7[%c0_15, %c0_16] : memref<128x128xf32, #tpu.memory_space<vmem>>, vector<128x128xf32>
    tpu.vector_store %arg7[%c0_15, %c0_16], %25 {strides = array<i32>} : memref<128x128xf32, #tpu.memory_space<vmem>>, vector<128x128xf32>,
    return
  }
  func.func @transform_0(%arg0: i32) -> (i32, i32) {
    %c0_i32 = arith.constant 0 : i32
    %c0_i32_0 = arith.constant 0 : i32
    return %arg0, %c0_i32 : i32, i32
  }
  func.func @transform_1(%arg0: i32) -> (i32, i32) {
    %c0_i32 = arith.constant 0 : i32
    %c0_i32_0 = arith.constant 0 : i32
    %c0_i32_1 = arith.constant 0 : i32
    return %c0_i32, %c0_i32_0 : i32, i32
  }
  func.func @transform_2(%arg0: i32) -> (i32, i32) {
    %c0_i32 = arith.constant 0 : i32
    %c0_i32_0 = arith.constant 0 : i32
    %c0_i32_1 = arith.constant 0 : i32
    return %c0_i32, %c0_i32_0 : i32, i32
  }
  func.func @transform_3(%arg0: i32) -> (i32, i32) {
    %c0_i32 = arith.constant 0 : i32
    %c0_i32_0 = arith.constant 0 : i32
    %c0_i32_1 = arith.constant 0 : i32
    return %c0_i32, %c0_i32_0 : i32, i32
  }
  func.func @transform_4(%arg0: i32) -> (i32, i32) {
    %c0_i32 = arith.constant 0 : i32
    %c0_i32_0 = arith.constant 0 : i32
    %c0_i32_1 = arith.constant 0 : i32
    return %c0_i32, %c0_i32_0 : i32, i32
  }
  func.func @transform_5(%arg0: i32) -> (i32, i32) {
    %c0_i32 = arith.constant 0 : i32
    %c0_i32_0 = arith.constant 0 : i32
    %c0_i32_1 = arith.constant 0 : i32
    return %c0_i32, %c0_i32_0 : i32, i32
  }
  func.func @transform_6(%arg0: i32) -> (i32, i32) {
    %c0_i32 = arith.constant 0 : i32
    %c0_i32_0 = arith.constant 0 : i32
    return %arg0, %c0_i32 : i32, i32
  }
}

</mosaic_0001>

<bundles_post_ra>
// kernel: _lambda_.1
= control target key start
LH: loop header
LB: loop body
LE: loop exit
PB: predicated region body
PF: predicated region fallthrough
CT: control target
= control target key end

     0   :  { %11 = vsyncpa [#allocation3], 0  ;;  %s6114_s0 = inlined_call_operand.vmem [shape: f32[256,32], index: 0, kind: input, shape index: {}]   ;;  %s6115_s1 = inlined_call_operand.vmem [shape: f32[32,128], index: 1, kind: input, shape index: {}]   ;;  %s6116_s2 = inlined_call_operand.vmem [shape: f32[32,128], index: 2, kind: input, shape index: {}]   ;;  %s6117_s3 = inlined_call_operand.vmem [shape: f32[1,128], index: 3, kind: input, shape index: {}]   ;;  %s6118_s4 = inlined_call_operand.vmem [shape: f32[1,128], index: 4, kind: input, shape index: {}]   ;;  %s6119_s5 = inlined_call_operand.vmem [shape: f32[1,128], index: 5, kind: input, shape index: {}]   ;;  %s6120_s6 = inlined_call_operand.hbm [shape: f32[256,128], index: 6, kind: output, shape index: {}]  }
   0x1   :  { %13 = vsyncpa [#allocation3 + $0x1], 0  ;;  %s3531_s21 = smov 0   ;;  %s3533_s22 = smov 0  }
   0x2   :  { %s3535_s23 = smov 0   ;;  %s3537_s24 = smov 0  }
   0x3 LB: > { %s3552_s25 = sadd.s32 4294967295, %s3485_s24   ;;  %s3234_s26 = sadd.s32 4294967294, %s3485_s24   ;;  %s3485_s24 = sphi %s3537_s24, %s6354_s24   ;;  %s3481_s23 = sphi %s3535_s23, %s6353_s23   ;;  %s3477_s22 = sphi %s3533_s22, %s6352_s22   ;;  %s3473_s21 = sphi %s3531_s21, %s6351_s21  }
   0x4   : > { %s3556_s27 = sadd.s32 1, %s3485_s24   ;;  %s157_s28 = sadd.s32 1, %s3481_s23 }
   0x5   : > { %s154_s29 = ssub.s32 %s3485_s24, %s3556_s27  ;;  %p167_p0 = scmp.ne.s32.totalorder %s3481_s23, %s3477_s22 }
   0x6   : > { %p155_p1 = scmp.eq.s32.totalorder %s154_s29, 0  ;;  %p168_p2 = scmp.eq.s32.totalorder %s3552_s25, 1 }
   0x7   : > { %p173_p3 = scmp.ne.s32.totalorder %s3477_s22, %s3473_s21  ;;  %p174_p4 = scmp.eq.s32.totalorder %s3234_s26, 1 }
   0x8   : > { %s3567_s30 = scalar_select %p155_p1, %s3481_s23, %s157_s28  }
   0x9   : > { %p3569_p5 = por %p168_p2, %p167_p0  ;;  %p3573_p6 = por %p174_p4, %p173_p3 }
   0xa   : > { %p3237_p7 = scmp.ge.s32.totalorder %s3485_s24, 1  ;;  %p216_p8 = scmp.lt.s32.totalorder %s3485_s24, 3 }
   0xc   : > { %p217_p9 = pnand %p3237_p7, %p216_p8 }
   0xe   : > { %220 = sbr.rel (%p217_p9) target bundleno = 809 (0x329), region = 44 }
  0x13   : > { %v454_v0 = vld [vmem:[%s6116_s2 + $0x18] sm:$0xff]  ;;  %v453_v1 = vld [vmem:[%s6116_s2 + $0x10] sm:$0xff]  ;;  %s3239_s13 = sshll.u32 %s3552_s25, 4  ;;  %v452_v2 = vld [vmem:[%s6116_s2 + $0x8] sm:$0xff]  ;;  %vm285_vm0 = vcmask 261120   ;;  %s243_s12 = sand.u32 1, %s3477_s22  }
  0x14   : > { %591 = vmatpush.msra.mxu1 %v454_v0  ;;  %3331 = vmatpush.msra.mxu3 %v454_v0  ;;  %p247_p10 = scmp.lt.s32.totalorder %s3239_s13, 31  ;;  %v451_v3 = vld [vmem:[%s6116_s2] sm:$0xff]  ;;  %v337_v13 = vld [vmem:[%s6115_s1 + $0x18] sm:$0xff]  ;;  %v336_v14 = vld [vmem:[%s6115_s1 + $0x10] sm:$0xff]  ;;  %s3326_s17 = sshll.u32 %s3552_s25, 7 }
  0x15   : > { %398 = vmatpush.msra.mxu0 %v337_v13  ;;  %3327 = vmatpush.msra.mxu2 %v337_v13  ;;  %v335_v18 = vld [vmem:[%s6115_s1 + $0x8] sm:$0xff]  ;;  %v334_v23 = vld [vmem:[%s6115_s1] sm:$0xff]  ;;  %s3168_s20 = scalar_lea.hbm %s6120_s6, %s3326_s17  ;;  %s3157_s28 = scalar_lea.sflag [#allocation3], %s243_s12 }
  0x16   : > { %592 = vmatpush.msra.mxu1 %v453_v1  ;;  %3332 = vmatpush.msra.mxu3 %v453_v1  ;;  %s6356_s13 = smov (!%p247_p10, %s3239_s13), 31  ;;  %v3717_v50 = vld [vmem:[%s6117_s3] ss:$0 sm:$0xff]  ;;  %s3171_s25 = sshll.u32 %s3168_s20, 4  ;;  %s3172_s25 = int_to_ptr.hbm [resolvable:$true] %s3171_s25 }
  0x17   : > { %s3240_s18 = sshll.u32 %s6356_s13, 3  ;;  %399 = vmatpush.msra.mxu0 %v336_v14  ;;  %3328 = vmatpush.msra.mxu2 %v336_v14  ;;  %v6125_v14 = vmov 920167782   ;;  %s3238_s13 = sshll.u32 %s243_s12, 7 }
  0x18   : > { %593 = vmatpush.msra.mxu1 %v452_v2  ;;  %3333 = vmatpush.msra.mxu3 %v452_v2  ;;  %s3595_s26 = scalar_lea.vmem %s6114_s0, %s3240_s18  ;;  %s5766_s14 = scalar_lea.vmem [#allocation2], %s3238_s13 }
  0x19   : > { %v253_v4 = vld [vmem:[%s3595_s26] sm:$0xff]  ;;  %v254_v6 = vld [vmem:[%s3595_s26 + $0x8] sm:$0xff]  ;;  %v3609_v8 = vld [vmem:[%s3595_s26 + $0x10] sm:$0xff]  ;;  %400 = vmatpush.msra.mxu0 %v335_v18  ;;  %3329 = vmatpush.msra.mxu2 %v335_v18  ;;  %s3437_s29 = sshra.s32 %s3172_s25, 4  ;;  %s3443_s13 = scalar_lea.hbm %s6120_s6, 256  ;;  %s3438_s29 = int_to_ptr.hbm [resolvable:$true] %s3437_s29 }
  0x1a   : > { %594 = vmatpush.msra.mxu1 %v451_v3  ;;  %3334 = vmatpush.msra.mxu3 %v451_v3  ;;  %v261_v5 = vld [vmem:[%s3595_s26 + $0x40] sm:$0xff]  ;;  %v3603_v7 = vld [vmem:[%s3595_s26 + $0x48] sm:$0xff]  ;;  %v3612_v9 = vld [vmem:[%s3595_s26 + $0x50] sm:$0xff]  ;;  %v269_v16 = vmul.f32 %v253_v4, %v253_v4  ;;  %v271_v17 = vmul.f32 %v3609_v8, %v3609_v8  ;;  %v270_v26 = vmul.f32 %v254_v6, %v254_v6  ;;  %s3439_s9 = scalar_lea.hbm %s3438_s29, 128  ;;  %p3444_p0 = scmp.lt.s32.totalorder %s3438_s29, %s6120_s6 }
  0x1b   : > { %3257 = vmatmul.msk.f32.vlgmr.msra.gmra.mxu1 %vm285_vm0, %v253_v4  ;;  %3265 = vmatmul.msk.f32.vlgmr.msra.gmra.mxu3 %vm285_vm0, %v261_v5  ;;  %v3619_v10 = vld [vmem:[%s3595_s26 + $0x18] sm:$0xff]  ;;  %v3625_v12 = vld [vmem:[%s3595_s26 + $0x20] sm:$0xff]  ;;  %v258_v22 = vld [vmem:[%s3595_s26 + $0x28] sm:$0xff]  ;;  %v277_v33 = vmul.f32 %v261_v5, %v261_v5  ;;  %v278_v41 = vmul.f32 %v3603_v7, %v3603_v7  ;;  %v279_v42 = vmul.f32 %v3612_v9, %v3612_v9  ;;  %p3440_p11 = scmp.ne.s32.totalorder %s3438_s29, %s3439_s9  ;;  %p3445_p1 = scmp.lt.s32.totalorder %s3443_s13, %s3439_s9 }
  0x1c   : > { %v3622_v11 = vld [vmem:[%s3595_s26 + $0x58] sm:$0xff]  ;;  %v273_v15 = vmul.f32 %v3625_v12, %v3625_v12  ;;  %v286_v20 = vsel %vm285_vm0, %v269_v16, 0.0  ;;  %v292_v21 = vsel %vm285_vm0, %v271_v17, 0.0  ;;  %v265_v24 = vld [vmem:[%s3595_s26 + $0x60] sm:$0xff]  ;;  %v274_v25 = vmul.f32 %v258_v22, %v258_v22  ;;  %401 = vmatpush.msra.mxu0 %v334_v23  ;;  %3330 = vmatpush.msra.mxu2 %v334_v23  ;;  %v259_v31 = vld [vmem:[%s3595_s26 + $0x30] sm:$0xff] }
  0x1d   : > { %287 = vadd.xlane.f32.xlu0 %v286_v20  ;;  %293 = vadd.xlane.f32.xlu1 %v292_v21  ;;  %v272_v27 = vmul.f32 %v3619_v10, %v3619_v10  ;;  %v289_v29 = vsel %vm285_vm0, %v270_v26, 0.0  ;;  %v3664_v32 = vld [vmem:[%s3595_s26 + $0x68] sm:$0xff]  ;;  %v275_v34 = vmul.f32 %v259_v31, %v259_v31  ;;  %v260_v35 = vld [vmem:[%s3595_s26 + $0x38] sm:$0xff]  ;;  %v310_v37 = vsel %vm285_vm0, %v277_v33, 0.0  ;;  %v3677_v40 = vld [vmem:[%s3595_s26 + $0x70] sm:$0xff]  ;;  %p3441_p12 = pnand %p3440_p11, %p3569_p5  ;;  %p3446_p2 = por %p3445_p1, %p3444_p0 }
  0x1e   : > { %v298_v19 = vsel %vm285_vm0, %v273_v15, 0.0  ;;  %3241 = vmatmul.msk.f32.vlgmr.msra.gmra.mxu0 %vm285_vm0, %v253_v4  ;;  %3249 = vmatmul.msk.f32.vlgmr.msra.gmra.mxu2 %vm285_vm0, %v261_v5  ;;  %v301_v28 = vsel %vm285_vm0, %v274_v25, 0.0  ;;  %v276_v36 = vmul.f32 %v260_v35, %v260_v35  ;;  %v313_v43 = vsel %vm285_vm0, %v278_v41, 0.0  ;;  %v268_v47 = vld [vmem:[%s3595_s26 + $0x78] sm:$0xff] }
  0x1f   : > { %299 = vadd.xlane.f32.xlu2 %v298_v19  ;;  %v295_v30 = vsel %vm285_vm0, %v272_v27, 0.0  ;;  %v304_v38 = vsel %vm285_vm0, %v275_v34, 0.0  ;;  %v280_v44 = vmul.f32 %v3622_v11, %v3622_v11  ;;  %v316_v45 = vsel %vm285_vm0, %v279_v42, 0.0  ;;  %p3442_p13 = pneg %p3441_p12 }
  0x20   : > { %v307_v39 = vsel %vm285_vm0, %v276_v36, 0.0  ;;  %v281_v48 = vmul.f32 %v265_v24, %v265_v24  ;;  %v6123_v23 = vmov 1326507024  }
  0x21   : > { %v319_v46 = vsel %vm285_vm0, %v280_v44, 0.0  ;;  %p3447_p3 = pnand %p3446_p2, %p3442_p13 }
  0x22   : > { %v322_v49 = vsel %vm285_vm0, %v281_v48, 0.0 }
  0x23   : > { %3258 = vmatmul.msk.f32.gmra.mxu1 %vm285_vm0, %v254_v6  ;;  %3266 = vmatmul.msk.f32.gmra.mxu3 %vm285_vm0, %v3603_v7 }
  0x25   : > { %290 = vadd.xlane.f32.xlu0 %v289_v29  ;;  %296 = vadd.xlane.f32.xlu1 %v295_v30 }
  0x26   : > { %3242 = vmatmul.msk.f32.gmra.mxu0 %vm285_vm0, %v254_v6  ;;  %3250 = vmatmul.msk.f32.gmra.mxu2 %vm285_vm0, %v3603_v7  ;;  %v6136_v6 = vmov 683565275  }
  0x27   : > { %302 = vadd.xlane.f32.xlu2 %v301_v28 }
  0x2b   : > { %3259 = vmatmul.msk.f32.gmra.mxu1 %vm285_vm0, %v3609_v8  ;;  %3267 = vmatmul.msk.f32.gmra.mxu3 %vm285_vm0, %v3612_v9 }
  0x2d   : > { %305 = vadd.xlane.f32.xlu0 %v304_v38  ;;  %308 = vadd.xlane.f32.xlu1 %v307_v39 }
  0x2e   : > { %3243 = vmatmul.msk.f32.gmra.mxu0 %vm285_vm0, %v3609_v8  ;;  %3251 = vmatmul.msk.f32.gmra.mxu2 %vm285_vm0, %v3612_v9  ;;  %v6132_v8 = vmov 2475754826  }
  0x2f   : > { %311 = vadd.xlane.f32.xlu2 %v310_v37 }
  0x33   : > { %3260 = vmatmul.msk.f32.gmra.mxu1 %vm285_vm0, %v3619_v10  ;;  %3268 = vmatmul.msk.f32.gmra.mxu3 %vm285_vm0, %v3622_v11 }
  0x35   : > { %314 = vadd.xlane.f32.xlu0 %v313_v43  ;;  %317 = vadd.xlane.f32.xlu1 %v316_v45 }
  0x36   : > { %3244 = vmatmul.msk.f32.gmra.mxu0 %vm285_vm0, %v3619_v10  ;;  %3252 = vmatmul.msk.f32.gmra.mxu2 %vm285_vm0, %v3622_v11  ;;  %v6127_v10 = vmov 2131351028  }
  0x37   : > { %320 = vadd.xlane.f32.xlu2 %v319_v46 }
  0x3b   : > { %3261 = vmatmul.msk.f32.gmra.mxu1 %vm285_vm0, %v3625_v12  ;;  %3269 = vmatmul.msk.f32.gmra.mxu3 %vm285_vm0, %v265_v24 }
  0x3d   : > { %323 = vadd.xlane.f32.xlu0 %v322_v49 }
  0x3e   : > { %3245 = vmatmul.msk.f32.gmra.mxu0 %vm285_vm0, %v3625_v12  ;;  %3253 = vmatmul.msk.f32.gmra.mxu2 %vm285_vm0, %v265_v24  ;;  %v6130_v12 = vmov 2102212464  }
  0x43   : > { %3262 = vmatmul.msk.f32.gmra.mxu1 %vm285_vm0, %v258_v22  ;;  %3270 = vmatmul.msk.f32.gmra.mxu3 %vm285_vm0, %v3664_v32 }
  0x46   : > { %3246 = vmatmul.msk.f32.gmra.mxu0 %vm285_vm0, %v258_v22  ;;  %3254 = vmatmul.msk.f32.gmra.mxu2 %vm285_vm0, %v3664_v32 }
  0x4b   : > { %3263 = vmatmul.msk.f32.gmra.mxu1 %vm285_vm0, %v259_v31  ;;  %3271 = vmatmul.msk.f32.gmra.mxu3 %vm285_vm0, %v3677_v40 }
  0x4e   : > { %3247 = vmatmul.msk.f32.gmra.mxu0 %vm285_vm0, %v259_v31  ;;  %3255 = vmatmul.msk.f32.gmra.mxu2 %vm285_vm0, %v3677_v40 }
  0x53   : > { %3264 = vmatmul.msk.f32.gmra.mxu1 %vm285_vm0, %v260_v35  ;;  %3272 = vmatmul.msk.f32.gmra.mxu3 %vm285_vm0, %v268_v47 }
  0x56   : > { %3248 = vmatmul.msk.f32.gmra.mxu0 %vm285_vm0, %v260_v35  ;;  %3256 = vmatmul.msk.f32.gmra.mxu2 %vm285_vm0, %v268_v47 }
  0x98   : > { %v596_v51 = vpop.f32.mrf.mxu1 }
  0x99   : > { %v3720_v52 = vadd.f32 %v3717_v50, %v596_v51 }
  0x9b   : > { %v647_v53 = vand.u32 2139095040, %v3720_v52  ;;  %v644_v54 = vand.u32 2147483647, %v3720_v52 }
  0x9d   : > { %v648_v55 = vshrl.u32 %v647_v53, 23  ;;  %v651_v59 = vand.u32 8388607, %v644_v54 }
  0x9e   : > { %v620_v56 = vpop.f32.mrf.mxu3 }
  0x9f   : > { %v3273_v57 = vadd.s32 4294967169, %v648_v55  ;;  %v3725_v58 = vadd.f32 %v3717_v50, %v620_v56  ;;  %v652_v62 = vor.u32 8388608, %v651_v59 }
  0xa1   : > { %6209 = vst [vmem:[#allocation5_spill] sm:$0xff] %v3725_v58  ;;  %v654_v60 = vadd.s32 1, %v3273_v57  ;;  %v1887_v61 = vand.u32 2139095040, %v3725_v58  ;;  %v1884_v0 = vand.u32 2147483647, %v3725_v58  ;;  %v3736_v16 = vshll.u32 %v652_v62, 8 }
  0xa3   : > { %vm655_vm1 = vcmp.gt.s32.totalorder %v654_v60, 0  ;;  %v1888_v1 = vshrl.u32 %v1887_v61, 23  ;;  %v1891_v17 = vand.u32 8388607, %v1884_v0  ;;  %v693_v31 = vand.u32 65535, %v3736_v16 }
  0xa4   : > { %v656_v63 = vsel %vm655_vm1, %v654_v60, 0  ;;  %v694_v46 = vshrl.u32 %v3736_v16, 16 }
  0xa5   : > { %v657_v2 = vshrl.u32 %v656_v63, 5  ;;  %v658_v3 = vand.u32 31, %v656_v63  ;;  %v3297_v4 = vadd.s32 4294967169, %v1888_v1  ;;  %v1892_v36 = vor.u32 8388608, %v1891_v17 }
  0xa7   : > { %v659_v5 = vsub.s32 32, %v658_v3  ;;  %v661_v7 = vshll.u32 %v6136_v6, %v658_v3  ;;  %v664_v9 = vshll.u32 %v6132_v8, %v658_v3  ;;  %v667_v11 = vshll.u32 %v6127_v10, %v658_v3 }
  0xa8   : > { %v670_v13 = vshll.u32 %v6130_v12, %v658_v3  ;;  %v673_v15 = vshll.u32 %v6125_v14, %v658_v3  ;;  %vm676_vm2 = vcmp.lt.s32.totalorder %v657_v2, 1  ;;  %vm679_vm3 = vcmp.lt.s32.totalorder %v657_v2, 4 }
  0xa9   : > { %v662_v18 = vshrl.u32 %v6132_v8, %v659_v5  ;;  %v665_v19 = vshrl.u32 %v6127_v10, %v659_v5  ;;  %v668_v20 = vshrl.u32 %v6130_v12, %v659_v5  ;;  %v660_v21 = vshrl.u32 %v6136_v6, %v659_v5 }
  0xaa   : > { %v671_v22 = vshrl.u32 %v6125_v14, %v659_v5  ;;  %v674_v24 = vshrl.u32 %v6123_v23, %v659_v5  ;;  %v1894_v28 = vadd.s32 1, %v3297_v4  ;;  %vm678_vm4 = vcmp.lt.s32.totalorder %v657_v2, 3 }
  0xab   : > { %v663_v25 = vor.u32 %v662_v18, %v661_v7  ;;  %v666_v26 = vor.u32 %v665_v19, %v664_v9  ;;  %v669_v27 = vor.u32 %v668_v20, %v667_v11  ;;  %vm677_vm5 = vcmp.lt.s32.totalorder %v657_v2, 2 }
  0xac   : > { %v672_v29 = vor.u32 %v671_v22, %v670_v13  ;;  %v675_v30 = vor.u32 %v674_v24, %v673_v15  ;;  %vm1895_vm6 = vcmp.gt.s32.totalorder %v1894_v28, 0  ;;  %v3756_v56 = vshll.u32 %v1892_v36, 8 }
  0xad   : > { %v681_v33 = vsel %vm679_vm3, %v669_v27, 2102212464  ;;  %v684_v34 = vsel %vm676_vm2, %v663_v25, %v666_v26  ;;  %v688_v35 = vsel %vm676_vm2, %v666_v26, %v669_v27  ;;  %v680_v39 = vsel %vm676_vm2, %v660_v21, %v663_v25 }
  0xae   : > { %v685_v37 = vsel %vm679_vm3, %v672_v29, 920167782  ;;  %v689_v38 = vsel %vm679_vm3, %v675_v30, 1326507024  ;;  %v682_v41 = vsel %vm678_vm4, %v666_v26, %v681_v33  ;;  %v1896_v47 = vsel %vm1895_vm6, %v1894_v28, 0 }
  0xaf   : > { %v686_v42 = vsel %vm678_vm4, %v669_v27, %v685_v37  ;;  %v690_v43 = vsel %vm678_vm4, %v672_v29, %v689_v38  ;;  %v3754_v55 = vsel %vm677_vm5, %v680_v39, %v682_v41  ;;  %v3758_v60 = vshrl.u32 %v1896_v47, 5 }
  0xb0   : > { %v687_v44 = vsel %vm677_vm5, %v684_v34, %v686_v42  ;;  %v691_v45 = vsel %vm677_vm5, %v688_v35, %v690_v43  ;;  %v1898_v61 = vand.u32 31, %v1896_v47  ;;  %v6141_v20 = vmov 0  }
  0xb1   : > { %v695_v48 = vand.u32 65535, %v691_v45  ;;  %v696_v49 = vshrl.u32 %v691_v45, 16  ;;  %v717_v51 = vand.u32 65535, %v687_v44  ;;  %v718_v53 = vshrl.u32 %v687_v44, 16 }
  0xb2   : > { %v3760_v19 = vsub.s32 32, %v1898_v61  ;;  %v1901_v27 = vshll.u32 %v6136_v6, %v1898_v61  ;;  %v1904_v30 = vshll.u32 %v6132_v8, %v1898_v61  ;;  %v1907_v37 = vshll.u32 %v6127_v10, %v1898_v61 }
  0xb3   : > { %v698_v57 = vmul.u32 %v696_v49, %v693_v31  ;;  %v699_v59 = vmul.u32 %v695_v48, %v694_v46  ;;  %v697_v62 = vmul.u32 %v695_v48, %v693_v31  ;;  %v700_v63 = vmul.u32 %v696_v49, %v694_v46  ;;  %v599_v49 = vpop.f32.mrf.mxu1 }
  0xb4   : > { %v720_v1 = vmul.u32 %v718_v53, %v693_v31  ;;  %v721_v3 = vmul.u32 %v717_v51, %v694_v46  ;;  %v719_v7 = vmul.u32 %v717_v51, %v693_v31  ;;  %v722_v9 = vmul.u32 %v718_v53, %v694_v46 }
  0xb5   : > { %v701_v4 = vshll.u32 %v698_v57, 16  ;;  %v702_v5 = vshrl.u32 %v698_v57, 16  ;;  %v703_v11 = vshll.u32 %v699_v59, 16  ;;  %v704_v13 = vshrl.u32 %v699_v59, 16 }
  0xb6   : > { %v723_v2 = vshll.u32 %v720_v1, 16  ;;  %v724_v15 = vshrl.u32 %v720_v1, 16  ;;  %v725_v18 = vshll.u32 %v721_v3, 16  ;;  %v726_v22 = vshrl.u32 %v721_v3, 16 }
  0xb7   : > { %vm705_vm7 = vc.u32 %v697_v62, %v701_v4  ;;  %v707_v17 = vadd.s32 %v701_v4, %v697_v62  ;;  %v1902_v34 = vshrl.u32 %v6132_v8, %v3760_v19  ;;  %v1905_v35 = vshrl.u32 %v6127_v10, %v3760_v19 }
  0xb8   : > { %v706_v21 = vsel %vm705_vm7, 1, %v6141_v20  ;;  %vm727_vm8 = vc.u32 %v719_v7, %v723_v2  ;;  %v729_v24 = vadd.s32 %v723_v2, %v719_v7  ;;  %v1908_v38 = vshrl.u32 %v6130_v12, %v3760_v19 }
  0xb9   : > { %v708_v25 = vadd.s32 %v706_v21, %v700_v63  ;;  %vm709_vm9 = vc.u32 %v707_v17, %v703_v11  ;;  %v728_v26 = vsel %vm727_vm8, 1, %v6141_v20  ;;  %v1910_v39 = vshll.u32 %v6130_v12, %v1898_v61 }
  0xba   : > { %v710_v28 = vsel %vm709_vm9, 1, %v6141_v20  ;;  %v730_v29 = vadd.s32 %v728_v26, %v722_v9  ;;  %vm731_vm10 = vc.u32 %v729_v24, %v725_v18  ;;  %v3776_v42 = vor.u32 %v1902_v34, %v1901_v27 }
  0xbb   : > { %v712_v31 = vadd.s32 %v710_v28, %v708_v25  ;;  %v732_v33 = vsel %vm731_vm10, 1, %v6141_v20  ;;  %v3778_v43 = vor.u32 %v1905_v35, %v1904_v30  ;;  %v1911_v44 = vshrl.u32 %v6125_v14, %v3760_v19 }
  0xbc   : > { %v734_v36 = vadd.s32 %v732_v33, %v730_v29  ;;  %v3782_v46 = vor.u32 %v1908_v38, %v1907_v37  ;;  %v1913_v47 = vshll.u32 %v6125_v14, %v1898_v61  ;;  %v1914_v48 = vshrl.u32 %v6123_v23, %v3760_v19 }
  0xbd   : > { %v713_v41 = vadd.s32 %v712_v31, %v702_v5  ;;  %v3789_v53 = vadd.s32 %v729_v24, %v725_v18  ;;  %v1912_v57 = vor.u32 %v1911_v44, %v1910_v39  ;;  %vm1916_vm11 = vcmp.lt.s32.totalorder %v3758_v60, 1 }
  0xbe   : > { %v735_v45 = vadd.s32 %v734_v36, %v724_v15  ;;  %v1915_v62 = vor.u32 %v1914_v48, %v1913_v47  ;;  %vm1919_vm12 = vcmp.lt.s32.totalorder %v3758_v60, 4  ;;  %v1924_v61 = vsel %vm1916_vm11, %v3776_v42, %v3778_v43 }
  0xbf   : > { %v3787_v51 = vadd.s32 %v713_v41, %v704_v13  ;;  %vm1918_vm14 = vcmp.lt.s32.totalorder %v3758_v60, 3  ;;  %v1925_v63 = vsel %vm1919_vm12, %v1912_v57, 920167782  ;;  %v3803_v1 = vadd.f32 %v3717_v50, %v599_v49 }
  0xc0   : > { %v736_v59 = vadd.s32 %v735_v45, %v726_v22  ;;  %vm1917_vm15 = vcmp.lt.s32.totalorder %v3758_v60, 2  ;;  %v1926_v4 = vsel %vm1918_vm14, %v3782_v46, %v1925_v63  ;;  %v1928_v5 = vsel %vm1916_vm11, %v3778_v43, %v3782_v46 }
  0xc1   : > { %vm739_vm13 = vc.u32 %v3787_v51, %v3789_v53  ;;  %6210 = vst [vmem:[#allocation6_spill] sm:$0xff] %v3803_v1  ;;  %v737_v7 = vmul.u32 %v3736_v16, %v3754_v55  ;;  %v1927_v9 = vsel %vm1917_vm15, %v1924_v61, %v1926_v4  ;;  %v1929_v11 = vsel %vm1919_vm12, %v1915_v62, 1326507024 }
  0xc2   : > { %v740_v3 = vadd.s32 1, %v736_v59  ;;  %v1933_v13 = vand.u32 65535, %v3756_v56  ;;  %v1930_v15 = vsel %vm1918_vm14, %v1912_v57, %v1929_v11  ;;  %v1957_v17 = vand.u32 65535, %v1927_v9 }
  0xc3   : > { %v1958_v18 = vshrl.u32 %v1927_v9, 16  ;;  %v1931_v22 = vsel %vm1917_vm15, %v1928_v5, %v1930_v15  ;;  %v1934_v16 = vshrl.u32 %v3756_v56, 16  ;;  %v802_v55 = vand.u32 2139095040, %v3803_v1 }
  0xc4   : > { %v741_v2 = vsel %vm739_vm13, %v740_v3, %v736_v59  ;;  %v1935_v24 = vand.u32 65535, %v1931_v22  ;;  %v1936_v25 = vshrl.u32 %v1931_v22, 16  ;;  %v1959_v33 = vmul.u32 %v1957_v17, %v1933_v13 }
  0xc5   : > { %v742_v21 = vadd.s32 %v741_v2, %v737_v7  ;;  %v1960_v26 = vmul.u32 %v1958_v18, %v1933_v13  ;;  %v1961_v28 = vmul.u32 %v1957_v17, %v1934_v16  ;;  %v803_v35 = vshrl.u32 %v802_v55, 23 }
  0xc6   : > { %v1938_v29 = vmul.u32 %v1936_v25, %v1933_v13  ;;  %v1939_v30 = vmul.u32 %v1935_v24, %v1934_v16  ;;  %v1937_v36 = vmul.u32 %v1935_v24, %v1933_v13  ;;  %v1940_v37 = vmul.u32 %v1936_v25, %v1934_v16 }
  0xc7   : > { %v743_v27 = vadd.s32 536870912, %v742_v21  ;;  %v1963_v34 = vshll.u32 %v1960_v26, 16  ;;  %v1962_v39 = vmul.u32 %v1958_v18, %v1934_v16  ;;  %v1965_v45 = vshll.u32 %v1961_v28, 16 }
  0xc8   : > { %v1941_v38 = vshll.u32 %v1938_v29, 16  ;;  %v1943_v44 = vshll.u32 %v1939_v30, 16  ;;  %v3276_v62 = vadd.s32 4294967169, %v803_v35  ;;  %v1900_v4 = vshrl.u32 %v6136_v6, %v3760_v19 }
  0xc9   : > { %v3826_v31 = vshrl.u32 %v743_v27, 30  ;;  %vm1967_vm1 = vc.u32 %v1959_v33, %v1963_v34  ;;  %v1969_v49 = vadd.s32 %v1963_v34, %v1959_v33  ;;  %v1942_v5 = vshrl.u32 %v1938_v29, 16 }
  0xca   : > { %vm1945_vm2 = vc.u32 %v1937_v36, %v1941_v38  ;;  %v1947_v47 = vadd.s32 %v1941_v38, %v1937_v36  ;;  %v1968_v48 = vsel %vm1967_vm1, 1, %v6141_v20  ;;  %v1921_v11 = vsel %vm1919_vm12, %v3782_v46, 2102212464 }
  0xcb   : > { %v745_v41 = vshll.u32 %v3826_v31, 30  ;;  %v1946_v57 = vsel %vm1945_vm2, 1, %v6141_v20  ;;  %v1970_v59 = vadd.s32 %v1968_v48, %v1962_v39  ;;  %vm1971_vm4 = vc.u32 %v1969_v49, %v1965_v45 }
  0xcc   : > { %v1948_v63 = vadd.s32 %v1946_v57, %v1940_v37  ;;  %vm1949_vm3 = vc.u32 %v1947_v47, %v1943_v44  ;;  %v1972_v9 = vsel %vm1971_vm4, 1, %v6141_v20  ;;  %v1964_v13 = vshrl.u32 %v1960_v26, 16 }
  0xcd   : > { %v3831_v61 = vsub.s32 %v742_v21, %v745_v41  ;;  %v1950_v3 = vsel %vm1949_vm3, 1, %v6141_v20  ;;  %v1974_v2 = vadd.s32 %v1972_v9, %v1970_v59  ;;  %v809_v15 = vadd.s32 1, %v3276_v62 }
  0xce   : > { %v1952_v7 = vadd.s32 %v1950_v3, %v1948_v63  ;;  %v1944_v18 = vshrl.u32 %v1939_v30, 16  ;;  %v1966_v22 = vshrl.u32 %v1961_v28, 16  ;;  %v282_v19 = vmul.f32 %v3664_v32, %v3664_v32 }
  0xcf   : > { %v748_v17 = vsub.s32 0, %v3831_v61  ;;  %vm747_vm5 = vcmp.lt.s32.totalorder %v3831_v61, 0  ;;  %v1975_v16 = vadd.s32 %v1974_v2, %v1964_v13  ;;  %vm810_vm6 = vcmp.gt.s32.totalorder %v809_v15, 0 }
  0xd0   : > { %v1953_v21 = vadd.s32 %v1952_v7, %v1942_v5  ;;  %v811_v24 = vsel %vm810_vm6, %v809_v15, 0  ;;  %v1920_v46 = vsel %vm1916_vm11, %v1900_v4, %v3776_v42  ;;  %v799_v26 = vand.u32 2147483647, %v3803_v1 }
  0xd1   : > { %v1976_v25 = vadd.s32 %v1975_v16, %v1966_v22  ;;  %v813_v27 = vand.u32 31, %v811_v24  ;;  %v749_v28 = vsel %vm747_vm5, %v748_v17, %v3831_v61  ;;  %v1922_v29 = vsel %vm1918_vm14, %v3778_v43, %v1921_v11 }
  0xd2   : > { %v3844_v55 = vadd.s32 %v1953_v21, %v1944_v18  ;;  %v3854_v30 = vadd.s32 %v1969_v49, %v1965_v45  ;;  %v325_v32 = vsel %vm285_vm0, %v282_v19, 0.0  ;;  %v750_v42 = vclz %v749_v28 }
  0xd3   : > { %v1980_v33 = vadd.s32 1, %v1976_v25  ;;  %v3857_v34 = vsub.s32 32, %v813_v27  ;;  %326 = vadd.xlane.f32.xlu1 %v325_v32  ;;  %v1923_v35 = vsel %vm1917_vm15, %v1920_v46, %v1922_v29  ;;  %v806_v36 = vand.u32 8388607, %v799_v26 }
  0xd4   : > { %vm1979_vm7 = vc.u32 %v3844_v55, %v3854_v30  ;;  %v3865_v37 = vshrl.u32 %v811_v24, 5  ;;  %v816_v43 = vshll.u32 %v6136_v6, %v813_v27  ;;  %v819_v39 = vshll.u32 %v6132_v8, %v813_v27 }
  0xd5   : > { %v817_v38 = vshrl.u32 %v6132_v8, %v3857_v34  ;;  %v820_v41 = vshrl.u32 %v6127_v10, %v3857_v34  ;;  %v1981_v44 = vsel %vm1979_vm7, %v1980_v33, %v1976_v25  ;;  %v822_v45 = vshll.u32 %v6127_v10, %v813_v27 }
  0xd6   : > { %v823_v60 = vshrl.u32 %v6130_v12, %v3857_v34  ;;  %v825_v47 = vshll.u32 %v6130_v12, %v813_v27  ;;  %v1977_v48 = vmul.u32 %v3756_v56, %v1923_v35  ;;  %v826_v49 = vshrl.u32 %v6125_v14, %v3857_v34 }
  0xd7   : > { %v3274_v57 = vadd.s32 4294967294, %v750_v42  ;;  %v807_v59 = vor.u32 8388608, %v806_v36  ;;  %v828_v62 = vshll.u32 %v6125_v14, %v813_v27  ;;  %v829_v63 = vshrl.u32 %v6123_v23, %v3857_v34 }
  0xd8   : > { %v1982_v3 = vadd.s32 %v1981_v44, %v1977_v48  ;;  %v3883_v4 = vor.u32 %v817_v38, %v816_v43  ;;  %v3885_v5 = vor.u32 %v820_v41, %v819_v39  ;;  %v827_v7 = vor.u32 %v826_v49, %v825_v47 }
  0xd9   : > { %v824_v9 = vor.u32 %v823_v60, %v822_v45  ;;  %v830_v11 = vor.u32 %v829_v63, %v828_v62  ;;  %vm831_vm8 = vcmp.lt.s32.totalorder %v3865_v37, 1  ;;  %vm834_vm9 = vcmp.lt.s32.totalorder %v3865_v37, 4  ;;  %v623_v45 = vpop.f32.mrf.mxu3 }
  0xda   : > { %vm833_vm10 = vcmp.lt.s32.totalorder %v3865_v37, 3  ;;  %v840_v56 = vsel %vm834_vm9, %v827_v7, 920167782  ;;  %vm3275_vm11 = vcmp.lt.s32.totalorder %v3274_v57, 0  ;;  %v839_v13 = vsel %vm831_vm8, %v3883_v4, %v3885_v5 }
  0xdb   : > { %v3896_v2 = vshll.u32 %v807_v59, 8  ;;  %v1983_v15 = vadd.s32 536870912, %v1982_v3  ;;  %v841_v17 = vsel %vm833_vm10, %v824_v9, %v840_v56  ;;  %v843_v18 = vsel %vm831_vm8, %v3885_v5, %v824_v9 }
  0xdc   : > { %v844_v21 = vsel %vm834_vm9, %v830_v11, 1326507024  ;;  %vm832_vm12 = vcmp.lt.s32.totalorder %v3865_v37, 2  ;;  %v753_v19 = vsel %vm3275_vm11, 0, %v3274_v57  ;;  %v738_v60 = vadd.s32 %v3789_v53, %v3787_v51 }
  0xdd   : > { %v842_v22 = vsel %vm832_vm12, %v839_v13, %v841_v17  ;;  %v845_v16 = vsel %vm833_vm10, %v827_v7, %v844_v21  ;;  %v3912_v46 = vshrl.u32 %v1983_v15, 30  ;;  %v848_v25 = vand.u32 65535, %v3896_v2 }
  0xde   : > { %v846_v24 = vsel %vm832_vm12, %v843_v18, %v845_v16  ;;  %v849_v29 = vshrl.u32 %v3896_v2, 16  ;;  %v873_v32 = vshrl.u32 %v842_v22, 16  ;;  %v758_v33 = vsub.s32 4294967266, %v753_v19 }
  0xdf   : > { %v850_v27 = vand.u32 65535, %v846_v24  ;;  %v851_v28 = vshrl.u32 %v846_v24, 16  ;;  %v872_v36 = vand.u32 65535, %v842_v22  ;;  %v1985_v43 = vshll.u32 %v3912_v46, 30 }
  0xe0   : > { %v875_v41 = vmul.u32 %v873_v32, %v848_v25  ;;  %v754_v44 = vsub.s32 32, %v753_v19  ;;  %v759_v47 = vadd.s32 127, %v758_v33  ;;  %v3923_v56 = vadd.f32 %v3717_v50, %v623_v45 }
  0xe1   : > { %v853_v42 = vmul.u32 %v851_v28, %v848_v25  ;;  %v854_v35 = vmul.u32 %v850_v27, %v849_v29  ;;  %v852_v38 = vmul.u32 %v850_v27, %v848_v25  ;;  %v855_v48 = vmul.u32 %v851_v28, %v849_v29 }
  0xe2   : > { %v876_v62 = vmul.u32 %v872_v36, %v849_v29  ;;  %v3920_v63 = vsub.s32 %v1982_v3, %v1985_v43  ;;  %v878_v11 = vshll.u32 %v875_v41, 16  ;;  %6211 = vst [vmem:[#allocation7_spill] sm:$0xff] %v3923_v56  ;;  %v756_v13 = vshrl.u32 %v738_v60, %v754_v44 }
  0xe3   : > { %v856_v39 = vshll.u32 %v853_v42, 16  ;;  %v858_v49 = vshll.u32 %v854_v35, 16  ;;  %v815_v15 = vshrl.u32 %v6136_v6, %v3857_v34  ;;  %v874_v51 = vmul.u32 %v872_v36, %v848_v25 }
  0xe4   : > { %v760_v53 = vshll.u32 %v759_v47, 23  ;;  %v857_v17 = vshrl.u32 %v853_v42, 16  ;;  %v877_v21 = vmul.u32 %v873_v32, %v849_v29  ;;  %v880_v16 = vshll.u32 %v876_v62, 16 }
  0xe5   : > { %vm860_vm13 = vc.u32 %v852_v38, %v856_v39  ;;  %v862_v59 = vadd.s32 %v856_v39, %v852_v38  ;;  %vm882_vm15 = vc.u32 %v874_v51, %v878_v11  ;;  %v884_v3 = vadd.s32 %v878_v11, %v874_v51 }
  0xe6   : > { %v861_v57 = vsel %vm860_vm13, 1, %v6141_v20  ;;  %v755_v24 = vshll.u32 %v3831_v61, %v753_v19  ;;  %v1988_v27 = vsub.s32 0, %v3920_v63  ;;  %v836_v28 = vsel %vm834_vm9, %v824_v9, 2102212464 }
  0xe7   : > { %v863_v7 = vadd.s32 %v861_v57, %v855_v48  ;;  %vm864_vm14 = vc.u32 %v862_v59, %v858_v49  ;;  %v883_v34 = vsel %vm882_vm15, 1, %v6141_v20  ;;  %vm1987_vm1 = vcmp.lt.s32.totalorder %v3920_v63, 0 }
  0xe8   : > { %v865_v18 = vsel %vm864_vm14, 1, %v6141_v20  ;;  %v885_v33 = vadd.s32 %v883_v34, %v877_v21  ;;  %vm886_vm2 = vc.u32 %v884_v3, %v880_v16  ;;  %v761_v42 = vor.u32 4788187, %v760_v53 }
  0xe9   : > { %v867_v22 = vadd.s32 %v865_v18, %v863_v7  ;;  %v859_v29 = vshrl.u32 %v854_v35, 16  ;;  %v887_v32 = vsel %vm886_vm2, 1, %v6141_v20  ;;  %v2042_v36 = vand.u32 2139095040, %v3923_v56 }
  0xea   : > { %v757_v43 = vor.u32 %v756_v13, %v755_v24  ;;  %v835_v61 = vsel %vm831_vm8, %v815_v15, %v3883_v4  ;;  %v879_v19 = vshrl.u32 %v875_v41, 16  ;;  %v889_v9 = vadd.s32 %v887_v32, %v885_v33 }
  0xeb   : > { %v868_v25 = vadd.s32 %v867_v22, %v857_v17  ;;  %v1989_v38 = vsel %vm1987_vm1, %v1988_v27, %v3920_v63  ;;  %v837_v39 = vsel %vm833_vm10, %v3885_v5, %v836_v28  ;;  %v2043_v35 = vshrl.u32 %v2042_v36, 23  ;;  %v602_v5 = vpop.f32.mrf.mxu1 }
  0xec   : > { %v881_v45 = vshrl.u32 %v876_v62, 16  ;;  %v890_v60 = vadd.s32 %v889_v9, %v879_v19  ;;  %v762_v47 = vand.u32 2147483647, %v761_v42  ;;  %v3945_v48 = vadd.s32 %v884_v3, %v880_v16 }
  0xed   : > { %v3943_v44 = vadd.s32 %v868_v25, %v859_v29  ;;  %v3300_v49 = vadd.s32 4294967169, %v2043_v35  ;;  %v1990_v57 = vclz %v1989_v38  ;;  %v838_v4 = vsel %vm832_vm12, %v835_v61, %v837_v39 }
  0xee   : > { %v891_v41 = vadd.s32 %v890_v60, %v881_v45  ;;  %v764_v59 = vcvt.s32.f32 %v757_v43  ;;  %v283_v62 = vmul.f32 %v3677_v40, %v3677_v40  ;;  %v892_v15 = vmul.u32 %v3896_v2, %v838_v4 }
  0xef   : > { %vm894_vm3 = vc.u32 %v3943_v44, %v3945_v48  ;;  %v2049_v7 = vadd.s32 1, %v3300_v49  ;;  %v2039_v51 = vand.u32 2147483647, %v3923_v56  ;;  %v3298_v53 = vadd.s32 4294967294, %v1990_v57 }
  0xf0   : > { %v895_v11 = vadd.s32 1, %v891_v41  ;;  %v765_v13 = vmul.f32 %v764_v59, %v762_v47  ;;  %v3956_v18 = vadd.f32 %v3717_v50, %v602_v5  ;;  %v328_v16 = vsel %vm285_vm0, %v283_v62, 0.0 }
  0xf1   : > { %vm2050_vm4 = vcmp.gt.s32.totalorder %v2049_v7, 0  ;;  %vm646_vm5 = vcmp.lt.s32.totalorder %v3720_v52, 0  ;;  %329 = vadd.xlane.f32.xlu2 %v328_v16  ;;  %vm3299_vm6 = vcmp.lt.s32.totalorder %v3298_v53, 0  ;;  %v2046_v2 = vand.u32 8388607, %v2039_v51 }
  0xf2   : > { %v896_v37 = vsel %vm894_vm3, %v895_v11, %v891_v41  ;;  %v2051_v17 = vsel %vm2050_vm4, %v2049_v7, 0  ;;  %6212 = vst [vmem:[#allocation8_spill] sm:$0xff] %v3956_v18  ;;  %v766_v3 = vxor.u32 2147483648, %v765_v13  ;;  %v957_v50 = vand.u32 2139095040, %v3956_v18 }
  0xf3   : > { %v897_v21 = vadd.s32 %v896_v37, %v892_v15  ;;  %v2053_v22 = vand.u32 31, %v2051_v17  ;;  %v3983_v19 = vshrl.u32 %v2051_v17, 5  ;;  %vm3993_vm7 = vcmp.le.f32.partialorder %v644_v54, 0.7853982 }
  0xf4   : > { %v767_v43 = vsel %vm646_vm5, %v766_v3, %v765_v13  ;;  %v3998_v47 = vsel %vm3299_vm6, 0, %v3298_v53  ;;  %v2047_v57 = vor.u32 8388608, %v2046_v2  ;;  %v958_v7 = vshrl.u32 %v957_v50, 23 }
  0xf5   : > { %v898_v40 = vadd.s32 536870912, %v897_v21  ;;  %v3960_v24 = vsub.s32 32, %v2053_v22  ;;  %v2056_v27 = vshll.u32 %v6136_v6, %v2053_v22  ;;  %v2059_v25 = vshll.u32 %v6132_v8, %v2053_v22 }
  0xf6   : > { %v2065_v33 = vshll.u32 %v6130_v12, %v2053_v22  ;;  %v2062_v9 = vshll.u32 %v6127_v10, %v2053_v22  ;;  %v2068_v45 = vshll.u32 %v6125_v14, %v2053_v22  ;;  %v4005_v4 = vsel %vm3993_vm7, %v3720_v52, %v767_v43 }
  0xf7   : > { %v3966_v28 = vshrl.u32 %v898_v40, 30  ;;  %v2057_v34 = vshrl.u32 %v6132_v8, %v3960_v24  ;;  %v2060_v42 = vshrl.u32 %v6127_v10, %v3960_v24  ;;  %v2063_v29 = vshrl.u32 %v6130_v12, %v3960_v24 }
  0xf8   : > { %v2066_v32 = vshrl.u32 %v6125_v14, %v3960_v24  ;;  %v2069_v36 = vshrl.u32 %v6123_v23, %v3960_v24  ;;  %vm2071_vm9 = vcmp.lt.s32.totalorder %v3983_v19, 1  ;;  %vm2074_vm10 = vcmp.lt.s32.totalorder %v3983_v19, 4 }
  0xf9   : > { %v900_v61 = vshll.u32 %v3966_v28, 30  ;;  %v3986_v38 = vor.u32 %v2057_v34, %v2056_v27  ;;  %v3988_v39 = vor.u32 %v2060_v42, %v2059_v25  ;;  %v2064_v41 = vor.u32 %v2063_v29, %v2062_v9 }
  0xfa   : > { %v2067_v35 = vor.u32 %v2066_v32, %v2065_v33  ;;  %v2070_v59 = vor.u32 %v2069_v36, %v2068_v45  ;;  %v1998_v5 = vsub.s32 4294967266, %v3998_v47  ;;  %v4020_v13 = vmul.f32 %v4005_v4, %v4005_v4 }
  0xfb   : > { %v4000_v49 = vsub.s32 %v897_v21, %v900_v61  ;;  %v2079_v11 = vsel %vm2071_vm9, %v3986_v38, %v3988_v39  ;;  %vm2073_vm11 = vcmp.lt.s32.totalorder %v3983_v19, 3  ;;  %v4024_v53 = vshll.u32 %v2047_v57, 8 }
  0xfc   : > { %v2080_v62 = vsel %vm2074_vm10, %v2067_v35, 920167782  ;;  %vm2072_vm12 = vcmp.lt.s32.totalorder %v3983_v19, 2  ;;  %v2083_v17 = vsel %vm2071_vm9, %v3988_v39, %v2064_v41  ;;  %v3279_v21 = vadd.s32 4294967169, %v958_v7 }
  0xfd   : > { %vm902_vm8 = vcmp.lt.s32.totalorder %v4000_v49, 0  ;;  %v903_v54 = vsub.s32 0, %v4000_v49  ;;  %v2081_v37 = vsel %vm2073_vm11, %v2064_v41, %v2080_v62  ;;  %v1994_v22 = vsub.s32 32, %v3998_v47 }
  0xfe   : > { %v2082_v3 = vsel %vm2072_vm12, %v2079_v11, %v2081_v37  ;;  %v2084_v40 = vsel %vm2074_vm10, %v2070_v59, 1326507024  ;;  %v4037_v2 = vadd.s32 127, %v1998_v5  ;;  %v1978_v25 = vadd.s32 %v3854_v30, %v3844_v55 }
  0xff   : > { %v904_v15 = vsel %vm902_vm8, %v903_v54, %v4000_v49  ;;  %v2085_v27 = vsel %vm2073_vm11, %v2067_v35, %v2084_v40  ;;  %v2112_v50 = vand.u32 65535, %v2082_v3  ;;  %v2113_v34 = vshrl.u32 %v2082_v3, 16 }
 0x100   : > { %v905_v16 = vclz %v904_v15  ;;  %v2086_v33 = vsel %vm2072_vm12, %v2083_v17, %v2085_v27  ;;  %v2088_v42 = vand.u32 65535, %v4024_v53  ;;  %v2089_v29 = vshrl.u32 %v4024_v53, 16 }
 0x101   : > { %v2090_v32 = vand.u32 65535, %v2086_v33  ;;  %v2091_v36 = vshrl.u32 %v2086_v33, 16  ;;  %v964_v43 = vadd.s32 1, %v3279_v21  ;;  %v768_v61 = vsub.s32 4, %v3826_v31 }
 0x102   : > { %v4049_v9 = vmul.f32 -0.00019511016, %v4020_v13  ;;  %v3277_v35 = vadd.s32 4294967294, %v905_v16  ;;  %v2115_v45 = vmul.u32 %v2113_v34, %v2088_v42  ;;  %v1995_v55 = vshll.u32 %v3920_v63, %v3998_v47 }
 0x103   : > { %v4053_v30 = vshrl.u32 %v1978_v25, %v1994_v22  ;;  %v2000_v57 = vshll.u32 %v4037_v2, 23  ;;  %v2116_v59 = vmul.u32 %v2112_v50, %v2089_v29  ;;  %v2093_v7 = vmul.u32 %v2091_v36, %v2088_v42 }
 0x104   : > { %v2094_v54 = vmul.u32 %v2090_v32, %v2089_v29  ;;  %v2118_v5 = vshll.u32 %v2115_v45, 16  ;;  %v6122_v11 = vand.u32 2147483647, %v3956_v18  ;;  %v2055_v62 = vshrl.u32 %v6136_v6, %v3960_v24 }
 0x105   : > { %v2076_v15 = vsel %vm2074_vm10, %v2064_v41, 2102212464  ;;  %v2114_v37 = vmul.u32 %v2112_v50, %v2088_v42  ;;  %vm965_vm13 = vcmp.gt.s32.totalorder %v964_v43, 0  ;;  %vm3278_vm14 = vcmp.lt.s32.totalorder %v3277_v35, 0 }
 0x106   : > { %v2092_v17 = vmul.u32 %v2090_v32, %v2088_v42  ;;  %v2096_v21 = vshll.u32 %v2093_v7, 16  ;;  %v2117_v22 = vmul.u32 %v2113_v34, %v2089_v29  ;;  %v2095_v16 = vmul.u32 %v2091_v36, %v2089_v29 }
 0x107   : > { %v2098_v3 = vshll.u32 %v2094_v54, 16  ;;  %v2120_v40 = vshll.u32 %v2116_v59, 16  ;;  %vm2122_vm15 = vc.u32 %v2114_v37, %v2118_v5  ;;  %v2124_v25 = vadd.s32 %v2118_v5, %v2114_v37 }
 0x108   : > { %vm2100_vm1 = vc.u32 %v2092_v17, %v2096_v21  ;;  %v2102_v2 = vadd.s32 %v2096_v21, %v2092_v17  ;;  %v2123_v27 = vsel %vm2122_vm15, 1, %v6141_v20  ;;  %v2075_v24 = vsel %vm2071_vm9, %v2055_v62, %v3986_v38 }
 0x109   : > { %v2077_v41 = vsel %vm2073_vm11, %v3988_v39, %v2076_v15  ;;  %v2101_v50 = vsel %vm2100_vm1, 1, %v6141_v20  ;;  %v2125_v34 = vadd.s32 %v2123_v27, %v2117_v22  ;;  %v4070_v33 = vsel %vm3278_vm14, 0, %v3277_v35 }
 0x10a   : > { %v2103_v42 = vadd.s32 %v2101_v50, %v2095_v16  ;;  %vm2104_vm2 = vc.u32 %v2102_v2, %v2098_v3  ;;  %vm2126_vm3 = vc.u32 %v2124_v25, %v2120_v40  ;;  %v2119_v32 = vshrl.u32 %v2115_v45, 16 }
 0x10b   : > { %v2105_v29 = vsel %vm2104_vm2, 1, %v6141_v20  ;;  %v2127_v36 = vsel %vm2126_vm3, 1, %v6141_v20  ;;  %v966_v38 = vsel %vm965_vm13, %v964_v43, 0  ;;  %v2097_v5 = vshrl.u32 %v2093_v7, 16 }
 0x10c   : > { %v2107_v62 = vadd.s32 %v2105_v29, %v2103_v42  ;;  %v2129_v37 = vadd.s32 %v2127_v36, %v2125_v34  ;;  %v968_v39 = vand.u32 31, %v966_v38  ;;  %v913_v15 = vsub.s32 4294967266, %v4070_v33 }
 0x10d   : > { %v2078_v35 = vsel %vm2072_vm12, %v2075_v24, %v2077_v41  ;;  %v2099_v17 = vshrl.u32 %v2094_v54, 16  ;;  %v961_v21 = vand.u32 8388607, %v6122_v11  ;;  %v2121_v16 = vshrl.u32 %v2116_v59, 16 }
 0x10e   : > { %v2108_v22 = vadd.s32 %v2107_v62, %v2097_v5  ;;  %v2130_v45 = vadd.s32 %v2129_v37, %v2119_v32  ;;  %v4080_v3 = vsub.s32 32, %v968_v39  ;;  %v4082_v2 = vadd.s32 %v2124_v25, %v2120_v40 }
 0x10f   : > { %v4084_v43 = vshrl.u32 %v966_v38, 5  ;;  %v974_v7 = vshll.u32 %v6132_v8, %v968_v39  ;;  %v977_v27 = vshll.u32 %v6127_v10, %v968_v39  ;;  %v971_v54 = vshll.u32 %v6136_v6, %v968_v39 }
 0x110   : > { %v4088_v50 = vadd.s32 %v2108_v22, %v2099_v17  ;;  %v2131_v19 = vadd.s32 %v2130_v45, %v2121_v16  ;;  %v980_v24 = vshll.u32 %v6130_v12, %v968_v39  ;;  %v972_v59 = vshrl.u32 %v6132_v8, %v4080_v3 }
 0x111   : > { %v975_v40 = vshrl.u32 %v6127_v10, %v4080_v3  ;;  %v978_v25 = vshrl.u32 %v6130_v12, %v4080_v3  ;;  %v981_v41 = vshrl.u32 %v6125_v14, %v4080_v3  ;;  %v2001_v34 = vor.u32 4788187, %v2000_v57 }
 0x112   : > { %vm2134_vm4 = vc.u32 %v4088_v50, %v4082_v2  ;;  %v2135_v42 = vadd.s32 1, %v2131_v19  ;;  %v962_v29 = vor.u32 8388608, %v961_v21  ;;  %v914_v32 = vadd.s32 127, %v913_v15 }
 0x113   : > { %v2132_v36 = vmul.u32 %v4024_v53, %v2078_v35  ;;  %v4103_v38 = vor.u32 %v975_v40, %v974_v7  ;;  %v4105_v5 = vor.u32 %v978_v25, %v977_v27  ;;  %v982_v37 = vor.u32 %v981_v41, %v980_v24 }
 0x114   : > { %v2136_v62 = vsel %vm2134_vm4, %v2135_v42, %v2131_v19  ;;  %v983_v17 = vshll.u32 %v6125_v14, %v968_v39  ;;  %v984_v22 = vshrl.u32 %v6123_v23, %v4080_v3  ;;  %v909_v57 = vsub.s32 32, %v4070_v33 }
 0x115   : > { %v2137_v16 = vadd.s32 %v2136_v62, %v2132_v36  ;;  %v4111_v45 = vor.u32 %v972_v59, %v971_v54  ;;  %vm986_vm6 = vcmp.lt.s32.totalorder %v4084_v43, 1  ;;  %v1997_v53 = vor.u32 %v4053_v30, %v1995_v55 }
 0x116   : > { %v985_v15 = vor.u32 %v984_v22, %v983_v17  ;;  %vm988_vm8 = vcmp.lt.s32.totalorder %v4084_v43, 3  ;;  %vm989_vm9 = vcmp.lt.s32.totalorder %v4084_v43, 4  ;;  %v893_v39 = vadd.s32 %v3945_v48, %v3943_v44 }
 0x117   : > { %v915_v35 = vshll.u32 %v914_v32, 23  ;;  %v2138_v21 = vadd.s32 536870912, %v2137_v16  ;;  %v4122_v7 = vshll.u32 %v962_v29, 8  ;;  %v2002_v27 = vand.u32 2147483647, %v2001_v34 }
 0x118   : > { %v995_v19 = vsel %vm989_vm9, %v982_v37, 920167782  ;;  %v998_v63 = vsel %vm986_vm6, %v4103_v38, %v4105_v5  ;;  %v999_v47 = vsel %vm989_vm9, %v985_v15, 1326507024  ;;  %v911_v55 = vshrl.u32 %v893_v39, %v909_v57 }
 0x119   : > { %v4132_v30 = vshrl.u32 %v2138_v21, 30  ;;  %v994_v44 = vsel %vm986_vm6, %v4111_v45, %v4103_v38  ;;  %v996_v48 = vsel %vm988_vm8, %v4105_v5, %v995_v19  ;;  %v2004_v54 = vcvt.s32.f32 %v1997_v53  ;;  %v626_v53 = vpop.f32.mrf.mxu3 }
 0x11a   : > { %v910_v24 = vshll.u32 %v4000_v49, %v4070_v33  ;;  %vm987_vm10 = vcmp.lt.s32.totalorder %v4084_v43, 2  ;;  %v1000_v59 = vsel %vm988_vm8, %v982_v37, %v999_v47  ;;  %v916_v40 = vor.u32 4788187, %v915_v35 }
 0x11b   : > { %v2140_v25 = vshll.u32 %v4132_v30, 30  ;;  %v1001_v41 = vsel %vm987_vm10, %v998_v63, %v1000_v59  ;;  %v1003_v34 = vand.u32 65535, %v4122_v7  ;;  %v997_v42 = vsel %vm987_vm10, %v994_v44, %v996_v48 }
 0x11c   : > { %v1004_v29 = vshrl.u32 %v4122_v7, 16  ;;  %v1005_v32 = vand.u32 65535, %v1001_v41  ;;  %v1006_v49 = vshrl.u32 %v1001_v41, 16  ;;  %vm1886_vm11 = vcmp.lt.s32.totalorder %v3725_v58, 0 }
 0x11d   : > { %v2005_v33 = vmul.f32 %v2004_v54, %v2002_v27  ;;  %v912_v36 = vor.u32 %v911_v55, %v910_v24  ;;  %v4154_v62 = vsub.s32 %v2137_v16, %v2140_v25  ;;  %v4161_v37 = vsel %vm646_vm5, %v768_v61, %v3826_v31  ;;  %v4179_v55 = vld [vmem:[%s6117_s3] ss:$0 sm:$0xff] }
 0x11e   : > { %v2008_v17 = vsub.s32 4, %v3912_v46  ;;  %v1008_v22 = vmul.u32 %v1006_v49, %v1003_v34  ;;  %v4164_v57 = vmul.u32 %v1005_v32, %v1004_v29  ;;  %v1027_v39 = vand.u32 65535, %v997_v42 }
 0x11f   : > { %vm2142_vm12 = vcmp.lt.s32.totalorder %v4154_v62, 0  ;;  %v2143_v15 = vsub.s32 0, %v4154_v62  ;;  %v1028_v16 = vshrl.u32 %v997_v42, 16  ;;  %v781_v35 = vadd.f32 0.008332121, %v4049_v9 }
 0x120   : > { %v917_v21 = vand.u32 2147483647, %v916_v40  ;;  %v1007_v27 = vmul.u32 %v1005_v32, %v1003_v34  ;;  %v1011_v19 = vshll.u32 %v1008_v22, 16  ;;  %vm4171_vm5 = vcmp.le.f32.partialorder %v1884_v0, 0.7853982 }
 0x121   : > { %v2006_v61 = vxor.u32 2147483648, %v2005_v33  ;;  %v919_v63 = vcvt.s32.f32 %v912_v36  ;;  %v2144_v47 = vsel %vm2142_vm12, %v2143_v15, %v4154_v62  ;;  %v4182_v9 = vadd.f32 %v4179_v55, %v626_v53 }
 0x122   : > { %v1010_v44 = vmul.u32 %v1006_v49, %v1004_v29  ;;  %v1013_v48 = vshll.u32 %v4164_v57, 16  ;;  %vm1015_vm13 = vc.u32 %v1007_v27, %v1011_v19  ;;  %v1017_v0 = vadd.s32 %v1011_v19, %v1007_v27 }
 0x123   : > { %6217 = vst [vmem:[#allocation9_spill] sm:$0xff] %v4182_v9  ;;  %v771_v54 = vsel %vm3993_vm7, 0, %v4161_v37  ;;  %vm801_vm14 = vcmp.lt.s32.totalorder %v3803_v1, 0  ;;  %v1016_v24 = vsel %vm1015_vm13, 1, %v6141_v20  ;;  %v1030_v59 = vmul.u32 %v1028_v16, %v1003_v34 }
 0x124   : > { %v1031_v40 = vmul.u32 %v1027_v39, %v1004_v29  ;;  %v920_v25 = vmul.f32 %v919_v63, %v917_v21  ;;  %v2145_v41 = vclz %v2144_v47  ;;  %v1018_v42 = vadd.s32 %v1016_v24, %v1010_v44 }
 0x125   : > { %vm1019_vm15 = vc.u32 %v1017_v0, %v1013_v48  ;;  %v2009_v32 = vsel %vm1886_vm11, %v2008_v17, %v3912_v46  ;;  %v1029_v36 = vmul.u32 %v1027_v39, %v1003_v34  ;;  %v1033_v53 = vshll.u32 %v1030_v59, 16 }
 0x126   : > { %v1020_v49 = vsel %vm1019_vm15, 1, %v6141_v20  ;;  %v782_v60 = vmul.f32 %v781_v35, %v4020_v13  ;;  %v2007_v37 = vsel %vm1886_vm11, %v2006_v61, %v2005_v33  ;;  %vm4199_vm7 = vcmp.le.f32.partialorder %v799_v26, 0.7853982 }
 0x127   : > { %v1022_v21 = vadd.s32 %v1020_v49, %v1018_v42  ;;  %v2197_v27 = vand.u32 2139095040, %v4182_v9  ;;  %v1012_v19 = vshrl.u32 %v1008_v22, 16  ;;  %v1035_v46 = vshll.u32 %v1031_v40, 16 }
 0x128   : > { %vm1037_vm1 = vc.u32 %v1029_v36, %v1033_v53  ;;  %v1039_v17 = vadd.s32 %v1033_v53, %v1029_v36  ;;  %v921_v34 = vxor.u32 2147483648, %v920_v25  ;;  %v3301_v39 = vadd.s32 4294967294, %v2145_v41 }
 0x129   : > { %v970_v35 = vshrl.u32 %v6136_v6, %v4080_v3  ;;  %v1032_v63 = vmul.u32 %v1028_v16, %v1004_v29  ;;  %v1023_v33 = vadd.s32 %v1022_v21, %v1012_v19  ;;  %v1038_v61 = vsel %vm1037_vm1, 1, %v6141_v20 }
 0x12a   : > { %vm1041_vm2 = vc.u32 %v1039_v17, %v1035_v46  ;;  %v2198_v26 = vshrl.u32 %v2197_v27, 23  ;;  %v783_v47 = vadd.f32 -0.16666654, %v782_v60  ;;  %v2011_v44 = vsel %vm4171_vm5, 0, %v2009_v32 }
 0x12b   : > { %v991_v22 = vsel %vm989_vm9, %v4105_v5, 2102212464  ;;  %v1040_v48 = vadd.s32 %v1038_v61, %v1032_v63  ;;  %v4215_v0 = vsel %vm4171_vm5, %v3725_v58, %v2007_v37  ;;  %v1014_v3 = vshrl.u32 %v4164_v57, 16 }
 0x12c   : > { %v1042_v29 = vsel %vm1041_vm2, 1, %v6141_v20  ;;  %v3303_v16 = vadd.s32 4294967169, %v2198_v26  ;;  %v922_v24 = vsel %vm801_vm14, %v921_v34, %v920_v25  ;;  %v990_v41 = vsel %vm986_vm6, %v970_v35, %v4111_v45 }
 0x12d   : > { %v1034_v42 = vshrl.u32 %v1030_v59, 16  ;;  %v1044_v5 = vadd.s32 %v1042_v29, %v1040_v48  ;;  %vm3302_vm3 = vcmp.lt.s32.totalorder %v3301_v39, 0  ;;  %v992_v31 = vsel %vm988_vm8, %v4103_v38, %v991_v22 }
 0x12e   : > { %v4227_v32 = vadd.s32 %v1023_v33, %v1014_v3  ;;  %v2204_v57 = vadd.s32 1, %v3303_v16  ;;  %v784_v49 = vmul.f32 %v783_v47, %v4020_v13  ;;  %v4232_v36 = vmul.f32 %v4215_v0, %v4215_v0 }
 0x12f   : > { %v1036_v25 = vshrl.u32 %v1031_v40, 16  ;;  %v1045_v53 = vadd.s32 %v1044_v5, %v1034_v42  ;;  %v4237_v45 = vsel %vm4199_vm7, %v3803_v1, %v922_v24  ;;  %v4239_v59 = vadd.s32 %v1039_v17, %v1035_v46 }
 0x130   : > { %v6121_v38 = vand.u32 2147483647, %v4182_v9  ;;  %vm2205_vm4 = vcmp.gt.s32.totalorder %v2204_v57, 0  ;;  %v4242_v60 = vsel %vm3302_vm3, 0, %v3301_v39  ;;  %v993_v37 = vsel %vm987_vm10, %v990_v41, %v992_v31 }
 0x131   : > { %v1046_v21 = vadd.s32 %v1045_v53, %v1036_v25  ;;  %v2206_v27 = vsel %vm2205_vm4, %v2204_v57, 0  ;;  %v4246_v19 = vadd.s32 3, %v771_v54  ;;  %v4248_v40 = vadd.s32 3, %v2011_v44 }
 0x132   : > { %vm1049_vm6 = vc.u32 %v4227_v32, %v4239_v59  ;;  %v2208_v34 = vand.u32 31, %v2206_v27  ;;  %v4252_v46 = vadd.f32 1.0, %v784_v49  ;;  %v2020_v17 = vmul.f32 -0.00019511016, %v4232_v36 }
 0x133   : > { %v4257_v39 = vmul.f32 %v4237_v45, %v4237_v45  ;;  %v1050_v43 = vadd.s32 1, %v1046_v21  ;;  %v2153_v35 = vsub.s32 4294967266, %v4242_v60  ;;  %v1047_v54 = vmul.u32 %v4122_v7, %v993_v37 }
 0x134   : > { %v2201_v63 = vand.u32 8388607, %v6121_v38  ;;  %v4263_v33 = vsub.s32 32, %v2208_v34  ;;  %v4265_v26 = vshrl.u32 %v2206_v27, 5  ;;  %v2211_v47 = vshll.u32 %v6136_v6, %v2208_v34 }
 0x135   : > { %v1051_v61 = vsel %vm1049_vm6, %v1050_v43, %v1046_v21  ;;  %v2214_v44 = vshll.u32 %v6132_v8, %v2208_v34  ;;  %v2217_v7 = vshll.u32 %v6127_v10, %v2208_v34  ;;  %v2220_v16 = vshll.u32 %v6130_v12, %v2208_v34 }
 0x136   : > { %v1052_v22 = vadd.s32 %v1051_v61, %v1047_v54  ;;  %v2212_v48 = vshrl.u32 %v6132_v8, %v4263_v33  ;;  %v2215_v3 = vshrl.u32 %v6127_v10, %v4263_v33  ;;  %v2218_v29 = vshrl.u32 %v6130_v12, %v4263_v33 }
 0x137   : > { %v2221_v24 = vshrl.u32 %v6125_v14, %v4263_v33  ;;  %v2224_v41 = vshrl.u32 %v6123_v23, %v4263_v33  ;;  %v2021_v42 = vadd.f32 0.008332121, %v2020_v17  ;;  %v2202_v49 = vor.u32 8388608, %v2201_v63 }
 0x138   : > { %v1053_v5 = vadd.s32 536870912, %v1052_v22  ;;  %v4281_v31 = vor.u32 %v2212_v48, %v2211_v47  ;;  %v4283_v57 = vor.u32 %v2215_v3, %v2214_v44  ;;  %v4285_v25 = vor.u32 %v2218_v29, %v2217_v7 }
 0x139   : > { %v2222_v53 = vor.u32 %v2221_v24, %v2220_v16  ;;  %v2223_v37 = vshll.u32 %v6125_v14, %v2208_v34  ;;  %v935_v21 = vmul.f32 -0.00019511016, %v4257_v39  ;;  %v2149_v27 = vsub.s32 32, %v4242_v60 }
 0x13a   : > { %v4290_v43 = vshrl.u32 %v1053_v5, 30  ;;  %vm2226_vm8 = vcmp.lt.s32.totalorder %v4265_v26, 1  ;;  %v2154_v17 = vadd.s32 127, %v2153_v35  ;;  %vm2229_vm9 = vcmp.lt.s32.totalorder %v4265_v26, 4 }
 0x13b   : > { %v2225_v54 = vor.u32 %v2224_v41, %v2223_v37  ;;  %v2234_v63 = vsel %vm2226_vm8, %v4281_v31, %v4283_v57  ;;  %v2022_v61 = vmul.f32 %v2021_v42, %v4232_v36  ;;  %vm2228_vm10 = vcmp.lt.s32.totalorder %v4265_v26, 3 }
 0x13c   : > { %v1055_v34 = vshll.u32 %v4290_v43, 30  ;;  %v2235_v47 = vsel %vm2229_vm9, %v2222_v53, 920167782  ;;  %v2133_v35 = vadd.s32 %v4082_v2, %v4088_v50  ;;  %vm2227_vm11 = vcmp.lt.s32.totalorder %v4265_v26, 2 }
 0x13d   : > { %v2236_v44 = vsel %vm2228_vm10, %v4285_v25, %v2235_v47  ;;  %v4309_v48 = vshll.u32 %v2202_v49, 8  ;;  %v923_v3 = vsub.s32 4, %v3966_v28  ;;  %v2238_v2 = vsel %vm2226_vm8, %v4283_v57, %v4285_v25 }
 0x13e   : > { %v4312_v7 = vsub.s32 %v1052_v22, %v1055_v34  ;;  %v2237_v29 = vsel %vm2227_vm11, %v2234_v63, %v2236_v44  ;;  %v936_v50 = vadd.f32 0.008332121, %v935_v21  ;;  %v2151_v16 = vshrl.u32 %v2133_v35, %v2149_v27 }
 0x13f   : > { %v2155_v24 = vshll.u32 %v2154_v17, 23  ;;  %v2239_v41 = vsel %vm2229_vm9, %v2225_v54, 1326507024  ;;  %v2150_v42 = vshll.u32 %v4154_v62, %v4242_v60  ;;  %v2243_v37 = vand.u32 65535, %v4309_v48  ;;  %v605_v60 = vpop.f32.mrf.mxu1 }
 0x140   : > { %vm1057_vm12 = vcmp.lt.s32.totalorder %v4312_v7, 0  ;;  %v1058_v22 = vsub.s32 0, %v4312_v7  ;;  %v2240_v5 = vsel %vm2228_vm10, %v2222_v53, %v2239_v41  ;;  %v2267_v21 = vand.u32 65535, %v2237_v29 }
 0x141   : > { %v2241_v49 = vsel %vm2227_vm11, %v2238_v2, %v2240_v5  ;;  %v2268_v27 = vshrl.u32 %v2237_v29, 16  ;;  %v2244_v54 = vshrl.u32 %v4309_v48, 16  ;;  %v2152_v34 = vor.u32 %v2151_v16, %v2150_v42 }
 0x142   : > { %v1059_v17 = vsel %vm1057_vm12, %v1058_v22, %v4312_v7  ;;  %v2245_v63 = vand.u32 65535, %v2241_v49  ;;  %v2246_v62 = vshrl.u32 %v2241_v49, 16  ;;  %v2156_v47 = vor.u32 4788187, %v2155_v24 }
 0x143   : > { %v1060_v35 = vclz %v1059_v17  ;;  %v2270_v44 = vmul.u32 %v2268_v27, %v2243_v37  ;;  %v4334_v53 = vand.u32 3, %v4246_v19  ;;  %v4337_v2 = vand.u32 3, %v4248_v40 }
 0x144   : > { %v2248_v41 = vmul.u32 %v2246_v62, %v2243_v37  ;;  %v2249_v5 = vmul.u32 %v2245_v63, %v2244_v54  ;;  %v4341_v29 = vmul.f32 %v4252_v46, %v4005_v4  ;;  %v2271_v38 = vmul.u32 %v2267_v21, %v2244_v54 }
 0x145   : > { %6220 = vst [vmem:[#allocation10_spill] sm:$0xff] %v4337_v2  ;;  %v3280_v22 = vadd.s32 4294967294, %v1060_v35  ;;  %v4344_v49 = vadd.f32 %v4179_v55, %v605_v60  ;;  %v2023_v16 = vadd.f32 -0.16666654, %v2022_v61  ;;  %v2247_v24 = vmul.u32 %v2245_v63, %v2243_v37 }
 0x146   : > { %v2251_v42 = vshll.u32 %v2248_v41, 16  ;;  %v2273_v17 = vshll.u32 %v2270_v44, 16  ;;  %v4349_v19 = vsel %vm801_vm14, %v923_v3, %v3966_v28  ;;  %v937_v40 = vmul.f32 %v936_v50, %v4257_v39 }
 0x147   : > { %6221 = vst [vmem:[#allocation11_spill] sm:$0xff] %v4344_v49  ;;  %v2157_v11 = vand.u32 2147483647, %v2156_v47  ;;  %v2159_v23 = vcvt.s32.f32 %v2152_v34  ;;  %v2253_v4 = vshll.u32 %v2249_v5, 16  ;;  %v2269_v35 = vmul.u32 %v2267_v21, %v2243_v37  ;;  %v3419_v34 = vld [vmem:[%s3595_s26 + $0x78] sm:$0xff]  ;;  %s3169_s26 = sshll.u32 %s5766_s14, 4  ;;  %s3170_s26 = int_to_ptr.vmem [resolvable:$true] %s3169_s26 }
 0x148   : > { %vm2255_vm5 = vc.u32 %v2247_v24, %v2251_v42  ;;  %v2257_v46 = vadd.s32 %v2251_v42, %v2247_v24  ;;  %vm3281_vm13 = vcmp.lt.s32.totalorder %v3280_v22, 0  ;;  %v2250_v60 = vmul.u32 %v2246_v62, %v2244_v54 }
 0x149   : > { %v2275_v61 = vshll.u32 %v2271_v38, 16  ;;  %v1112_v63 = vand.u32 2139095040, %v4344_v49  ;;  %v2256_v14 = vsel %vm2255_vm5, 1, %v6141_v20  ;;  %vm2277_vm1 = vc.u32 %v2269_v35, %v2273_v17 }
 0x14a   : > { %vm2259_vm15 = vc.u32 %v2257_v46, %v2253_v4  ;;  %v2279_v28 = vadd.s32 %v2273_v17, %v2269_v35  ;;  %v2258_v3 = vadd.s32 %v2256_v14, %v2250_v60  ;;  %v2272_v47 = vmul.u32 %v2268_v27, %v2244_v54 }
 0x14b   : > { %v2260_v50 = vsel %vm2259_vm15, 1, %v6141_v20  ;;  %v284_v10 = vmul.f32 %v3419_v34, %v3419_v34  ;;  %v2210_v24 = vshrl.u32 %v6136_v6, %v4263_v33  ;;  %v2231_v37 = vsel %vm2229_vm9, %v4285_v25, 2102212464 }
 0x14c   : > { %v2278_v21 = vsel %vm2277_vm1, 1, %v6141_v20  ;;  %vm2281_vm14 = vc.u32 %v2279_v28, %v2275_v61  ;;  %v4363_v62 = vsel %vm3281_vm13, 0, %v3280_v22  ;;  %v2252_v42 = vshrl.u32 %v2248_v41, 16 }
 0x14d   : > { %v2262_v14 = vadd.s32 %v2260_v50, %v2258_v3  ;;  %v2280_v17 = vadd.s32 %v2278_v21, %v2272_v47  ;;  %vm2041_vm2 = vcmp.lt.s32.totalorder %v3923_v56, 0  ;;  %v2160_v27 = vmul.f32 %v2159_v23, %v2157_v11 }
 0x14e   : > { %v2230_v33 = vsel %vm2226_vm8, %v2210_v24, %v4281_v31  ;;  %v2282_v54 = vsel %vm2281_vm14, 1, %v6141_v20  ;;  %v1113_v4 = vshrl.u32 %v1112_v63, 23  ;;  %v2254_v25 = vshrl.u32 %v2249_v5, 16 }
 0x14f   : > { %v2263_v46 = vadd.s32 %v2262_v14, %v2252_v42  ;;  %v2274_v35 = vshrl.u32 %v2270_v44, 16  ;;  %v2284_v60 = vadd.s32 %v2282_v54, %v2280_v17  ;;  %v1068_v22 = vsub.s32 4294967266, %v4363_v62 }
 0x150   : > { %v2232_v41 = vsel %vm2228_vm10, %v4283_v57, %v2231_v37  ;;  %v3282_v3 = vadd.s32 4294967169, %v1113_v4  ;;  %v331_v23 = vsel %vm285_vm0, %v284_v10, 0.0  ;;  %v2024_v11 = vmul.f32 %v2023_v16, %v4232_v36 }
 0x151   : > { %v4376_v50 = vadd.s32 %v2263_v46, %v2254_v25  ;;  %v2276_v31 = vshrl.u32 %v2271_v38, 16  ;;  %v2285_v47 = vadd.s32 %v2284_v60, %v2274_v35  ;;  %332 = vadd.xlane.f32.xlu0 %v331_v23  ;;  %v926_v44 = vsel %vm4199_vm7, 0, %v4349_v19 }
 0x152   : > { %v938_v5 = vadd.f32 -0.16666654, %v937_v40  ;;  %v4381_v63 = vadd.s32 %v2279_v28, %v2275_v61  ;;  %v1119_v34 = vadd.s32 1, %v3282_v3  ;;  %v2161_v24 = vxor.u32 2147483648, %v2160_v27 }
 0x153   : > { %v2163_v57 = vsub.s32 4, %v4132_v30  ;;  %v2233_v10 = vsel %vm2227_vm11, %v2230_v33, %v2232_v41  ;;  %v2286_v16 = vadd.s32 %v2285_v47, %v2276_v31  ;;  %v1064_v37 = vsub.s32 32, %v4363_v62 }
 0x154   : > { %v1069_v38 = vadd.s32 127, %v1068_v22  ;;  %vm2289_vm0 = vc.u32 %v4376_v50, %v4381_v63  ;;  %vm1120_vm3 = vcmp.gt.s32.totalorder %v1119_v34, 0  ;;  %v2025_v15 = vadd.f32 1.0, %v2024_v11 }
 0x155   : > { %v2290_v19 = vadd.s32 1, %v2286_v16  ;;  %v6129_v40 = vand.u32 2147483647, %v4344_v49  ;;  %v1121_v61 = vsel %vm1120_vm3, %v1119_v34, 0  ;;  %v4390_v28 = vadd.s32 3, %v926_v44 }
 0x156   : > { %vm4394_vm7 = vcmp.le.f32.partialorder %v2039_v51, 0.7853982  ;;  %v1048_v21 = vadd.s32 %v4239_v59, %v4227_v32  ;;  %v2287_v42 = vmul.u32 %v4309_v48, %v2233_v10  ;;  %v1123_v14 = vand.u32 31, %v1121_v61 }
 0x157   : > { %v939_v17 = vmul.f32 %v938_v5, %v4257_v39  ;;  %v2162_v33 = vsel %vm2041_vm2, %v2161_v24, %v2160_v27  ;;  %v4407_v54 = vsel %vm2041_vm2, %v2163_v57, %v4132_v30  ;;  %v2291_v51 = vsel %vm2289_vm0, %v2290_v19, %v2286_v16 }
 0x158   : > { %v1066_v4 = vshrl.u32 %v1048_v21, %v1064_v37  ;;  %v1070_v25 = vshll.u32 %v1069_v38, 23  ;;  %v2292_v46 = vadd.s32 %v2291_v51, %v2287_v42  ;;  %v4409_v35 = vsub.s32 32, %v1123_v14  ;;  %v629_v51 = vpop.f32.mrf.mxu3 }
 0x159   : > { %v1116_v32 = vand.u32 8388607, %v6129_v40  ;;  %v1126_v59 = vshll.u32 %v6136_v6, %v1123_v14  ;;  %v1129_v48 = vshll.u32 %v6132_v8, %v1123_v14  ;;  %v1135_v27 = vshll.u32 %v6130_v12, %v1123_v14 }
 0x15a   : > { %v2293_v60 = vadd.s32 536870912, %v2292_v46  ;;  %v4416_v22 = vshrl.u32 %v1121_v61, 5  ;;  %v1127_v30 = vshrl.u32 %v6132_v8, %v4409_v35  ;;  %v6224_v41 = vmov 2131351028  }
 0x15b   : > { %v1130_v3 = vshrl.u32 %v6224_v41, %v4409_v35  ;;  %v1132_v23 = vshll.u32 %v6224_v41, %v1123_v14  ;;  %v1133_v11 = vshrl.u32 %v6130_v12, %v4409_v35  ;;  %v6225_v31 = vmov 920167782  }
 0x15c   : > { %v1136_v47 = vshrl.u32 %v6225_v31, %v4409_v35  ;;  %v1138_v44 = vshll.u32 %v6225_v31, %v1123_v14  ;;  %v1065_v5 = vshll.u32 %v4312_v7, %v4363_v62  ;;  %v1071_v34 = vor.u32 4788187, %v1070_v25 }
 0x15d   : > { %v4430_v24 = vshrl.u32 %v2293_v60, 30  ;;  %v6226_v57 = vmov 1326507024   ;;  %v1117_v16 = vor.u32 8388608, %v1116_v32  ;;  %v4434_v37 = vor.u32 %v1127_v30, %v1126_v59 }
 0x15e   : > { %v1139_v10 = vshrl.u32 %v6226_v57, %v4409_v35  ;;  %v4436_v38 = vor.u32 %v1130_v3, %v1129_v48  ;;  %v1137_v19 = vor.u32 %v1136_v47, %v1135_v27  ;;  %v4439_v61 = vmul.f32 %v2025_v15, %v4215_v0 }
 0x15f   : > { %v1067_v21 = vor.u32 %v1066_v4, %v1065_v5  ;;  %v2295_v42 = vshll.u32 %v4430_v24, 30  ;;  %vm1141_vm4 = vcmp.lt.s32.totalorder %v4416_v22, 1  ;;  %v2166_v7 = vsel %vm4394_vm7, 0, %v4407_v54 }
 0x160   : > { %6227 = vst [vmem:[#allocation12_spill] sm:$0xff] %v4439_v61  ;;  %v1134_v62 = vor.u32 %v1133_v11, %v1132_v23  ;;  %v1140_v14 = vor.u32 %v1139_v10, %v1138_v44  ;;  %vm1144_vm6 = vcmp.lt.s32.totalorder %v4416_v22, 4  ;;  %v940_v25 = vadd.f32 1.0, %v939_v17 }
 0x161   : > { %v4450_v0 = vsel %vm4394_vm7, %v3923_v56, %v2162_v33  ;;  %v4452_v15 = vsub.s32 %v2292_v46, %v2295_v42  ;;  %vm1143_vm8 = vcmp.lt.s32.totalorder %v4416_v22, 3  ;;  %v1072_v4 = vand.u32 2147483647, %v1071_v34 }
 0x162   : > { %v1149_v54 = vsel %vm1141_vm4, %v4434_v37, %v4436_v38  ;;  %v1150_v32 = vsel %vm1144_vm6, %v1137_v19, 920167782  ;;  %v4461_v59 = vshll.u32 %v1117_v16, 8  ;;  %v1074_v17 = vcvt.s32.f32 %v1067_v21 }
 0x163   : > { %vm2297_vm9 = vcmp.lt.s32.totalorder %v4452_v15, 0  ;;  %v2298_v26 = vsub.s32 0, %v4452_v15  ;;  %v4466_v33 = vadd.f32 %v4179_v55, %v629_v51  ;;  %vm1142_vm10 = vcmp.lt.s32.totalorder %v4416_v22, 2 }
 0x164   : > { %v1151_v46 = vsel %vm1143_vm8, %v1134_v62, %v1150_v32  ;;  %v1153_v48 = vsel %vm1141_vm4, %v4436_v38, %v1134_v62  ;;  %v1154_v27 = vsel %vm1144_vm6, %v1140_v14, 1326507024  ;;  %v4478_v60 = vmul.f32 %v4450_v0, %v4450_v0 }
 0x165   : > { %6228 = vst [vmem:[#allocation13_spill] sm:$0xff] %v4466_v33  ;;  %v2299_v30 = vsel %vm2297_vm9, %v2298_v26, %v4452_v15  ;;  %v1152_v3 = vsel %vm1142_vm10, %v1149_v54, %v1151_v46  ;;  %v1155_v23 = vsel %vm1143_vm8, %v1137_v19, %v1154_v27  ;;  %v4485_v11 = vmul.f32 %v1074_v17, %v1072_v4 }
 0x166   : > { %6229 = vst [vmem:[#allocation14_spill] sm:$0xff] %v4478_v60  ;;  %v2300_v47 = vclz %v2299_v30  ;;  %v1156_v44 = vsel %vm1142_vm10, %v1153_v48, %v1155_v23  ;;  %v1158_v5 = vand.u32 65535, %v4461_v59  ;;  %v1159_v34 = vshrl.u32 %v4461_v59, 16 }
 0x167   : > { %v1160_v10 = vand.u32 65535, %v1156_v44  ;;  %v1161_v16 = vshrl.u32 %v1156_v44, 16  ;;  %v1183_v21 = vshrl.u32 %v1152_v3, 16  ;;  %v4493_v14 = vand.u32 3, %v4390_v28 }
 0x168   : > { %v1182_v51 = vand.u32 65535, %v1152_v3  ;;  %v2352_v19 = vand.u32 2139095040, %v4466_v33  ;;  %v2183_v54 = vadd.s32 3, %v2166_v7  ;;  %v4498_v26 = vmul.f32 %v940_v25, %v4237_v45 }
 0x169   : > { %6230 = vst [vmem:[#allocation15_spill] sm:$0xff] %v4493_v14  ;;  %v1163_v32 = vmul.u32 %v1161_v16, %v1158_v5  ;;  %v1164_v17 = vmul.u32 %v1160_v10, %v1159_v34  ;;  %v2175_v46 = vmul.f32 -0.00019511016, %v4478_v60  ;;  %v3304_v48 = vadd.s32 4294967294, %v2300_v47 }
 0x16a   : > { %6231 = vst [vmem:[#allocation16_spill] sm:$0xff] %v4498_v26  ;;  %v1185_v27 = vmul.u32 %v1183_v21, %v1158_v5  ;;  %vm956_vm11 = vcmp.lt.s32.totalorder %v3956_v18, 0  ;;  %v1076_v28 = vxor.u32 2147483648, %v4485_v11  ;;  %v1078_v30 = vsub.s32 4, %v4290_v43 }
 0x16b   : > { %v1162_v3 = vmul.u32 %v1160_v10, %v1158_v5  ;;  %v1166_v23 = vshll.u32 %v1163_v32, 16  ;;  %v1165_v44 = vmul.u32 %v1161_v16, %v1159_v34  ;;  %v1184_v4 = vmul.u32 %v1182_v51, %v1158_v5 }
 0x16c   : > { %v1186_v7 = vmul.u32 %v1182_v51, %v1159_v34  ;;  %v2353_v42 = vshrl.u32 %v2352_v19, 23  ;;  %v1168_v40 = vshll.u32 %v1164_v17, 16  ;;  %v1188_v25 = vshll.u32 %v1185_v27, 16 }
 0x16d   : > { %vm1170_vm12 = vc.u32 %v1162_v3, %v1166_v23  ;;  %v1172_v45 = vadd.s32 %v1166_v23, %v1162_v3  ;;  %vm3305_vm5 = vcmp.lt.s32.totalorder %v3304_v48, 0  ;;  %v1125_v47 = vshrl.u32 %v6136_v6, %v4409_v35 }
 0x16e   : > { %v1146_v12 = vsel %vm1144_vm6, %v1134_v62, 2102212464  ;;  %v1171_v8 = vsel %vm1170_vm12, 1, %v6141_v20  ;;  %v1187_v10 = vmul.u32 %v1183_v21, %v1159_v34  ;;  %vm1192_vm15 = vc.u32 %v1184_v4, %v1188_v25 }
 0x16f   : > { %v1173_v56 = vadd.s32 %v1171_v8, %v1165_v44  ;;  %vm1174_vm13 = vc.u32 %v1172_v45, %v1168_v40  ;;  %v6232_v5 = vand.u32 2147483647, %v3956_v18  ;;  %v1167_v51 = vshrl.u32 %v1163_v32, 16 }
 0x170   : > { %v1175_v19 = vsel %vm1174_vm13, 1, %v6141_v20  ;;  %v1190_v3 = vshll.u32 %v1186_v7, 16  ;;  %v1193_v35 = vsel %vm1192_vm15, 1, %v6141_v20  ;;  %v1194_v62 = vadd.s32 %v1188_v25, %v1184_v4 }
 0x171   : > { %vm4511_vm1 = vcmp.le.f32.partialorder %v6232_v5, 0.7853982  ;;  %v1177_v23 = vadd.s32 %v1175_v19, %v1173_v56  ;;  %v1195_v6 = vadd.s32 %v1193_v35, %v1187_v10  ;;  %v3306_v61 = vadd.s32 4294967169, %v2353_v42 }
 0x172   : > { %v4517_v8 = vand.u32 3, %v2183_v54  ;;  %v1145_v40 = vsel %vm1141_vm4, %v1125_v47, %v4434_v37  ;;  %v1147_v34 = vsel %vm1143_vm8, %v4436_v38, %v1146_v12  ;;  %v6140_v21 = vand.u32 2147483647, %v4466_v33 }
 0x173   : > { %v4527_v32 = vsel %vm3305_vm5, 0, %v3304_v48  ;;  %v1178_v44 = vadd.s32 %v1177_v23, %v1167_v51  ;;  %vm1196_vm14 = vc.u32 %v1194_v62, %v1190_v3  ;;  %v2359_v56 = vadd.s32 1, %v3306_v61 }
 0x174   : > { %6235 = vst [vmem:[#allocation17_spill] sm:$0xff] %v4517_v8  ;;  %v2176_v4 = vadd.f32 0.008332121, %v2175_v46  ;;  %v4532_v42 = vsel %vm956_vm11, %v1078_v30, %v4290_v43  ;;  %v1169_v54 = vshrl.u32 %v1164_v17, 16  ;;  %v1197_v37 = vsel %vm1196_vm14, 1, %v6141_v20 }
 0x175   : > { %v1077_v12 = vsel %vm956_vm11, %v1076_v28, %v4485_v11  ;;  %v1189_v38 = vshrl.u32 %v1185_v27, 16  ;;  %v1199_v45 = vadd.s32 %v1197_v37, %v1195_v6  ;;  %vm2360_vm2 = vcmp.gt.s32.totalorder %v2359_v56, 0 }
 0x176   : > { %v2304_v48 = vsub.s32 32, %v4527_v32  ;;  %v1148_v61 = vsel %vm1142_vm10, %v1145_v40, %v1147_v34  ;;  %v4541_v46 = vadd.s32 %v1178_v44, %v1169_v54  ;;  %v2361_v25 = vsel %vm2360_vm2, %v2359_v56, 0 }
 0x177   : > { %v2308_v43 = vsub.s32 4294967266, %v4527_v32  ;;  %v1191_v17 = vshrl.u32 %v1186_v7, 16  ;;  %v1200_v30 = vadd.s32 %v1199_v45, %v1189_v38  ;;  %v2356_v47 = vand.u32 8388607, %v6140_v21 }
 0x178   : > { %v2177_v11 = vmul.f32 %v2176_v4, %v4478_v60  ;;  %v2288_v6 = vadd.s32 %v4381_v63, %v4376_v50  ;;  %v4549_v27 = vadd.s32 %v1194_v62, %v1190_v3  ;;  %v2363_v28 = vand.u32 31, %v2361_v25 }
 0x179   : > { %v4554_v22 = vsel %vm4511_vm1, %v3956_v18, %v1077_v12  ;;  %v1081_v7 = vsel %vm4511_vm1, 0, %v4532_v42  ;;  %v1201_v10 = vadd.s32 %v1200_v30, %v1191_v17  ;;  %v1202_v5 = vmul.u32 %v4461_v59, %v1148_v61 }
 0x17a   : > { %v2306_v51 = vshrl.u32 %v2288_v6, %v2304_v48  ;;  %vm1204_vm0 = vc.u32 %v4541_v46, %v4549_v27  ;;  %v4562_v50 = vshrl.u32 %v2361_v25, 5  ;;  %v4564_v63 = vsub.s32 32, %v2363_v28 }
 0x17b   : > { %v2309_v19 = vadd.s32 127, %v2308_v43  ;;  %v1205_v3 = vadd.s32 1, %v1201_v10  ;;  %v2357_v35 = vor.u32 8388608, %v2356_v47  ;;  %v6236_v23 = vmov 683565275  }
 0x17c   : > { %v2366_v62 = vshll.u32 %v6236_v23, %v2363_v28  ;;  %v6237_v40 = vmov 2475754826   ;;  %v2370_v59 = vshrl.u32 %v6224_v41, %v4564_v63  ;;  %v2372_v44 = vshll.u32 %v6224_v41, %v2363_v28 }
 0x17d   : > { %v2367_v16 = vshrl.u32 %v6237_v40, %v4564_v63  ;;  %v2369_v34 = vshll.u32 %v6237_v40, %v2363_v28  ;;  %v1206_v56 = vsel %vm1204_vm0, %v1205_v3, %v1201_v10  ;;  %v6238_v4 = vmov 2102212464  }
 0x17e   : > { %v2373_v42 = vshrl.u32 %v6238_v4, %v4564_v63  ;;  %v2375_v54 = vshll.u32 %v6238_v4, %v2363_v28  ;;  %v2376_v37 = vshrl.u32 %v6225_v31, %v4564_v63  ;;  %v1207_v12 = vadd.s32 %v1206_v56, %v1202_v5 }
 0x17f   : > { %v4578_v38 = vor.u32 %v2367_v16, %v2366_v62  ;;  %v4580_v45 = vor.u32 %v2370_v59, %v2369_v34  ;;  %vm2381_vm3 = vcmp.lt.s32.totalorder %v4562_v50, 1  ;;  %v2378_v25 = vshll.u32 %v6225_v31, %v2363_v28  ;;  %v608_v28 = vpop.f32.mrf.mxu1 }
 0x180   : > { %v4583_v48 = vor.u32 %v2373_v42, %v2372_v44  ;;  %v2377_v61 = vor.u32 %v2376_v37, %v2375_v54  ;;  %v2379_v43 = vshrl.u32 %v6226_v57, %v4564_v63  ;;  %v2310_v17 = vshll.u32 %v2309_v19, 23 }
 0x181   : > { %v1208_v30 = vadd.s32 536870912, %v1207_v12  ;;  %vm2384_vm7 = vcmp.lt.s32.totalorder %v4562_v50, 4  ;;  %v2389_v47 = vsel %vm2381_vm3, %v4578_v38, %v4580_v45  ;;  %vm2383_vm4 = vcmp.lt.s32.totalorder %v4562_v50, 3 }
 0x182   : > { %v2380_v6 = vor.u32 %v2379_v43, %v2378_v25  ;;  %v2390_v10 = vsel %vm2384_vm7, %v2377_v61, 920167782  ;;  %v4596_v5 = vshll.u32 %v2357_v35, 8  ;;  %vm2382_vm6 = vcmp.lt.s32.totalorder %v4562_v50, 2 }
 0x183   : > { %v4598_v3 = vshrl.u32 %v1208_v30, 30  ;;  %v2391_v19 = vsel %vm2383_vm4, %v4583_v48, %v2390_v10  ;;  %v2393_v62 = vsel %vm2381_vm3, %v4580_v45, %v4583_v48  ;;  %v2178_v16 = vadd.f32 -0.16666654, %v2177_v11 }
 0x184   : > { %v2305_v34 = vshll.u32 %v4452_v15, %v4527_v32  ;;  %v2392_v35 = vsel %vm2382_vm6, %v2389_v47, %v2391_v19  ;;  %v2394_v59 = vsel %vm2384_vm7, %v2380_v6, 1326507024  ;;  %v4616_v44 = vmul.f32 %v4554_v22, %v4554_v22 }
 0x185   : > { %v1210_v56 = vshll.u32 %v4598_v3, 30  ;;  %v2395_v42 = vsel %vm2383_vm4, %v2377_v61, %v2394_v59  ;;  %v4622_v11 = vadd.f32 %v4179_v55, %v608_v28  ;;  %v2311_v15 = vor.u32 4788187, %v2310_v17 }
 0x186   : > { %6239 = vst [vmem:[#allocation18_spill] sm:$0xff] %v4616_v44  ;;  %v2307_v54 = vor.u32 %v2306_v51, %v2305_v34  ;;  %v2396_v32 = vsel %vm2382_vm6, %v2393_v62, %v2395_v42  ;;  %v2423_v37 = vshrl.u32 %v2392_v35, 16  ;;  %v2398_v43 = vand.u32 65535, %v4596_v5 }
 0x187   : > { %6240 = vst [vmem:[#allocation19_spill] sm:$0xff] %v4622_v11  ;;  %v4626_v25 = vsub.s32 %v1207_v12, %v1210_v56  ;;  %v2400_v30 = vand.u32 65535, %v2396_v32  ;;  %v2422_v47 = vand.u32 65535, %v2392_v35  ;;  %v1098_v10 = vadd.s32 3, %v1081_v7 }
 0x188   : > { %v2399_v61 = vshrl.u32 %v4596_v5, 16  ;;  %v2401_v19 = vshrl.u32 %v2396_v32, 16  ;;  %v2425_v51 = vmul.u32 %v2423_v37, %v2398_v43  ;;  %v1267_v17 = vand.u32 2139095040, %v4622_v11 }
 0x189   : > { %vm1212_vm8 = vcmp.lt.s32.totalorder %v4626_v25, 0  ;;  %v1213_v55 = vsub.s32 0, %v4626_v25  ;;  %v2179_v12 = vmul.f32 %v2178_v16, %v4478_v60  ;;  %v1090_v28 = vmul.f32 -0.00019511016, %v4616_v44 }
 0x18a   : > { %v2403_v62 = vmul.u32 %v2401_v19, %v2398_v43  ;;  %v2404_v34 = vmul.u32 %v2400_v30, %v2399_v61  ;;  %v2312_v35 = vand.u32 2147483647, %v2311_v15  ;;  %v2314_v59 = vcvt.s32.f32 %v2307_v54 }
 0x18b   : > { %v1214_v7 = vsel %vm1212_vm8, %v1213_v55, %v4626_v25  ;;  %v2426_v56 = vmul.u32 %v2422_v47, %v2399_v61  ;;  %v2365_v32 = vshrl.u32 %v6236_v23, %v4564_v63  ;;  %v2402_v6 = vmul.u32 %v2400_v30, %v2398_v43 }
 0x18c   : > { %v1215_v42 = vclz %v1214_v7  ;;  %v2406_v21 = vshll.u32 %v2403_v62, 16  ;;  %v2405_v20 = vmul.u32 %v2401_v19, %v2399_v61  ;;  %v2424_v8 = vmul.u32 %v2422_v47, %v2398_v43 }
 0x18d   : > { %v2428_v18 = vshll.u32 %v2425_v51, 16  ;;  %v1268_v2 = vshrl.u32 %v1267_v17, 23  ;;  %v2408_v60 = vshll.u32 %v2404_v34, 16  ;;  %v6241_v26 = vmov 0  }
 0x18e   : > { %v3283_v16 = vadd.s32 4294967294, %v1215_v42  ;;  %vm2410_vm9 = vc.u32 %v2402_v6, %v2406_v21  ;;  %v2412_v58 = vadd.s32 %v2406_v21, %v2402_v6  ;;  %v2427_v54 = vmul.u32 %v2423_v37, %v2399_v61 }
 0x18f   : > { %v2411_v15 = vsel %vm2410_vm9, 1, %v6241_v26  ;;  %v2430_v1 = vshll.u32 %v2426_v56, 16  ;;  %vm2432_vm10 = vc.u32 %v2424_v8, %v2428_v18  ;;  %v2434_v47 = vadd.s32 %v2428_v18, %v2424_v8 }
 0x190   : > { %vm3284_vm11 = vcmp.lt.s32.totalorder %v3283_v16, 0  ;;  %v2413_v55 = vadd.s32 %v2411_v15, %v2405_v20  ;;  %vm2414_vm12 = vc.u32 %v2412_v58, %v2408_v60  ;;  %v2433_v63 = vsel %vm2432_vm10, 1, %v6241_v26 }
 0x191   : > { %v4641_v30 = vsel %vm3284_vm11, 0, %v3283_v16  ;;  %v2415_v43 = vsel %vm2414_vm12, 1, %v6241_v26  ;;  %v2435_v19 = vadd.s32 %v2433_v63, %v2427_v54  ;;  %v1091_v17 = vadd.f32 0.008332121, %v1090_v28 }
 0x192   : > { %vm2196_vm5 = vcmp.lt.s32.totalorder %v4182_v9, 0  ;;  %v2386_v21 = vsel %vm2384_vm7, %v4583_v48, 2102212464  ;;  %v2407_v37 = vshrl.u32 %v2403_v62, 16  ;;  %v2417_v6 = vadd.s32 %v2415_v43, %v2413_v55 }
 0x193   : > { %v2315_v61 = vmul.f32 %v2314_v59, %v2312_v35  ;;  %v2385_v58 = vsel %vm2381_vm3, %v2365_v32, %v4578_v38  ;;  %vm2436_vm13 = vc.u32 %v2434_v47, %v2430_v1  ;;  %v3285_v20 = vadd.s32 4294967169, %v1268_v2 }
 0x194   : > { %v1223_v60 = vsub.s32 4294967266, %v4641_v30  ;;  %v2409_v18 = vshrl.u32 %v2404_v34, 16  ;;  %v2418_v8 = vadd.s32 %v2417_v6, %v2407_v37  ;;  %v2437_v28 = vsel %vm2436_vm13, 1, %v6241_v26 }
 0x195   : > { %v2387_v7 = vsel %vm2383_vm4, %v4580_v45, %v2386_v21  ;;  %v2429_v48 = vshrl.u32 %v2425_v51, 16  ;;  %v2439_v62 = vadd.s32 %v2437_v28, %v2435_v19  ;;  %v1274_v42 = vadd.s32 1, %v3285_v20 }
 0x196   : > { %v2180_v35 = vadd.f32 1.0, %v2179_v12  ;;  %v4656_v59 = vand.u32 3, %v1098_v10  ;;  %v4658_v16 = vadd.s32 %v2418_v8, %v2409_v18  ;;  %v6155_v2 = vand.u32 2147483647, %v4622_v11 }
 0x197   : > { %v6243_v38 = vand.u32 2147483647, %v4182_v9  ;;  %v2316_v32 = vxor.u32 2147483648, %v2315_v61  ;;  %v2431_v15 = vshrl.u32 %v2426_v56, 16  ;;  %v2440_v54 = vadd.s32 %v2439_v62, %v2429_v48 }
 0x198   : > { %6242 = vst [vmem:[#allocation20_spill] sm:$0xff] %v4656_v59  ;;  %vm1275_vm1 = vcmp.gt.s32.totalorder %v1274_v42, 0  ;;  %v1219_v45 = vsub.s32 32, %v4641_v30  ;;  %v1224_v51 = vadd.s32 127, %v1223_v60  ;;  %v2388_v10 = vsel %vm2382_vm6, %v2385_v58, %v2387_v7 }
 0x199   : > { %vm4663_vm15 = vcmp.le.f32.partialorder %v6243_v38, 0.7853982  ;;  %v4670_v12 = vadd.s32 %v2434_v47, %v2430_v1  ;;  %v1092_v55 = vmul.f32 %v1091_v17, %v4616_v44  ;;  %v2318_v63 = vsub.s32 4, %v4430_v24 }
 0x19a   : > { %v2441_v43 = vadd.s32 %v2440_v54, %v2431_v15  ;;  %v1276_v19 = vsel %vm1275_vm1, %v1274_v42, 0  ;;  %v1203_v21 = vadd.s32 %v4549_v27, %v4541_v46  ;;  %v1271_v56 = vand.u32 8388607, %v6155_v2 }
 0x19b   : > { %vm2444_vm14 = vc.u32 %v4658_v16, %v4670_v12  ;;  %v1278_v37 = vand.u32 31, %v1276_v19  ;;  %v2317_v1 = vsel %vm2196_vm5, %v2316_v32, %v2315_v61  ;;  %v1220_v50 = vshll.u32 %v4626_v25, %v4641_v30 }
 0x19c   : > { %v2442_v47 = vmul.u32 %v4596_v5, %v2388_v10  ;;  %v2445_v17 = vadd.s32 1, %v2441_v43  ;;  %v1221_v6 = vshrl.u32 %v1203_v21, %v1219_v45  ;;  %v1225_v58 = vshll.u32 %v1224_v51, 23 }
 0x19d   : > { %v4685_v20 = vshrl.u32 %v1276_v19, 5  ;;  %v4687_v46 = vsub.s32 32, %v1278_v37  ;;  %v1281_v60 = vshll.u32 %v6236_v23, %v1278_v37  ;;  %v1284_v18 = vshll.u32 %v6237_v40, %v1278_v37 }
 0x19e   : > { %v2446_v27 = vsel %vm2444_vm14, %v2445_v17, %v2441_v43  ;;  %v1290_v8 = vshll.u32 %v6238_v4, %v1278_v37  ;;  %v1287_v5 = vshll.u32 %v6224_v41, %v1278_v37  ;;  %v1293_v30 = vshll.u32 %v6225_v31, %v1278_v37 }
 0x19f   : > { %v2447_v61 = vadd.s32 %v2446_v27, %v2442_v47  ;;  %v1282_v25 = vshrl.u32 %v6237_v40, %v4687_v46  ;;  %v1285_v28 = vshrl.u32 %v6224_v41, %v4687_v46  ;;  %v1288_v7 = vshrl.u32 %v6238_v4, %v4687_v46  ;;  %v632_v47 = vpop.f32.mrf.mxu3 }
 0x1a0   : > { %v1291_v48 = vshrl.u32 %v6225_v31, %v4687_v46  ;;  %v1294_v62 = vshrl.u32 %v6226_v57, %v4687_v46  ;;  %v2319_v42 = vsel %vm2196_vm5, %v2318_v63, %v4430_v24  ;;  %v4710_v38 = vsel %vm4663_vm15, %v4182_v9, %v2317_v1 }
 0x1a1   : > { %v1226_v32 = vor.u32 4788187, %v1225_v58  ;;  %v2448_v15 = vadd.s32 536870912, %v2447_v61  ;;  %v1222_v54 = vor.u32 %v1221_v6, %v1220_v50  ;;  %v1272_v45 = vor.u32 8388608, %v1271_v56 }
 0x1a2   : > { %v4712_v51 = vor.u32 %v1282_v25, %v1281_v60  ;;  %v1292_v10 = vor.u32 %v1291_v48, %v1290_v8  ;;  %v4716_v19 = vor.u32 %v1285_v28, %v1284_v18  ;;  %v1289_v21 = vor.u32 %v1288_v7, %v1287_v5 }
 0x1a3   : > { %v4714_v43 = vshrl.u32 %v2448_v15, 30  ;;  %v1295_v37 = vor.u32 %v1294_v62, %v1293_v30  ;;  %v4719_v24 = vmul.f32 %v2180_v35, %v4450_v0  ;;  %v1093_v63 = vadd.f32 -0.16666654, %v1092_v55 }
 0x1a4   : > { %vm1296_vm2 = vcmp.lt.s32.totalorder %v4685_v20, 1  ;;  %vm1299_vm0 = vcmp.lt.s32.totalorder %v4685_v20, 4  ;;  %v2321_v56 = vsel %vm4663_vm15, 0, %v2319_v42  ;;  %v1227_v1 = vand.u32 2147483647, %v1226_v32 }
 0x1a5   : > { %6246 = vst [vmem:[#allocation21_spill] sm:$0xff] %v4719_v24  ;;  %v2450_v50 = vshll.u32 %v4714_v43, 30  ;;  %vm1298_vm3 = vcmp.lt.s32.totalorder %v4685_v20, 3  ;;  %v4729_v17 = vmul.f32 %v4710_v38, %v4710_v38  ;;  %v1305_v0 = vsel %vm1299_vm0, %v1292_v10, 920167782 }
 0x1a6   : > { %v1309_v35 = vsel %vm1299_vm0, %v1295_v37, 1326507024  ;;  %v4735_v55 = vshll.u32 %v1272_v45, 8  ;;  %v1229_v34 = vcvt.s32.f32 %v1222_v54  ;;  %v1304_v58 = vsel %vm1296_vm2, %v4712_v51, %v4716_v19 }
 0x1a7   : > { %6247 = vst [vmem:[#allocation22_spill] sm:$0xff] %v4729_v17  ;;  %v4737_v6 = vsub.s32 %v2447_v61, %v2450_v50  ;;  %v1308_v27 = vsel %vm1296_vm2, %v4716_v19, %v1289_v21  ;;  %v2338_v60 = vadd.s32 3, %v2321_v56  ;;  %vm1111_vm7 = vcmp.lt.s32.totalorder %v4344_v49, 0  ;;  %v4754_v61 = vld [vmem:[%s6117_s3] ss:$0 sm:$0xff] }
 0x1a8   : > { %v1306_v18 = vsel %vm1298_vm3, %v1289_v21, %v1305_v0  ;;  %v1310_v8 = vsel %vm1298_vm3, %v1292_v10, %v1309_v35  ;;  %v4757_v25 = vadd.f32 %v4754_v61, %v632_v47  ;;  %v1230_v5 = vmul.f32 %v1229_v34, %v1227_v1 }
 0x1a9   : > { %vm2452_vm4 = vcmp.lt.s32.totalorder %v4737_v6, 0  ;;  %v2453_v30 = vsub.s32 0, %v4737_v6  ;;  %vm1297_vm6 = vcmp.lt.s32.totalorder %v4685_v20, 2  ;;  %v1094_v28 = vmul.f32 %v1093_v63, %v4616_v44 }
 0x1aa   : > { %6248 = vst [vmem:[#allocation23_spill] sm:$0xff] %v4757_v25  ;;  %v2330_v7 = vmul.f32 -0.00019511016, %v4729_v17  ;;  %v1307_v48 = vsel %vm1297_vm6, %v1304_v58, %v1306_v18  ;;  %v1311_v62 = vsel %vm1297_vm6, %v1308_v27, %v1310_v8  ;;  %v1313_v15 = vand.u32 65535, %v4735_v55 }
 0x1ab   : > { %v2454_v32 = vsel %vm2452_vm4, %v2453_v30, %v4737_v6  ;;  %v1315_v54 = vand.u32 65535, %v1311_v62  ;;  %v1316_v10 = vshrl.u32 %v1311_v62, 16  ;;  %v1338_v37 = vshrl.u32 %v1307_v48, 16 }
 0x1ac   : > { %v2455_v45 = vclz %v2454_v32  ;;  %v2507_v63 = vand.u32 2139095040, %v4757_v25  ;;  %v4772_v56 = vand.u32 3, %v2338_v60  ;;  %v1231_v1 = vxor.u32 2147483648, %v1230_v5 }
 0x1ad   : > { %v1314_v50 = vshrl.u32 %v4735_v55, 16  ;;  %v1337_v47 = vand.u32 65535, %v1307_v48  ;;  %v1095_v0 = vadd.f32 1.0, %v1094_v28  ;;  %v2331_v35 = vadd.f32 0.008332121, %v2330_v7 }
 0x1ae   : > { %6249 = vst [vmem:[#allocation24_spill] sm:$0xff] %v4772_v56  ;;  %v3307_v34 = vadd.s32 4294967294, %v2455_v45  ;;  %v1318_v58 = vmul.u32 %v1316_v10, %v1313_v15  ;;  %v6250_v27 = vand.u32 2147483647, %v4344_v49  ;;  %v1280_v8 = vshrl.u32 %v6236_v23, %v4687_v46 }
 0x1af   : > { %v1319_v30 = vmul.u32 %v1315_v54, %v1314_v50  ;;  %v1340_v60 = vmul.u32 %v1338_v37, %v1313_v15  ;;  %v1317_v32 = vmul.u32 %v1315_v54, %v1313_v15  ;;  %v2508_v28 = vshrl.u32 %v2507_v63, 23 }
 0x1b0   : > { %vm4777_vm8 = vcmp.le.f32.partialorder %v6250_v27, 0.7853982  ;;  %vm3308_vm9 = vcmp.lt.s32.totalorder %v3307_v34, 0  ;;  %v1321_v48 = vshll.u32 %v1318_v58, 16  ;;  %v1232_v7 = vsel %vm1111_vm7, %v1231_v1, %v1230_v5 }
 0x1b1   : > { %v4786_v45 = vsel %vm3308_vm9, 0, %v3307_v34  ;;  %v1341_v27 = vmul.u32 %v1337_v47, %v1314_v50  ;;  %v1343_v42 = vshll.u32 %v1340_v60, 16  ;;  %v1301_v2 = vsel %vm1299_vm0, %v1289_v21, 2102212464 }
 0x1b2   : > { %v1320_v56 = vmul.u32 %v1316_v10, %v1314_v50  ;;  %vm1325_vm10 = vc.u32 %v1317_v32, %v1321_v48  ;;  %v1339_v46 = vmul.u32 %v1337_v47, %v1313_v15  ;;  %v2463_v9 = vsub.s32 4294967266, %v4786_v45 }
 0x1b3   : > { %v1323_v62 = vshll.u32 %v1319_v30, 16  ;;  %v1326_v54 = vsel %vm1325_vm10, 1, %v6241_v26  ;;  %v1327_v24 = vadd.s32 %v1321_v48, %v1317_v32  ;;  %v1300_v5 = vsel %vm1296_vm2, %v1280_v8, %v4712_v51 }
 0x1b4   : > { %v1328_v63 = vadd.s32 %v1326_v54, %v1320_v56  ;;  %v1342_v1 = vmul.u32 %v1338_v37, %v1314_v50  ;;  %v3309_v34 = vadd.s32 4294967169, %v2508_v28  ;;  %v1345_v59 = vshll.u32 %v1341_v27, 16 }
 0x1b5   : > { %vm1329_vm11 = vc.u32 %v1327_v24, %v1323_v62  ;;  %vm1347_vm12 = vc.u32 %v1339_v46, %v1343_v42  ;;  %v1349_v21 = vadd.s32 %v1343_v42, %v1339_v46  ;;  %v1302_v15 = vsel %vm1298_vm3, %v4716_v19, %v1301_v2 }
 0x1b6   : > { %v1322_v10 = vshrl.u32 %v1318_v58, 16  ;;  %v1330_v47 = vsel %vm1329_vm11, 1, %v6241_v26  ;;  %v1348_v32 = vsel %vm1347_vm12, 1, %v6241_v26  ;;  %v2464_v48 = vadd.s32 127, %v2463_v9 }
 0x1b7   : > { %v1332_v44 = vadd.s32 %v1330_v47, %v1328_v63  ;;  %v1350_v14 = vadd.s32 %v1348_v32, %v1342_v1  ;;  %vm1351_vm5 = vc.u32 %v1349_v21, %v1345_v59  ;;  %v4803_v51 = vsel %vm4777_vm8, %v4344_v49, %v1232_v7 }
 0x1b8   : > { %v1352_v24 = vsel %vm1351_vm5, 1, %v6241_v26  ;;  %v6253_v42 = vand.u32 2147483647, %v4757_v25  ;;  %v2514_v2 = vadd.s32 1, %v3309_v34  ;;  %v1324_v19 = vshrl.u32 %v1319_v30, 16 }
 0x1b9   : > { %v1333_v56 = vadd.s32 %v1332_v44, %v1322_v10  ;;  %v1344_v50 = vshrl.u32 %v1340_v60, 16  ;;  %v1354_v58 = vadd.s32 %v1352_v24, %v1350_v14  ;;  %v2459_v9 = vsub.s32 32, %v4786_v45 }
 0x1ba   : > { %v4808_v37 = vand.u32 8388607, %v6253_v42  ;;  %v1303_v8 = vsel %vm1297_vm6, %v1300_v5, %v1302_v15  ;;  %v1346_v62 = vshrl.u32 %v1341_v27, 16  ;;  %vm2515_vm13 = vcmp.gt.s32.totalorder %v2514_v2, 0 }
 0x1bb   : > { %v2465_v28 = vshll.u32 %v2464_v48, 23  ;;  %v4813_v7 = vadd.s32 %v1333_v56, %v1324_v19  ;;  %v1355_v46 = vadd.s32 %v1354_v58, %v1344_v50  ;;  %v2516_v54 = vsel %vm2515_vm13, %v2514_v2, 0 }
 0x1bc   : > { %v4816_v63 = vmul.f32 %v1095_v0, %v4554_v22  ;;  %v2332_v30 = vmul.f32 %v2331_v35, %v4729_v17  ;;  %v4819_v44 = vadd.s32 %v1349_v21, %v1345_v59  ;;  %v2518_v14 = vand.u32 31, %v2516_v54 }
 0x1bd   : > { %v1233_v60 = vsub.s32 4, %v4598_v3  ;;  %v4824_v20 = vmul.f32 %v4803_v51, %v4803_v51  ;;  %v2443_v27 = vadd.s32 %v4670_v12, %v4658_v16  ;;  %v1356_v5 = vadd.s32 %v1355_v46, %v1346_v62 }
 0x1be   : > { %6254 = vst [vmem:[#allocation25_spill] sm:$0xff] %v4816_v63  ;;  %v1357_v1 = vmul.u32 %v4735_v55, %v1303_v8  ;;  %vm1359_vm15 = vc.u32 %v4813_v7, %v4819_v44  ;;  %v2512_v22 = vor.u32 8388608, %v4808_v37  ;;  %v4832_v59 = vsub.s32 32, %v2518_v14 }
 0x1bf   : > { %v2460_v0 = vshll.u32 %v4737_v6, %v4786_v45  ;;  %v2461_v35 = vshrl.u32 %v2443_v27, %v2459_v9  ;;  %v2466_v34 = vor.u32 4788187, %v2465_v28  ;;  %v1360_v21 = vadd.s32 1, %v1356_v5 }
 0x1c0   : > { %v2521_v15 = vshll.u32 %v6236_v23, %v2518_v14  ;;  %v2522_v16 = vshrl.u32 %v6237_v40, %v4832_v59  ;;  %v2524_v12 = vshll.u32 %v6237_v40, %v2518_v14  ;;  %v2525_v55 = vshrl.u32 %v6224_v41, %v4832_v59 }
 0x1c1   : > { %v1361_v10 = vsel %vm1359_vm15, %v1360_v21, %v1356_v5  ;;  %v2528_v47 = vshrl.u32 %v6238_v4, %v4832_v59  ;;  %v2530_v32 = vshll.u32 %v6238_v4, %v2518_v14  ;;  %v2531_v6 = vshrl.u32 %v6225_v31, %v4832_v59 }
 0x1c2   : > { %v1362_v45 = vadd.s32 %v1361_v10, %v1357_v1  ;;  %v4847_v48 = vshrl.u32 %v2516_v54, 5  ;;  %v2527_v24 = vshll.u32 %v6224_v41, %v2518_v14  ;;  %v2533_v42 = vshll.u32 %v6225_v31, %v2518_v14 }
 0x1c3   : > { %vm2351_vm1 = vcmp.lt.s32.totalorder %v4466_v33, 0  ;;  %v4852_v37 = vor.u32 %v2522_v16, %v2521_v15  ;;  %v4854_v2 = vor.u32 %v2525_v55, %v2524_v12  ;;  %v2532_v19 = vor.u32 %v2531_v6, %v2530_v32 }
 0x1c4   : > { %v2534_v56 = vshrl.u32 %v6226_v57, %v4832_v59  ;;  %v2333_v50 = vadd.f32 -0.16666654, %v2332_v30  ;;  %v2462_v58 = vor.u32 %v2461_v35, %v2460_v0  ;;  %v1363_v9 = vadd.s32 536870912, %v1362_v45 }
 0x1c5   : > { %v4858_v8 = vor.u32 %v2528_v47, %v2527_v24  ;;  %v1234_v62 = vsel %vm1111_vm7, %v1233_v60, %v4598_v3  ;;  %v1245_v28 = vmul.f32 -0.00019511016, %v4824_v20  ;;  %v2473_v46 = vsub.s32 4, %v4714_v43 }
 0x1c6   : > { %v2535_v54 = vor.u32 %v2534_v56, %v2533_v42  ;;  %v2467_v14 = vand.u32 2147483647, %v2466_v34  ;;  %v4865_v27 = vshrl.u32 %v1363_v9, 30  ;;  %vm2536_vm14 = vcmp.lt.s32.totalorder %v4847_v48, 1 }
 0x1c7   : > { %vm2539_vm2 = vcmp.lt.s32.totalorder %v4847_v48, 4  ;;  %v6255_v30 = vand.u32 2147483647, %v4466_v33  ;;  %v2544_v3 = vsel %vm2536_vm14, %v4852_v37, %v4854_v2  ;;  %v4883_v0 = vshll.u32 %v2512_v22, 8 }
 0x1c8   : > { %v2545_v60 = vsel %vm2539_vm2, %v2532_v19, 920167782  ;;  %v2549_v1 = vsel %vm2539_vm2, %v2535_v54, 1326507024  ;;  %v2469_v35 = vcvt.s32.f32 %v2462_v58  ;;  %v1365_v34 = vshll.u32 %v4865_v27, 30 }
 0x1c9   : > { %vm4871_vm0 = vcmp.le.f32.partialorder %v6255_v30, 0.7853982  ;;  %vm2538_vm3 = vcmp.lt.s32.totalorder %v4847_v48, 3  ;;  %v2548_v21 = vsel %vm2536_vm14, %v4854_v2, %v4858_v8  ;;  %v2334_v15 = vmul.f32 %v2333_v50, %v4729_v17  ;;  %v611_v30 = vpop.f32.mrf.mxu1 }
 0x1ca   : > { %vm2537_vm7 = vcmp.lt.s32.totalorder %v4847_v48, 2  ;;  %v2546_v16 = vsel %vm2538_vm3, %v4858_v8, %v2545_v60  ;;  %v2550_v22 = vsel %vm2538_vm3, %v2532_v19, %v2549_v1  ;;  %v1236_v12 = vsel %vm4777_vm8, 0, %v1234_v62 }
 0x1cb   : > { %v2470_v55 = vmul.f32 %v2469_v35, %v2467_v14  ;;  %v4900_v10 = vsub.s32 %v1362_v45, %v1365_v34  ;;  %v2547_v47 = vsel %vm2537_vm7, %v2544_v3, %v2546_v16  ;;  %v2551_v32 = vsel %vm2537_vm7, %v2548_v21, %v2550_v22 }
 0x1cc   : > { %v2553_v6 = vand.u32 65535, %v4883_v0  ;;  %v2577_v24 = vand.u32 65535, %v2547_v47  ;;  %v2578_v42 = vshrl.u32 %v2547_v47, 16  ;;  %v1246_v56 = vadd.f32 0.008332121, %v1245_v28 }
 0x1cd   : > { %v4910_v19 = vsel %vm2351_vm1, %v2473_v46, %v4714_v43  ;;  %vm1367_vm4 = vcmp.lt.s32.totalorder %v4900_v10, 0  ;;  %v1368_v18 = vsub.s32 0, %v4900_v10  ;;  %v2554_v45 = vshrl.u32 %v4883_v0, 16 }
 0x1ce   : > { %v2555_v50 = vand.u32 65535, %v2551_v32  ;;  %v2556_v58 = vshrl.u32 %v2551_v32, 16  ;;  %v2580_v9 = vmul.u32 %v2578_v42, %v2553_v6  ;;  %v4916_v54 = vadd.f32 1.0, %v2334_v15 }
 0x1cf   : > { %v2471_v14 = vxor.u32 2147483648, %v2470_v55  ;;  %v1369_v28 = vsel %vm1367_vm4, %v1368_v18, %v4900_v10  ;;  %v2581_v60 = vmul.u32 %v2577_v24, %v2554_v45  ;;  %v1247_v1 = vmul.f32 %v1246_v56, %v4824_v20 }
 0x1d0   : > { %v1370_v3 = vclz %v1369_v28  ;;  %v2558_v43 = vmul.u32 %v2556_v58, %v2553_v6  ;;  %v2559_v46 = vmul.u32 %v2555_v50, %v2554_v45  ;;  %v1253_v35 = vadd.s32 3, %v1236_v12 }
 0x1d1   : > { %v2476_v34 = vsel %vm4871_vm0, 0, %v4910_v19  ;;  %v2583_v21 = vshll.u32 %v2580_v9, 16  ;;  %v2557_v22 = vmul.u32 %v2555_v50, %v2553_v6  ;;  %v4924_v47 = vadd.f32 %v4754_v61, %v611_v30 }
 0x1d2   : > { %v3286_v16 = vadd.s32 4294967294, %v1370_v3  ;;  %v2561_v15 = vshll.u32 %v2558_v43, 16  ;;  %v2472_v32 = vsel %vm2351_vm1, %v2471_v14, %v2470_v55  ;;  %v2560_v18 = vmul.u32 %v2556_v58, %v2554_v45 }
 0x1d3   : > { %6258 = vst [vmem:[#allocation26_spill] sm:$0xff] %v4924_v47  ;;  %v2563_v28 = vshll.u32 %v2559_v46, 16  ;;  %v2579_v62 = vmul.u32 %v2577_v24, %v2553_v6  ;;  %v2585_v56 = vshll.u32 %v2581_v60, 16  ;;  %v1248_v3 = vadd.f32 -0.16666654, %v1247_v1 }
 0x1d4   : > { %vm3287_vm6 = vcmp.lt.s32.totalorder %v3286_v16, 0  ;;  %vm2565_vm8 = vc.u32 %v2557_v22, %v2561_v15  ;;  %v2567_v12 = vadd.s32 %v2561_v15, %v2557_v22  ;;  %v2582_v63 = vmul.u32 %v2578_v42, %v2554_v45 }
 0x1d5   : > { %v4928_v17 = vsel %vm3287_vm6, 0, %v3286_v16  ;;  %v2566_v19 = vsel %vm2565_vm8, 1, %v6241_v26  ;;  %vm2587_vm9 = vc.u32 %v2579_v62, %v2583_v21  ;;  %v2589_v50 = vadd.s32 %v2583_v21, %v2579_v62 }
 0x1d6   : > { %v1378_v30 = vsub.s32 4294967266, %v4928_v17  ;;  %v2568_v49 = vadd.s32 %v2566_v19, %v2560_v18  ;;  %v2520_v55 = vshrl.u32 %v6236_v23, %v4832_v59  ;;  %vm2569_vm10 = vc.u32 %v2567_v12, %v2563_v28 }
 0x1d7   : > { %v2588_v6 = vsel %vm2587_vm9, 1, %v6241_v26  ;;  %vm2591_vm11 = vc.u32 %v2589_v50, %v2585_v56  ;;  %v4938_v24 = vsel %vm4871_vm0, %v4466_v33, %v2472_v32  ;;  %v2541_v58 = vsel %vm2539_vm2, %v4858_v8, 2102212464 }
 0x1d8   : > { %v2570_v62 = vsel %vm2569_vm10, 1, %v6241_v26  ;;  %v2590_v14 = vadd.s32 %v2588_v6, %v2582_v63  ;;  %v2562_v42 = vshrl.u32 %v2558_v43, 16  ;;  %v2592_v59 = vsel %vm2591_vm11, 1, %v6241_v26 }
 0x1d9   : > { %v2572_v45 = vadd.s32 %v2570_v62, %v2568_v49  ;;  %v1422_v1 = vand.u32 2139095040, %v4924_v47  ;;  %v1379_v21 = vadd.s32 127, %v1378_v30  ;;  %v2540_v5 = vsel %vm2536_vm14, %v2520_v55, %v4852_v37 }
 0x1da   : > { %v2584_v16 = vshrl.u32 %v2580_v9, 16  ;;  %v2594_v22 = vadd.s32 %v2592_v59, %v2590_v14  ;;  %v2542_v8 = vsel %vm2538_vm3, %v4854_v2, %v2541_v58  ;;  %v2564_v15 = vshrl.u32 %v2559_v46, 16 }
 0x1db   : > { %v2573_v32 = vadd.s32 %v2572_v45, %v2562_v42  ;;  %v1423_v63 = vshrl.u32 %v1422_v1, 23  ;;  %v4954_v49 = vmul.f32 %v4938_v24, %v4938_v24  ;;  %v1374_v43 = vsub.s32 32, %v4928_v17  ;;  %v635_v42 = vpop.f32.mrf.mxu3 }
 0x1dc   : > { %v2586_v18 = vshrl.u32 %v2581_v60, 16  ;;  %v2595_v28 = vadd.s32 %v2594_v22, %v2584_v16  ;;  %v4959_v37 = vadd.s32 %v2589_v50, %v2585_v56  ;;  %v6172_v9 = vand.u32 2147483647, %v4924_v47 }
 0x1dd   : > { %6259 = vst [vmem:[#allocation27_spill] sm:$0xff] %v4954_v49  ;;  %v4957_v12 = vadd.s32 %v2573_v32, %v2564_v15  ;;  %v3288_v19 = vadd.s32 4294967169, %v1423_v63  ;;  %v1358_v2 = vadd.s32 %v4819_v44, %v4813_v7  ;;  %v1380_v46 = vshll.u32 %v1379_v21, 23 }
 0x1de   : > { %v2543_v30 = vsel %vm2537_vm7, %v2540_v5, %v2542_v8  ;;  %v2596_v55 = vadd.s32 %v2595_v28, %v2586_v18  ;;  %v4968_v6 = vmul.f32 %v4916_v54, %v4710_v38  ;;  %v2493_v60 = vadd.s32 3, %v2476_v34 }
 0x1df   : > { %vm2599_vm12 = vc.u32 %v4957_v12, %v4959_v37  ;;  %v1429_v56 = vadd.s32 1, %v3288_v19  ;;  %v1249_v50 = vmul.f32 %v1248_v3, %v4824_v20  ;;  %v2485_v58 = vmul.f32 -0.00019511016, %v4954_v49 }
 0x1e0   : > { %6260 = vst [vmem:[#allocation28_spill] sm:$0xff] %v4968_v6  ;;  %v1376_v62 = vshrl.u32 %v1358_v2, %v1374_v43  ;;  %v2600_v7 = vadd.s32 1, %v2596_v55  ;;  %v4974_v44 = vand.u32 3, %v1253_v35  ;;  %vm1266_vm5 = vcmp.lt.s32.totalorder %v4622_v11, 0 }
 0x1e1   : > { %v2597_v48 = vmul.u32 %v4883_v0, %v2543_v30  ;;  %v1426_v38 = vand.u32 8388607, %v6172_v9  ;;  %vm1430_vm13 = vcmp.gt.s32.totalorder %v1429_v56, 0  ;;  %v1375_v54 = vshll.u32 %v4900_v10, %v4928_v17 }
 0x1e2   : > { %6261 = vst [vmem:[#allocation29_spill] sm:$0xff] %v4974_v44  ;;  %v1381_v34 = vor.u32 4788187, %v1380_v46  ;;  %v2601_v14 = vsel %vm2599_vm12, %v2600_v7, %v2596_v55  ;;  %v1431_v3 = vsel %vm1430_vm13, %v1429_v56, 0  ;;  %v4983_v59 = vand.u32 3, %v2493_v60 }
 0x1e3   : > { %v2602_v35 = vadd.s32 %v2601_v14, %v2597_v48  ;;  %v1433_v1 = vand.u32 31, %v1431_v3  ;;  %v1250_v21 = vadd.f32 1.0, %v1249_v50  ;;  %v2486_v5 = vadd.f32 0.008332121, %v2485_v58 }
 0x1e4   : > { %6262 = vst [vmem:[#allocation30_spill] sm:$0xff] %v4983_v59  ;;  %v1377_v0 = vor.u32 %v1376_v62, %v1375_v54  ;;  %v1388_v16 = vsub.s32 4, %v4865_v27  ;;  %v6263_v22 = vand.u32 2147483647, %v4622_v11  ;;  %v1427_v10 = vor.u32 8388608, %v1426_v38 }
 0x1e5   : > { %v2603_v17 = vadd.s32 536870912, %v2602_v35  ;;  %v1434_v15 = vsub.s32 32, %v1433_v1  ;;  %v4993_v32 = vadd.f32 %v4754_v61, %v635_v42  ;;  %v1382_v63 = vand.u32 2147483647, %v1381_v34 }
 0x1e6   : > { %vm4988_vm15 = vcmp.le.f32.partialorder %v6263_v22, 0.7853982  ;;  %v4995_v43 = vshrl.u32 %v1431_v3, 5  ;;  %v1436_v18 = vshll.u32 %v6236_v23, %v1433_v1  ;;  %v1439_v28 = vshll.u32 %v6237_v40, %v1433_v1 }
 0x1e7   : > { %6266 = vst [vmem:[#allocation31_spill] sm:$0xff] %v4993_v32  ;;  %v4999_v19 = vshrl.u32 %v2603_v17, 30  ;;  %v1437_v2 = vshrl.u32 %v6237_v40, %v1434_v15  ;;  %v1440_v46 = vshrl.u32 %v6224_v41, %v1434_v15  ;;  %v1445_v30 = vshll.u32 %v6238_v4, %v1433_v1 }
 0x1e8   : > { %v1442_v55 = vshll.u32 %v6224_v41, %v1433_v1  ;;  %v1443_v60 = vshrl.u32 %v6238_v4, %v1434_v15  ;;  %v1446_v56 = vshrl.u32 %v6225_v31, %v1434_v15  ;;  %v1448_v50 = vshll.u32 %v6225_v31, %v1433_v1 }
 0x1e9   : > { %v5009_v58 = vmul.f32 %v1250_v21, %v4803_v51  ;;  %v2487_v62 = vmul.f32 %v2486_v5, %v4954_v49  ;;  %v1384_v7 = vcvt.s32.f32 %v1377_v0  ;;  %v2605_v48 = vshll.u32 %v4999_v19, 30 }
 0x1ea   : > { %v5016_v38 = vsel %vm1266_vm5, %v1388_v16, %v4865_v27  ;;  %v1438_v54 = vor.u32 %v1437_v2, %v1436_v18  ;;  %v1441_v34 = vor.u32 %v1440_v46, %v1439_v28  ;;  %v1449_v14 = vshrl.u32 %v6226_v57, %v1434_v15 }
 0x1eb   : > { %6267 = vst [vmem:[#allocation32_spill] sm:$0xff] %v5009_v58  ;;  %v1385_v3 = vmul.f32 %v1384_v7, %v1382_v63  ;;  %v2606_v42 = vsub.s32 %v2602_v35, %v2605_v48  ;;  %v1447_v1 = vor.u32 %v1446_v56, %v1445_v30  ;;  %vm1451_vm1 = vcmp.lt.s32.totalorder %v4995_v43, 1 }
 0x1ec   : > { %v1444_v51 = vor.u32 %v1443_v60, %v1442_v55  ;;  %v1450_v21 = vor.u32 %v1449_v14, %v1448_v50  ;;  %v5020_v5 = vshll.u32 %v1427_v10, 8  ;;  %v2662_v0 = vand.u32 2139095040, %v4993_v32 }
 0x1ed   : > { %vm2607_vm14 = vcmp.lt.s32.totalorder %v2606_v42, 0  ;;  %v2608_v22 = vsub.s32 0, %v2606_v42  ;;  %vm1453_vm2 = vcmp.lt.s32.totalorder %v4995_v43, 3  ;;  %vm1454_vm0 = vcmp.lt.s32.totalorder %v4995_v43, 4 }
 0x1ee   : > { %v5025_v27 = vadd.f32 -0.16666654, %v2487_v62  ;;  %v1459_v16 = vsel %vm1451_vm1, %v1438_v54, %v1441_v34  ;;  %v6171_v17 = vand.u32 2147483647, %v4993_v32  ;;  %v1386_v10 = vxor.u32 2147483648, %v1385_v3 }
 0x1ef   : > { %v2598_v63 = vadd.s32 %v4959_v37, %v4957_v12  ;;  %v2609_v18 = vsel %vm2607_vm14, %v2608_v22, %v2606_v42  ;;  %v1460_v28 = vsel %vm1454_vm0, %v1447_v1, 920167782  ;;  %vm1452_vm3 = vcmp.lt.s32.totalorder %v4995_v43, 2 }
 0x1f0   : > { %v2610_v2 = vclz %v2609_v18  ;;  %v1461_v46 = vsel %vm1453_vm2, %v1444_v51, %v1460_v28  ;;  %v1468_v30 = vand.u32 65535, %v5020_v5  ;;  %v1463_v60 = vsel %vm1451_vm1, %v1441_v34, %v1444_v51 }
 0x1f1   : > { %v1462_v55 = vsel %vm1452_vm3, %v1459_v16, %v1461_v46  ;;  %v1464_v12 = vsel %vm1454_vm0, %v1450_v21, 1326507024  ;;  %v2663_v37 = vshrl.u32 %v2662_v0, 23  ;;  %v1435_v50 = vshrl.u32 %v6236_v23, %v1434_v15 }
 0x1f2   : > { %v3310_v56 = vadd.s32 4294967294, %v2610_v2  ;;  %v1465_v62 = vsel %vm1453_vm2, %v1447_v1, %v1464_v12  ;;  %v1469_v7 = vshrl.u32 %v5020_v5, 16  ;;  %v1387_v48 = vsel %vm1266_vm5, %v1386_v10, %v1385_v3 }
 0x1f3   : > { %v1466_v14 = vsel %vm1452_vm3, %v1463_v60, %v1465_v62  ;;  %v1492_v22 = vand.u32 65535, %v1462_v55  ;;  %v1493_v16 = vshrl.u32 %v1462_v55, 16  ;;  %v1456_v21 = vsel %vm1454_vm0, %v1444_v51, 2102212464 }
 0x1f4   : > { %vm3311_vm7 = vcmp.lt.s32.totalorder %v3310_v56, 0  ;;  %v1470_v0 = vand.u32 65535, %v1466_v14  ;;  %v1471_v18 = vshrl.u32 %v1466_v14, 16  ;;  %v3312_v2 = vadd.s32 4294967169, %v2663_v37 }
 0x1f5   : > { %v2613_v15 = vsel %vm3311_vm7, 0, %v3310_v56  ;;  %v1495_v28 = vmul.u32 %v1493_v16, %v1468_v30  ;;  %v5059_v1 = vand.u32 8388607, %v6171_v17  ;;  %v5064_v3 = vsel %vm4988_vm15, %v4622_v11, %v1387_v48 }
 0x1f6   : > { %v2614_v10 = vsub.s32 32, %v2613_v15  ;;  %v2618_v46 = vsub.s32 4294967266, %v2613_v15  ;;  %v1455_v55 = vsel %vm1451_vm1, %v1435_v50, %v1438_v54  ;;  %v1457_v51 = vsel %vm1453_vm2, %v1441_v34, %v1456_v21 }
 0x1f7   : > { %v1473_v60 = vmul.u32 %v1471_v18, %v1468_v30  ;;  %v1474_v12 = vmul.u32 %v1470_v0, %v1469_v7  ;;  %v1496_v37 = vmul.u32 %v1492_v22, %v1469_v7  ;;  %v2615_v56 = vshll.u32 %v2606_v42, %v2613_v15 }
 0x1f8   : > { %v2616_v62 = vshrl.u32 %v2598_v63, %v2614_v10  ;;  %v2619_v14 = vadd.s32 127, %v2618_v46  ;;  %v1498_v45 = vshll.u32 %v1495_v28, 16  ;;  %v1472_v17 = vmul.u32 %v1470_v0, %v1468_v30 }
 0x1f9   : > { %v1476_v9 = vshll.u32 %v1473_v60, 16  ;;  %v1494_v35 = vmul.u32 %v1492_v22, %v1468_v30  ;;  %v2669_v48 = vadd.s32 1, %v3312_v2  ;;  %v1475_v11 = vmul.u32 %v1471_v18, %v1469_v7 }
 0x1fa   : > { %v2617_v33 = vor.u32 %v2616_v62, %v2615_v56  ;;  %v2620_v59 = vshll.u32 %v2619_v14, 23  ;;  %v1497_v6 = vmul.u32 %v1493_v16, %v1469_v7  ;;  %v1478_v44 = vshll.u32 %v1474_v12, 16 }
 0x1fb   : > { %vm1480_vm4 = vc.u32 %v1472_v17, %v1476_v9  ;;  %v1482_v54 = vadd.s32 %v1476_v9, %v1472_v17  ;;  %vm1502_vm6 = vc.u32 %v1494_v35, %v1498_v45  ;;  %vm2506_vm8 = vcmp.lt.s32.totalorder %v4757_v25, 0 }
 0x1fc   : > { %v2621_v34 = vor.u32 4788187, %v2620_v59  ;;  %v1481_v42 = vsel %vm1480_vm4, 1, %v6241_v26  ;;  %v1500_v63 = vshll.u32 %v1496_v37, 16  ;;  %v1503_v50 = vsel %vm1502_vm6, 1, %v6241_v26 }
 0x1fd   : > { %v1483_v21 = vadd.s32 %v1481_v42, %v1475_v11  ;;  %vm1484_vm9 = vc.u32 %v1482_v54, %v1478_v44  ;;  %v1504_v30 = vadd.s32 %v1498_v45, %v1494_v35  ;;  %v1505_v22 = vadd.s32 %v1503_v50, %v1497_v6 }
 0x1fe   : > { %v2622_v0 = vand.u32 2147483647, %v2621_v34  ;;  %v2624_v15 = vcvt.s32.f32 %v2617_v33  ;;  %v1485_v7 = vsel %vm1484_vm9, 1, %v6241_v26  ;;  %vm2670_vm10 = vcmp.gt.s32.totalorder %v2669_v48, 0 }
 0x1ff   : > { %v1477_v16 = vshrl.u32 %v1473_v60, 16  ;;  %v1487_v9 = vadd.s32 %v1485_v7, %v1483_v21  ;;  %vm1506_vm11 = vc.u32 %v1504_v30, %v1500_v63  ;;  %v2671_v17 = vsel %vm2670_vm10, %v2669_v48, 0 }
 0x200   : > { %v5076_v59 = vmul.f32 %v5064_v3, %v5064_v3  ;;  %v2625_v18 = vmul.f32 %v2624_v15, %v2622_v0  ;;  %v1507_v2 = vsel %vm1506_vm11, 1, %v6241_v26  ;;  %v2673_v11 = vand.u32 31, %v2671_v17 }
 0x201   : > { %v6269_v44 = vand.u32 2147483647, %v4757_v25  ;;  %v1479_v33 = vshrl.u32 %v1474_v12, 16  ;;  %v1488_v45 = vadd.s32 %v1487_v9, %v1477_v16  ;;  %v1499_v35 = vshrl.u32 %v1495_v28, 16 }
 0x202   : > { %6268 = vst [vmem:[#allocation33_spill] sm:$0xff] %v5076_v59  ;;  %v1509_v10 = vadd.s32 %v1507_v2, %v1505_v22  ;;  %v2626_v46 = vxor.u32 2147483648, %v2625_v18  ;;  %v1458_v60 = vsel %vm1452_vm3, %v1455_v55, %v1457_v51  ;;  %v1501_v56 = vshrl.u32 %v1496_v37, 16 }
 0x203   : > { %vm5081_vm12 = vcmp.le.f32.partialorder %v6269_v44, 0.7853982  ;;  %v5087_v62 = vsub.s32 32, %v2673_v11  ;;  %v5089_v14 = vadd.s32 %v1488_v45, %v1479_v33  ;;  %v5091_v48 = vadd.s32 %v1504_v30, %v1500_v63 }
 0x204   : > { %v1510_v54 = vadd.s32 %v1509_v10, %v1499_v35  ;;  %v5093_v34 = vshrl.u32 %v2671_v17, 5  ;;  %v2676_v42 = vshll.u32 %v6236_v23, %v2673_v11  ;;  %v2679_v12 = vshll.u32 %v6237_v40, %v2673_v11 }
 0x205   : > { %v2677_v28 = vshrl.u32 %v6237_v40, %v5087_v62  ;;  %v2680_v43 = vshrl.u32 %v6224_v41, %v5087_v62  ;;  %v2627_v55 = vsel %vm2506_vm8, %v2626_v46, %v2625_v18  ;;  %v2682_v37 = vshll.u32 %v6224_v41, %v2673_v11 }
 0x206   : > { %v1511_v51 = vadd.s32 %v1510_v54, %v1501_v56  ;;  %v2685_v63 = vshll.u32 %v6238_v4, %v2673_v11  ;;  %vm1514_vm5 = vc.u32 %v5089_v14, %v5091_v48  ;;  %v2683_v30 = vshrl.u32 %v6238_v4, %v5087_v62 }
 0x207   : > { %v5107_v50 = vor.u32 %v2677_v28, %v2676_v42  ;;  %v5109_v21 = vor.u32 %v2680_v43, %v2679_v12  ;;  %v2686_v0 = vshrl.u32 %v6225_v31, %v5087_v62  ;;  %v2688_v15 = vshll.u32 %v6225_v31, %v2673_v11  ;;  %v614_v28 = vpop.f32.mrf.mxu1 }
 0x208   : > { %v1515_v22 = vadd.s32 1, %v1511_v51  ;;  %v2689_v7 = vshrl.u32 %v6226_v57, %v5087_v62  ;;  %v2489_v16 = vmul.f32 %v5025_v27, %v4954_v49  ;;  %v1512_v9 = vmul.u32 %v5020_v5, %v1458_v60 }
 0x209   : > { %v2667_v17 = vor.u32 8388608, %v5059_v1  ;;  %v2684_v18 = vor.u32 %v2683_v30, %v2682_v37  ;;  %v1400_v2 = vmul.f32 -0.00019511016, %v5076_v59  ;;  %v2687_v33 = vor.u32 %v2686_v0, %v2685_v63 }
 0x20a   : > { %v1516_v44 = vsel %vm1514_vm5, %v1515_v22, %v1511_v51  ;;  %v2690_v45 = vor.u32 %v2689_v7, %v2688_v15  ;;  %v5126_v11 = vsel %vm5081_vm12, %v4757_v25, %v2627_v55  ;;  %vm2691_vm13 = vcmp.lt.s32.totalorder %v5093_v34, 1 }
 0x20b   : > { %v1517_v35 = vadd.s32 %v1516_v44, %v1512_v9  ;;  %vm2694_vm1 = vcmp.lt.s32.totalorder %v5093_v34, 4  ;;  %v6272_v5 = vsel %vm4988_vm15, 0, %v5016_v38  ;;  %vm2693_vm14 = vcmp.lt.s32.totalorder %v5093_v34, 3 }
 0x20c   : > { %v1408_v27 = vadd.s32 3, %v6272_v5  ;;  %v2699_v1 = vsel %vm2691_vm13, %v5107_v50, %v5109_v21  ;;  %v2700_v10 = vsel %vm2694_vm1, %v2687_v33, 920167782  ;;  %vm2692_vm2 = vcmp.lt.s32.totalorder %v5093_v34, 2 }
 0x20d   : > { %v1518_v46 = vadd.s32 536870912, %v1517_v35  ;;  %v2701_v60 = vsel %vm2693_vm14, %v2684_v18, %v2700_v10  ;;  %v2703_v8 = vsel %vm2691_vm13, %v5109_v21, %v2684_v18  ;;  %v5149_v38 = vmul.f32 %v5126_v11, %v5126_v11 }
 0x20e   : > { %v2702_v56 = vsel %vm2692_vm2, %v2699_v1, %v2701_v60  ;;  %v2704_v54 = vsel %vm2694_vm1, %v2690_v45, 1326507024  ;;  %v5155_v42 = vshll.u32 %v2667_v17, 8  ;;  %v1401_v12 = vadd.f32 0.008332121, %v1400_v2 }
 0x20f   : > { %6273 = vst [vmem:[#allocation34_spill] sm:$0xff] %v5149_v38  ;;  %v2628_v43 = vsub.s32 4, %v4999_v19  ;;  %v5158_v55 = vshrl.u32 %v1518_v46, 30  ;;  %v2705_v51 = vsel %vm2693_vm14, %v2687_v33, %v2704_v54  ;;  %v5163_v63 = vadd.f32 1.0, %v2489_v16 }
 0x210   : > { %v2706_v30 = vsel %vm2692_vm2, %v2703_v8, %v2705_v51  ;;  %v2733_v22 = vshrl.u32 %v2702_v56, 16  ;;  %v2732_v7 = vand.u32 65535, %v2702_v56  ;;  %v5169_v9 = vadd.f32 %v4754_v61, %v614_v28 }
 0x211   : > { %v1520_v0 = vshll.u32 %v5158_v55, 30  ;;  %v2710_v15 = vand.u32 65535, %v2706_v30  ;;  %v2640_v17 = vmul.f32 -0.00019511016, %v5149_v38  ;;  %v2708_v2 = vand.u32 65535, %v5155_v42 }
 0x212   : > { %6274 = vst [vmem:[#allocation35_spill] sm:$0xff] %v5169_v9  ;;  %v2709_v44 = vshrl.u32 %v5155_v42, 16  ;;  %v2711_v33 = vshrl.u32 %v2706_v30, 16  ;;  %v5175_v16 = vmul.f32 %v1401_v12, %v5076_v59  ;;  %v5177_v45 = vand.u32 3, %v1408_v27 }
 0x213   : > { %v5182_v5 = vsel %vm2506_vm8, %v2628_v43, %v4999_v19  ;;  %v1521_v1 = vsub.s32 %v1517_v35, %v1520_v0  ;;  %v2735_v46 = vmul.u32 %v2733_v22, %v2708_v2  ;;  %v2675_v56 = vshrl.u32 %v6236_v23, %v5087_v62 }
 0x214   : > { %6275 = vst [vmem:[#allocation36_spill] sm:$0xff] %v5177_v45  ;;  %v2713_v61 = vmul.u32 %v2711_v33, %v2708_v2  ;;  %v2714_v10 = vmul.u32 %v2710_v15, %v2709_v44  ;;  %v2736_v54 = vmul.u32 %v2732_v7, %v2709_v44  ;;  %v2641_v28 = vadd.f32 0.008332121, %v2640_v17 }
 0x215   : > { %vm1522_vm15 = vcmp.lt.s32.totalorder %v1521_v1, 0  ;;  %v1523_v8 = vsub.s32 0, %v1521_v1  ;;  %v1513_v27 = vadd.s32 %v5091_v48, %v5089_v14  ;;  %v2712_v12 = vmul.u32 %v2710_v15, %v2708_v2 }
 0x216   : > { %v2716_v51 = vshll.u32 %v2713_v61, 16  ;;  %v2715_v43 = vmul.u32 %v2711_v33, %v2709_v44  ;;  %v2718_v35 = vshll.u32 %v2714_v10, 16  ;;  %v2734_v30 = vmul.u32 %v2732_v7, %v2708_v2 }
 0x217   : > { %v1524_v19 = vsel %vm1522_vm15, %v1523_v8, %v1521_v1  ;;  %v2738_v60 = vshll.u32 %v2735_v46, 16  ;;  %v2696_v25 = vsel %vm2694_vm1, %v2684_v18, 2102212464  ;;  %v2737_v45 = vmul.u32 %v2733_v22, %v2709_v44 }
 0x218   : > { %v1525_v0 = vclz %v1524_v19  ;;  %vm2720_vm0 = vc.u32 %v2712_v12, %v2716_v51  ;;  %v2722_v37 = vadd.s32 %v2716_v51, %v2712_v12  ;;  %v2740_v17 = vshll.u32 %v2736_v54, 16 }
 0x219   : > { %v2721_v62 = vsel %vm2720_vm0, 1, %v6241_v26  ;;  %vm2742_vm7 = vc.u32 %v2734_v30, %v2738_v60  ;;  %v2744_v15 = vadd.s32 %v2738_v60, %v2734_v30  ;;  %v1577_v7 = vand.u32 2139095040, %v5169_v9 }
 0x21a   : > { %v3289_v49 = vadd.s32 4294967294, %v1525_v0  ;;  %v2723_v58 = vadd.s32 %v2721_v62, %v2715_v43  ;;  %vm2724_vm3 = vc.u32 %v2722_v37, %v2718_v35  ;;  %v2743_v48 = vsel %vm2742_vm7, 1, %v6241_v26 }
 0x21b   : > { %v2725_v14 = vsel %vm2724_vm3, 1, %v6241_v26  ;;  %v2717_v2 = vshrl.u32 %v2713_v61, 16  ;;  %v2745_v8 = vadd.s32 %v2743_v48, %v2737_v45  ;;  %v2695_v22 = vsel %vm2691_vm13, %v2675_v56, %v5107_v50 }
 0x21c   : > { %vm3290_vm4 = vcmp.lt.s32.totalorder %v3289_v49, 0  ;;  %v2727_v33 = vadd.s32 %v2725_v14, %v2723_v58  ;;  %vm2746_vm6 = vc.u32 %v2744_v15, %v2740_v17  ;;  %v1578_v44 = vshrl.u32 %v1577_v7, 23 }
 0x21d   : > { %v1528_v18 = vsel %vm3290_vm4, 0, %v3289_v49  ;;  %v2697_v51 = vsel %vm2693_vm14, %v5109_v21, %v2696_v25  ;;  %v2719_v19 = vshrl.u32 %v2714_v10, 16  ;;  %v2739_v43 = vshrl.u32 %v2735_v46, 16 }
 0x21e   : > { %v1529_v37 = vsub.s32 32, %v1528_v18  ;;  %v1533_v12 = vsub.s32 4294967266, %v1528_v18  ;;  %v2728_v60 = vadd.s32 %v2727_v33, %v2717_v2  ;;  %v2747_v61 = vsel %vm2746_vm6, 1, %v6241_v26 }
 0x21f   : > { %v3291_v58 = vadd.s32 4294967169, %v1578_v44  ;;  %v1530_v45 = vshll.u32 %v1521_v1, %v1528_v18  ;;  %v2749_v30 = vadd.s32 %v2747_v61, %v2745_v8  ;;  %v2698_v50 = vsel %vm2692_vm2, %v2695_v22, %v2697_v51 }
 0x220   : > { %v1531_v49 = vshrl.u32 %v1513_v27, %v1529_v37  ;;  %v1534_v35 = vadd.s32 127, %v1533_v12  ;;  %v5204_v56 = vadd.s32 %v2728_v60, %v2719_v19  ;;  %v2741_v0 = vshrl.u32 %v2736_v54, 16 }
 0x221   : > { %v1584_v62 = vadd.s32 1, %v3291_v58  ;;  %v2750_v25 = vadd.s32 %v2749_v30, %v2739_v43  ;;  %v6276_v21 = vand.u32 2147483647, %v5169_v9  ;;  %v5210_v46 = vmul.f32 %v5163_v63, %v4938_v24 }
 0x222   : > { %v1532_v14 = vor.u32 %v1531_v49, %v1530_v45  ;;  %v1535_v48 = vshll.u32 %v1534_v35, 23  ;;  %v2631_v1 = vsel %vm5081_vm12, 0, %v5182_v5  ;;  %vm1421_vm8 = vcmp.lt.s32.totalorder %v4924_v47, 0 }
 0x223   : > { %v1581_v10 = vand.u32 8388607, %v6276_v21  ;;  %6277 = vst [vmem:[#allocation37_spill] sm:$0xff] %v5210_v46  ;;  %v5216_v34 = vadd.s32 %v2744_v15, %v2740_v17  ;;  %vm1585_vm9 = vcmp.gt.s32.totalorder %v1584_v62, 0  ;;  %v1403_v54 = vadd.f32 -0.16666654, %v5175_v16 }
 0x224   : > { %v6278_v27 = vand.u32 2147483647, %v4924_v47  ;;  %v1536_v2 = vor.u32 4788187, %v1535_v48  ;;  %v2751_v24 = vadd.s32 %v2750_v25, %v2741_v0  ;;  %v1586_v63 = vsel %vm1585_vm9, %v1584_v62, 0 }
 0x225   : > { %v2642_v33 = vmul.f32 %v2641_v28, %v5149_v38  ;;  %v2752_v6 = vmul.u32 %v5155_v42, %v2698_v50  ;;  %vm2754_vm11 = vc.u32 %v5204_v56, %v5216_v34  ;;  %v1588_v5 = vand.u32 31, %v1586_v63 }
 0x226   : > { %vm5221_vm10 = vcmp.le.f32.partialorder %v6278_v27, 0.7853982  ;;  %v1537_v17 = vand.u32 2147483647, %v1536_v2  ;;  %v1539_v15 = vcvt.s32.f32 %v1532_v14  ;;  %v2755_v16 = vadd.s32 1, %v2751_v24 }
 0x227   : > { %v1582_v8 = vor.u32 8388608, %v1581_v10  ;;  %v5229_v18 = vshrl.u32 %v1586_v63, 5  ;;  %v1589_v22 = vsub.s32 32, %v1588_v5  ;;  %v1591_v44 = vshll.u32 %v6236_v23, %v1588_v5 }
 0x228   : > { %v1594_v37 = vshll.u32 %v6237_v40, %v1588_v5  ;;  %v1540_v12 = vmul.f32 %v1539_v15, %v1537_v17  ;;  %v2756_v51 = vsel %vm2754_vm11, %v2755_v16, %v2751_v24  ;;  %v1597_v28 = vshll.u32 %v6224_v41, %v1588_v5  ;;  %v638_v17 = vpop.f32.mrf.mxu3 }
 0x229   : > { %v1600_v42 = vshll.u32 %v6238_v4, %v1588_v5  ;;  %v2757_v60 = vadd.s32 %v2756_v51, %v2752_v6  ;;  %v1592_v19 = vshrl.u32 %v6237_v40, %v1589_v22  ;;  %v1595_v43 = vshrl.u32 %v6224_v41, %v1589_v22 }
 0x22a   : > { %v1603_v61 = vshll.u32 %v6225_v31, %v1588_v5  ;;  %v1541_v58 = vxor.u32 2147483648, %v1540_v12  ;;  %v1598_v45 = vshrl.u32 %v6238_v4, %v1589_v22  ;;  %v1601_v49 = vshrl.u32 %v6225_v31, %v1589_v22 }
 0x22b   : > { %v1604_v35 = vshrl.u32 %v6226_v57, %v1589_v22  ;;  %v2758_v30 = vadd.s32 536870912, %v2757_v60  ;;  %v1593_v50 = vor.u32 %v1592_v19, %v1591_v44  ;;  %v5241_v0 = vor.u32 %v1595_v43, %v1594_v37  ;;  %v5291_v19 = vld [vmem:[%s6117_s3] ss:$0 sm:$0xff] }
 0x22c   : > { %vm1606_vm12 = vcmp.lt.s32.totalorder %v5229_v18, 1  ;;  %v1404_v62 = vmul.f32 %v1403_v54, %v5076_v59  ;;  %v1542_v14 = vsel %vm1421_vm8, %v1541_v58, %v1540_v12  ;;  %v1599_v48 = vor.u32 %v1598_v45, %v1597_v28 }
 0x22d   : > { %v1602_v25 = vor.u32 %v1601_v49, %v1600_v42  ;;  %v2643_v21 = vadd.f32 -0.16666654, %v2642_v33  ;;  %v5250_v10 = vsel %vm5221_vm10, %v4924_v47, %v1542_v14  ;;  %v5252_v27 = vshrl.u32 %v2758_v30, 30 }
 0x22e   : > { %vm1608_vm5 = vcmp.lt.s32.totalorder %v5229_v18, 3  ;;  %v5257_v2 = vmul.f32 %v5250_v10, %v5250_v10  ;;  %v1605_v54 = vor.u32 %v1604_v35, %v1603_v61  ;;  %vm1609_vm13 = vcmp.lt.s32.totalorder %v5229_v18, 4 }
 0x22f   : > { %v1614_v24 = vsel %vm1606_vm12, %v1593_v50, %v5241_v0  ;;  %v2760_v33 = vshll.u32 %v5252_v27, 30  ;;  %v1615_v6 = vsel %vm1609_vm13, %v1602_v25, 920167782  ;;  %v5267_v5 = vshll.u32 %v1582_v8, 8 }
 0x230   : > { %v5269_v15 = vadd.f32 1.0, %v1404_v62  ;;  %v5271_v16 = vadd.s32 3, %v2631_v1  ;;  %vm1607_vm1 = vcmp.lt.s32.totalorder %v5229_v18, 2  ;;  %v1616_v44 = vsel %vm1608_vm5, %v1599_v48, %v1615_v6 }
 0x231   : > { %v5277_v37 = vmul.f32 %v2643_v21, %v5149_v38  ;;  %v2761_v12 = vsub.s32 %v2757_v60, %v2760_v33  ;;  %v1617_v51 = vsel %vm1607_vm1, %v1614_v24, %v1616_v44  ;;  %v1618_v8 = vsel %vm1606_vm12, %v5241_v0, %v1599_v48 }
 0x232   : > { %v1543_v28 = vsub.s32 4, %v5158_v55  ;;  %v1555_v1 = vmul.f32 -0.00019511016, %v5257_v2  ;;  %v1619_v42 = vsel %vm1609_vm13, %v1605_v54, 1326507024  ;;  %v5294_v60 = vadd.f32 %v5291_v19, %v638_v17 }
 0x233   : > { %vm2762_vm14 = vcmp.lt.s32.totalorder %v2761_v12, 0  ;;  %v2763_v43 = vsub.s32 0, %v2761_v12  ;;  %v1620_v61 = vsel %vm1608_vm5, %v1602_v25, %v1619_v42  ;;  %v1623_v58 = vand.u32 65535, %v5267_v5 }
 0x234   : > { %v1590_v45 = vshrl.u32 %v6236_v23, %v1589_v22  ;;  %v1621_v49 = vsel %vm1607_vm1, %v1618_v8, %v1620_v61  ;;  %v1647_v35 = vand.u32 65535, %v1617_v51  ;;  %v1648_v30 = vshrl.u32 %v1617_v51, 16 }
 0x235   : > { %v2764_v62 = vsel %vm2762_vm14, %v2763_v43, %v2761_v12  ;;  %v1624_v14 = vshrl.u32 %v5267_v5, 16  ;;  %v1625_v21 = vand.u32 65535, %v1621_v49  ;;  %v1626_v54 = vshrl.u32 %v1621_v49, 16 }
 0x236   : > { %v5306_v24 = vsel %vm1421_vm8, %v1543_v28, %v5158_v55  ;;  %v1556_v25 = vadd.f32 0.008332121, %v1555_v1  ;;  %v2765_v33 = vclz %v2764_v62  ;;  %v1650_v6 = vmul.u32 %v1648_v30, %v1623_v58 }
 0x237   : > { %v2753_v22 = vadd.s32 %v5216_v34, %v5204_v56  ;;  %v1628_v17 = vmul.u32 %v1626_v54, %v1623_v58  ;;  %v1629_v44 = vmul.u32 %v1625_v21, %v1624_v14  ;;  %v1610_v42 = vsel %vm1606_vm12, %v1590_v45, %v1593_v50 }
 0x238   : > { %v3313_v8 = vadd.s32 4294967294, %v2765_v33  ;;  %v1651_v43 = vmul.u32 %v1647_v35, %v1624_v14  ;;  %v2817_v61 = vand.u32 2139095040, %v5294_v60  ;;  %v1611_v55 = vsel %vm1609_vm13, %v1599_v48, 2102212464 }
 0x239   : > { %v1627_v28 = vmul.u32 %v1625_v21, %v1623_v58  ;;  %v1631_v1 = vshll.u32 %v1628_v17, 16  ;;  %v1653_v49 = vshll.u32 %v1650_v6, 16  ;;  %v1557_v62 = vmul.f32 %v1556_v25, %v5257_v2 }
 0x23a   : > { %vm3314_vm2 = vcmp.lt.s32.totalorder %v3313_v8, 0  ;;  %v1630_v56 = vmul.u32 %v1626_v54, %v1624_v14  ;;  %v1649_v34 = vmul.u32 %v1647_v35, %v1623_v58  ;;  %v1633_v51 = vshll.u32 %v1629_v44, 16 }
 0x23b   : > { %v2768_v63 = vsel %vm3314_vm2, 0, %v3313_v8  ;;  %vm1635_vm15 = vc.u32 %v1627_v28, %v1631_v1  ;;  %v1637_v33 = vadd.s32 %v1631_v1, %v1627_v28  ;;  %v1652_v45 = vmul.u32 %v1648_v30, %v1624_v14 }
 0x23c   : > { %v2769_v38 = vsub.s32 32, %v2768_v63  ;;  %v2773_v50 = vsub.s32 4294967266, %v2768_v63  ;;  %v1655_v46 = vshll.u32 %v1651_v43, 16  ;;  %v1636_v47 = vsel %vm1635_vm15, 1, %v6241_v26 }
 0x23d   : > { %vm1639_vm0 = vc.u32 %v1637_v33, %v1633_v51  ;;  %vm1657_vm3 = vc.u32 %v1649_v34, %v1653_v49  ;;  %v1659_v48 = vadd.s32 %v1653_v49, %v1649_v34  ;;  %vm2661_vm7 = vcmp.lt.s32.totalorder %v4993_v32, 0 }
 0x23e   : > { %v2770_v21 = vshll.u32 %v2761_v12, %v2768_v63  ;;  %v2771_v25 = vshrl.u32 %v2753_v22, %v2769_v38  ;;  %v2774_v59 = vadd.s32 127, %v2773_v50  ;;  %v1638_v54 = vadd.s32 %v1636_v47, %v1630_v56 }
 0x23f   : > { %v1632_v58 = vshrl.u32 %v1628_v17, 16  ;;  %v1640_v35 = vsel %vm1639_vm0, 1, %v6241_v26  ;;  %v1658_v8 = vsel %vm1657_vm3, 1, %v6241_v26  ;;  %vm1661_vm4 = vc.u32 %v1659_v48, %v1655_v46 }
 0x240   : > { %v2772_v28 = vor.u32 %v2771_v25, %v2770_v21  ;;  %v2775_v30 = vshll.u32 %v2774_v59, 23  ;;  %v1642_v14 = vadd.s32 %v1640_v35, %v1638_v54  ;;  %v1660_v1 = vadd.s32 %v1658_v8, %v1652_v45  ;;  %v617_v8 = vpop.f32.mrf.mxu1 }
 0x241   : > { %v2783_v51 = vsub.s32 4, %v5252_v27  ;;  %v1634_v33 = vshrl.u32 %v1629_v44, 16  ;;  %v1662_v49 = vsel %vm1661_vm4, 1, %v6241_v26  ;;  %v2818_v34 = vshrl.u32 %v2817_v61, 23 }
 0x242   : > { %v2776_v63 = vor.u32 4788187, %v2775_v30  ;;  %v1643_v38 = vadd.s32 %v1642_v14, %v1632_v58  ;;  %v1654_v12 = vshrl.u32 %v1650_v6, 16  ;;  %v1664_v47 = vadd.s32 %v1662_v49, %v1660_v1 }
 0x243   : > { %v1558_v22 = vadd.f32 -0.16666654, %v1557_v62  ;;  %v1612_v17 = vsel %vm1608_vm5, %v5241_v0, %v1611_v55  ;;  %v1656_v56 = vshrl.u32 %v1651_v43, 16  ;;  %v3315_v50 = vadd.s32 4294967169, %v2818_v34 }
 0x244   : > { %v2777_v59 = vand.u32 2147483647, %v2776_v63  ;;  %v2779_v21 = vcvt.s32.f32 %v2772_v28  ;;  %v5326_v45 = vadd.s32 %v1643_v38, %v1634_v33  ;;  %v1665_v25 = vadd.s32 %v1664_v47, %v1654_v12 }
 0x245   : > { %v5330_v44 = vmul.f32 %v5269_v15, %v5064_v3  ;;  %v2645_v61 = vadd.f32 1.0, %v5277_v37  ;;  %v1663_v6 = vadd.s32 %v1659_v48, %v1655_v46  ;;  %v2824_v54 = vadd.s32 1, %v3315_v50 }
 0x246   : > { %v1546_v62 = vsel %vm5221_vm10, 0, %v5306_v24  ;;  %v2780_v0 = vmul.f32 %v2779_v21, %v2777_v59  ;;  %v1613_v43 = vsel %vm1607_vm1, %v1610_v42, %v1612_v17  ;;  %v1666_v55 = vadd.s32 %v1665_v25, %v1656_v56 }
 0x247   : > { %v1559_v58 = vmul.f32 %v1558_v22, %v5257_v2  ;;  %v2784_v3 = vsel %vm2661_vm7, %v2783_v51, %v5252_v27  ;;  %vm1669_vm6 = vc.u32 %v5326_v45, %v1663_v6  ;;  %vm2825_vm8 = vcmp.gt.s32.totalorder %v2824_v54, 0 }
 0x248   : > { %v2781_v46 = vxor.u32 2147483648, %v2780_v0  ;;  %v1670_v15 = vadd.s32 1, %v1666_v55  ;;  %v6281_v37 = vand.u32 2147483647, %v5294_v60  ;;  %v2826_v24 = vsel %vm2825_vm8, %v2824_v54, 0 }
 0x249   : > { %v5346_v48 = vand.u32 3, %v5271_v16  ;;  %v6283_v18 = vand.u32 2147483647, %v4993_v32  ;;  %v1667_v27 = vmul.u32 %v5267_v5, %v1613_v43  ;;  %v2828_v35 = vand.u32 31, %v2826_v24 }
 0x24a   : > { %v2821_v7 = vand.u32 8388607, %v6281_v37  ;;  %v5357_v30 = vmul.f32 %v2645_v61, %v5126_v11  ;;  %v1563_v14 = vadd.s32 3, %v1546_v62  ;;  %v1671_v1 = vsel %vm1669_vm6, %v1670_v15, %v1666_v55 }
 0x24b   : > { %6282 = vst [vmem:[#allocation38_spill] sm:$0xff] %v5346_v48  ;;  %vm5350_vm9 = vcmp.le.f32.partialorder %v6283_v18, 0.7853982  ;;  %v1560_v51 = vadd.f32 1.0, %v1559_v58  ;;  %v1672_v33 = vadd.s32 %v1671_v1, %v1667_v27  ;;  %v2829_v49 = vsub.s32 32, %v2828_v35 }
 0x24c   : > { %6286 = vst [vmem:[#allocation39_spill] sm:$0xff] %v5357_v30  ;;  %v2786_v16 = vsel %vm5350_vm9, 0, %v2784_v3  ;;  %v2782_v34 = vsel %vm2661_vm7, %v2781_v46, %v2780_v0  ;;  %v2822_v63 = vor.u32 8388608, %v2821_v7  ;;  %v5363_v5 = vshrl.u32 %v2826_v24, 5 }
 0x24d   : > { %v5366_v38 = vadd.f32 %v5291_v19, %v617_v8  ;;  %v1673_v12 = vadd.s32 536870912, %v1672_v33  ;;  %v2831_v11 = vshll.u32 %v6236_v23, %v2828_v35  ;;  %v2832_v47 = vshrl.u32 %v6237_v40, %v2829_v49 }
 0x24e   : > { %v2835_v22 = vshrl.u32 %v6224_v41, %v2829_v49  ;;  %v2834_v17 = vshll.u32 %v6237_v40, %v2828_v35  ;;  %v2838_v56 = vshrl.u32 %v6238_v4, %v2829_v49  ;;  %v2840_v50 = vshll.u32 %v6238_v4, %v2828_v35 }
 0x24f   : > { %v2841_v59 = vshrl.u32 %v6225_v31, %v2829_v49  ;;  %v5378_v21 = vsel %vm5350_vm9, %v4993_v32, %v2782_v34  ;;  %v5380_v25 = vshrl.u32 %v1673_v12, 30  ;;  %v2837_v61 = vshll.u32 %v6224_v41, %v2828_v35 }
 0x250   : > { %v2844_v54 = vshrl.u32 %v6226_v57, %v2829_v49  ;;  %v5384_v62 = vor.u32 %v2832_v47, %v2831_v11  ;;  %v5386_v0 = vor.u32 %v2835_v22, %v2834_v17  ;;  %v2843_v55 = vshll.u32 %v6225_v31, %v2828_v35 }
 0x251   : > { %v2842_v43 = vor.u32 %v2841_v59, %v2840_v50  ;;  %v5390_v3 = vand.u32 3, %v1563_v14  ;;  %v5392_v46 = vadd.s32 3, %v2786_v16  ;;  %v1675_v15 = vshll.u32 %v5380_v25, 30 }
 0x252   : > { %v5396_v37 = vmul.f32 %v1560_v51, %v5250_v10  ;;  %v2839_v7 = vor.u32 %v2838_v56, %v2837_v61  ;;  %v2845_v24 = vor.u32 %v2844_v54, %v2843_v55  ;;  %v6196_v18 = vand.u32 2147483647, %v5366_v38 }
 0x253   : > { %v5401_v42 = vmul.f32 %v5378_v21, %v5378_v21  ;;  %v1676_v27 = vsub.s32 %v1672_v33, %v1675_v15  ;;  %vm2846_vm10 = vcmp.lt.s32.totalorder %v5363_v5, 1  ;;  %vm2849_vm11 = vcmp.lt.s32.totalorder %v5363_v5, 4 }
 0x254   : > { %v1668_v35 = vadd.s32 %v1663_v6, %v5326_v45  ;;  %v2854_v10 = vsel %vm2846_vm10, %v5384_v62, %v5386_v0  ;;  %v2855_v8 = vsel %vm2849_vm11, %v2842_v43, 920167782  ;;  %v5412_v14 = vshll.u32 %v2822_v63, 8 }
 0x255   : > { %6287 = vst [vmem:[#allocation40_spill] sm:$0xff] %v5401_v42  ;;  %vm1677_vm12 = vcmp.lt.s32.totalorder %v1676_v27, 0  ;;  %v1678_v1 = vsub.s32 0, %v1676_v27  ;;  %vm2848_vm5 = vcmp.lt.s32.totalorder %v5363_v5, 3  ;;  %v1732_v51 = vand.u32 2139095040, %v5366_v38 }
 0x256   : > { %vm2847_vm13 = vcmp.lt.s32.totalorder %v5363_v5, 2  ;;  %v2856_v45 = vsel %vm2848_vm5, %v2839_v7, %v2855_v8  ;;  %v2858_v6 = vsel %vm2846_vm10, %v5386_v0, %v2839_v7  ;;  %v2859_v16 = vsel %vm2849_vm11, %v2845_v24, 1326507024 }
 0x257   : > { %v2795_v33 = vmul.f32 -0.00019511016, %v5401_v42  ;;  %v1679_v34 = vsel %vm1677_vm12, %v1678_v1, %v1676_v27  ;;  %v2857_v63 = vsel %vm2847_vm13, %v2854_v10, %v2856_v45  ;;  %v2860_v12 = vsel %vm2848_vm5, %v2842_v43, %v2859_v16 }
 0x258   : > { %v1680_v11 = vclz %v1679_v34  ;;  %v2861_v47 = vsel %vm2847_vm13, %v2858_v6, %v2860_v12  ;;  %v2863_v22 = vand.u32 65535, %v5412_v14  ;;  %v2887_v17 = vand.u32 65535, %v2857_v63 }
 0x259   : > { %v2864_v56 = vshrl.u32 %v5412_v14, 16  ;;  %v2865_v50 = vand.u32 65535, %v2861_v47  ;;  %v2866_v59 = vshrl.u32 %v2861_v47, 16  ;;  %v2888_v61 = vshrl.u32 %v2857_v63, 16 }
 0x25a   : > { %v3292_v54 = vadd.s32 4294967294, %v1680_v11  ;;  %v2830_v55 = vshrl.u32 %v6236_v23, %v2829_v49  ;;  %v1733_v15 = vshrl.u32 %v1732_v51, 23  ;;  %v5436_v24 = vand.u32 8388607, %v6196_v18 }
 0x25b   : > { %v2796_v43 = vadd.f32 0.008332121, %v2795_v33  ;;  %v2851_v10 = vsel %vm2849_vm11, %v2839_v7, 2102212464  ;;  %v2868_v8 = vmul.u32 %v2866_v59, %v2863_v22  ;;  %v2869_v1 = vmul.u32 %v2865_v50, %v2864_v56 }
 0x25c   : > { %vm3293_vm1 = vcmp.lt.s32.totalorder %v3292_v54, 0  ;;  %v2889_v45 = vmul.u32 %v2887_v17, %v2863_v22  ;;  %v2890_v6 = vmul.u32 %v2888_v61, %v2863_v22  ;;  %v2891_v16 = vmul.u32 %v2887_v17, %v2864_v56 }
 0x25d   : > { %v1683_v34 = vsel %vm3293_vm1, 0, %v3292_v54  ;;  %v2867_v63 = vmul.u32 %v2865_v50, %v2863_v22  ;;  %v2870_v12 = vmul.u32 %v2866_v59, %v2864_v56  ;;  %v2871_v11 = vshll.u32 %v2868_v8, 16 }
 0x25e   : > { %v1684_v49 = vsub.s32 32, %v1683_v34  ;;  %v1688_v51 = vsub.s32 4294967266, %v1683_v34  ;;  %v2872_v47 = vshrl.u32 %v2868_v8, 16  ;;  %v2892_v58 = vmul.u32 %v2888_v61, %v2864_v56 }
 0x25f   : > { %v2873_v28 = vshll.u32 %v2869_v1, 16  ;;  %vm2875_vm14 = vc.u32 %v2867_v63, %v2871_v11  ;;  %v2877_v33 = vadd.s32 %v2871_v11, %v2867_v63  ;;  %v2893_v18 = vshll.u32 %v2890_v6, 16 }
 0x260   : > { %v1685_v30 = vshll.u32 %v1676_v27, %v1683_v34  ;;  %v1686_v7 = vshrl.u32 %v1668_v35, %v1684_v49  ;;  %v1689_v32 = vadd.s32 127, %v1688_v51  ;;  %v2876_v48 = vsel %vm2875_vm14, 1, %v6241_v26 }
 0x261   : > { %vm1576_vm2 = vcmp.lt.s32.totalorder %v5169_v9, 0  ;;  %v2878_v17 = vadd.s32 %v2876_v48, %v2870_v12  ;;  %vm2879_vm15 = vc.u32 %v2877_v33, %v2873_v28  ;;  %v2895_v22 = vshll.u32 %v2891_v16, 16 }
 0x262   : > { %vm2897_vm0 = vc.u32 %v2889_v45, %v2893_v18  ;;  %v1687_v50 = vor.u32 %v1686_v7, %v1685_v30  ;;  %v1690_v59 = vshll.u32 %v1689_v32, 23  ;;  %v2880_v54 = vsel %vm2879_vm15, 1, %v6241_v26 }
 0x263   : > { %v2898_v56 = vsel %vm2897_vm0, 1, %v6241_v26  ;;  %v2882_v61 = vadd.s32 %v2880_v54, %v2878_v17  ;;  %v2899_v8 = vadd.s32 %v2893_v18, %v2889_v45  ;;  %v3294_v27 = vadd.s32 4294967169, %v1733_v15 }
 0x264   : > { %v2900_v63 = vadd.s32 %v2898_v56, %v2892_v58  ;;  %v6288_v35 = vand.u32 2147483647, %v5169_v9  ;;  %v1691_v48 = vor.u32 4788187, %v1690_v59  ;;  %v1698_v28 = vsub.s32 4, %v5380_v25 }
 0x265   : > { %v2850_v32 = vsel %vm2846_vm10, %v2830_v55, %v5384_v62  ;;  %v2852_v30 = vsel %vm2848_vm5, %v5386_v0, %v2851_v10  ;;  %v2874_v18 = vshrl.u32 %v2869_v1, 16  ;;  %v2883_v58 = vadd.s32 %v2882_v61, %v2872_v47 }
 0x266   : > { %vm5446_vm3 = vcmp.le.f32.partialorder %v6288_v35, 0.7853982  ;;  %vm2901_vm7 = vc.u32 %v2899_v8, %v2895_v22  ;;  %v1739_v15 = vadd.s32 1, %v3294_v27  ;;  %v2797_v45 = vmul.f32 %v2796_v43, %v5401_v42 }
 0x267   : > { %v1692_v12 = vand.u32 2147483647, %v1691_v48  ;;  %v1694_v11 = vcvt.s32.f32 %v1687_v50  ;;  %v2902_v49 = vsel %vm2901_vm7, 1, %v6241_v26  ;;  %v5459_v51 = vadd.s32 %v2883_v58, %v2874_v18 }
 0x268   : > { %v2894_v33 = vshrl.u32 %v2890_v6, 16  ;;  %v2904_v7 = vadd.s32 %v2902_v49, %v2900_v63  ;;  %vm1740_vm4 = vcmp.gt.s32.totalorder %v1739_v15, 0  ;;  %v2853_v55 = vsel %vm2847_vm13, %v2850_v32, %v2852_v30 }
 0x269   : > { %v1695_v62 = vmul.f32 %v1694_v11, %v1692_v12  ;;  %v1737_v0 = vor.u32 8388608, %v5436_v24  ;;  %v1741_v10 = vsel %vm1740_vm4, %v1739_v15, 0  ;;  %v2896_v1 = vshrl.u32 %v2891_v16, 16 }
 0x26a   : > { %v5464_v47 = vadd.s32 %v2899_v8, %v2895_v22  ;;  %v2905_v43 = vadd.s32 %v2904_v7, %v2894_v33  ;;  %v5466_v17 = vshrl.u32 %v1741_v10, 5  ;;  %v2798_v50 = vadd.f32 -0.16666654, %v2797_v45 }
 0x26b   : > { %v1696_v59 = vxor.u32 2147483648, %v1695_v62  ;;  %v5471_v6 = vsel %vm1576_vm2, %v1698_v28, %v5380_v25  ;;  %v1743_v54 = vand.u32 31, %v1741_v10  ;;  %v2907_v5 = vmul.u32 %v5412_v14, %v2853_v55 }
 0x26c   : > { %v2906_v56 = vadd.s32 %v2905_v43, %v2896_v1  ;;  %vm2909_vm6 = vc.u32 %v5459_v51, %v5464_v47  ;;  %vm1761_vm8 = vcmp.lt.s32.totalorder %v5466_v17, 1  ;;  %vm1763_vm9 = vcmp.lt.s32.totalorder %v5466_v17, 3 }
 0x26d   : > { %v1697_v24 = vsel %vm1576_vm2, %v1696_v59, %v1695_v62  ;;  %v1744_v16 = vsub.s32 32, %v1743_v54  ;;  %v1746_v22 = vshll.u32 %v6236_v23, %v1743_v54  ;;  %v1749_v61 = vshll.u32 %v6237_v40, %v1743_v54 }
 0x26e   : > { %v5484_v25 = vsel %vm5446_vm3, %v5169_v9, %v1697_v24  ;;  %v2910_v8 = vadd.s32 1, %v2906_v56  ;;  %v1752_v14 = vshll.u32 %v6224_v41, %v1743_v54  ;;  %v1755_v63 = vshll.u32 %v6238_v4, %v1743_v54 }
 0x26f   : > { %v5490_v27 = vmul.f32 %v5484_v25, %v5484_v25  ;;  %v1747_v35 = vshrl.u32 %v6237_v40, %v1744_v16  ;;  %v1750_v48 = vshrl.u32 %v6224_v41, %v1744_v16  ;;  %v1753_v32 = vshrl.u32 %v6238_v4, %v1744_v16 }
 0x270   : > { %v2911_v28 = vsel %vm2909_vm6, %v2910_v8, %v2906_v56  ;;  %v1756_v30 = vshrl.u32 %v6225_v31, %v1744_v16  ;;  %v1758_v18 = vshll.u32 %v6225_v31, %v1743_v54  ;;  %v1759_v33 = vshrl.u32 %v6226_v57, %v1744_v16 }
 0x271   : > { %v1710_v58 = vmul.f32 -0.00019511016, %v5490_v27  ;;  %v2912_v15 = vadd.s32 %v2911_v28, %v2907_v5  ;;  %v1748_v45 = vor.u32 %v1747_v35, %v1746_v22  ;;  %v1751_v12 = vor.u32 %v1750_v48, %v1749_v61  ;;  %v641_v5 = vpop.f32.mrf.mxu3 }
 0x272   : > { %v1754_v11 = vor.u32 %v1753_v32, %v1752_v14  ;;  %v1757_v49 = vor.u32 %v1756_v30, %v1755_v63  ;;  %vm1764_vm10 = vcmp.lt.s32.totalorder %v5466_v17, 4  ;;  %v2799_v7 = vmul.f32 %v2798_v50, %v5401_v42 }
 0x273   : > { %v2913_v62 = vadd.s32 536870912, %v2912_v15  ;;  %v1769_v55 = vsel %vm1761_vm8, %v1748_v45, %v1751_v12  ;;  %v5504_v10 = vshll.u32 %v1737_v0, 8  ;;  %v5507_v1 = vand.u32 3, %v5392_v46 }
 0x274   : > { %v1760_v43 = vor.u32 %v1759_v33, %v1758_v18  ;;  %vm1762_vm11 = vcmp.lt.s32.totalorder %v5466_v17, 2  ;;  %v1770_v59 = vsel %vm1764_vm10, %v1757_v49, 920167782  ;;  %v1711_v54 = vadd.f32 0.008332121, %v1710_v58 }
 0x275   : > { %6291 = vst [vmem:[#allocation41_spill] sm:$0xff] %v5507_v1  ;;  %vm2816_vm12 = vcmp.lt.s32.totalorder %v5294_v60, 0  ;;  %v2914_v56 = vshrl.u32 %v2913_v62, 30  ;;  %v1771_v50 = vsel %vm1763_vm9, %v1754_v11, %v1770_v59  ;;  %v1773_v0 = vsel %vm1761_vm8, %v1751_v12, %v1754_v11 }
 0x276   : > { %v1772_v22 = vsel %vm1762_vm11, %v1769_v55, %v1771_v50  ;;  %v1774_v61 = vsel %vm1764_vm10, %v1760_v43, 1326507024  ;;  %v5525_v8 = vadd.f32 1.0, %v2799_v7  ;;  %v1778_v35 = vand.u32 65535, %v5504_v10 }
 0x277   : > { %v2915_v14 = vshll.u32 %v2914_v56, 30  ;;  %v1775_v63 = vsel %vm1763_vm9, %v1757_v49, %v1774_v61  ;;  %v1745_v48 = vshrl.u32 %v6236_v23, %v1744_v16  ;;  %v1803_v32 = vshrl.u32 %v1772_v22, 16 }
 0x278   : > { %v1776_v28 = vsel %vm1762_vm11, %v1773_v0, %v1775_v63  ;;  %v5534_v30 = vadd.f32 %v5291_v19, %v641_v5  ;;  %v1712_v18 = vmul.f32 %v1711_v54, %v5490_v27  ;;  %v1802_v7 = vand.u32 65535, %v1772_v22 }
 0x279   : > { %v2916_v58 = vsub.s32 %v2912_v15, %v2915_v14  ;;  %v1780_v33 = vand.u32 65535, %v1776_v28  ;;  %v2938_v62 = vsub.s32 4, %v2914_v56  ;;  %v1766_v49 = vsel %vm1764_vm10, %v1754_v11, 2102212464 }
 0x27a   : > { %v1779_v55 = vshrl.u32 %v5504_v10, 16  ;;  %v1781_v43 = vshrl.u32 %v1776_v28, 16  ;;  %v2908_v16 = vadd.s32 %v5464_v47, %v5459_v51  ;;  %v1805_v50 = vmul.u32 %v1803_v32, %v1778_v35 }
 0x27b   : > { %vm2917_vm5 = vcmp.lt.s32.totalorder %v2916_v58, 0  ;;  %v2918_v59 = vsub.s32 0, %v2916_v58  ;;  %v5544_v19 = vsel %vm1761_vm8, %v1745_v48, %v1748_v45  ;;  %v1713_v5 = vadd.f32 -0.16666654, %v1712_v18 }
 0x27c   : > { %v1783_v15 = vmul.u32 %v1781_v43, %v1778_v35  ;;  %v1784_v54 = vmul.u32 %v1780_v33, %v1779_v55  ;;  %v1767_v11 = vsel %vm1763_vm9, %v1751_v12, %v1766_v49  ;;  %v1806_v61 = vmul.u32 %v1802_v7, %v1779_v55 }
 0x27d   : > { %v2919_v22 = vsel %vm2917_vm5, %v2918_v59, %v2916_v58  ;;  %v2939_v51 = vsel %vm2816_vm12, %v2938_v62, %v2914_v56  ;;  %v1782_v47 = vmul.u32 %v1780_v33, %v1778_v35  ;;  %v6292_v28 = vand.u32 2147483647, %v5294_v60 }
 0x27e   : > { %v2920_v14 = vclz %v2919_v22  ;;  %v1786_v63 = vshll.u32 %v1783_v15, 16  ;;  %v1785_v48 = vmul.u32 %v1781_v43, %v1779_v55  ;;  %v1787_v46 = vshrl.u32 %v1783_v15, 16 }
 0x27f   : > { %vm5553_vm13 = vcmp.le.f32.partialorder %v6292_v28, 0.7853982  ;;  %v1804_v18 = vmul.u32 %v1802_v7, %v1778_v35  ;;  %v1808_v59 = vshll.u32 %v1805_v50, 16  ;;  %v1788_v0 = vshll.u32 %v1784_v54, 16 }
 0x280   : > { %v3316_v24 = vadd.s32 4294967294, %v2920_v14  ;;  %vm1790_vm1 = vc.u32 %v1782_v47, %v1786_v63  ;;  %v1792_v12 = vadd.s32 %v1786_v63, %v1782_v47  ;;  %v1807_v22 = vmul.u32 %v1803_v32, %v1779_v55 }
 0x281   : > { %v1791_v49 = vsel %vm1790_vm1, 1, %v6241_v26  ;;  %v1810_v56 = vshll.u32 %v1806_v61, 16  ;;  %vm1812_vm14 = vc.u32 %v1804_v18, %v1808_v59  ;;  %v1814_v15 = vadd.s32 %v1808_v59, %v1804_v18 }
 0x282   : > { %vm3317_vm2 = vcmp.lt.s32.totalorder %v3316_v24, 0  ;;  %v1793_v33 = vadd.s32 %v1791_v49, %v1785_v48  ;;  %vm1794_vm15 = vc.u32 %v1792_v12, %v1788_v0  ;;  %v1813_v62 = vsel %vm1812_vm14, 1, %v6241_v26 }
 0x283   : > { %v2923_v28 = vsel %vm3317_vm2, 0, %v3316_v24  ;;  %v1795_v43 = vsel %vm1794_vm15, 1, %v6241_v26  ;;  %v1815_v35 = vadd.s32 %v1813_v62, %v1807_v22  ;;  %v1789_v1 = vshrl.u32 %v1784_v54, 16 }
 0x284   : > { %v2924_v7 = vsub.s32 32, %v2923_v28  ;;  %v2928_v14 = vsub.s32 4294967266, %v2923_v28  ;;  %v1797_v42 = vadd.s32 %v1795_v43, %v1793_v33  ;;  %v2925_v47 = vshll.u32 %v2916_v58, %v2923_v28 }
 0x285   : > { %vm1816_vm0 = vc.u32 %v1814_v15, %v1810_v56  ;;  %v2972_v32 = vand.u32 2139095040, %v5534_v30  ;;  %v6295_v55 = vand.u32 2147483647, %v5534_v30  ;;  %v1714_v49 = vmul.f32 %v1713_v5, %v5490_v27 }
 0x286   : > { %v2926_v48 = vshrl.u32 %v2908_v16, %v2924_v7  ;;  %v2929_v0 = vadd.s32 127, %v2928_v14  ;;  %v1798_v12 = vadd.s32 %v1797_v42, %v1787_v46  ;;  %v1817_v24 = vsel %vm1816_vm0, 1, %v6241_v26 }
 0x287   : > { %v2976_v63 = vand.u32 8388607, %v6295_v55  ;;  %v1809_v18 = vshrl.u32 %v1805_v50, 16  ;;  %v1819_v59 = vadd.s32 %v1817_v24, %v1815_v35  ;;  %v2973_v22 = vshrl.u32 %v2972_v32, 23 }
 0x288   : > { %v2927_v62 = vor.u32 %v2926_v48, %v2925_v47  ;;  %v2930_v54 = vshll.u32 %v2929_v0, 23  ;;  %v2941_v58 = vsel %vm5553_vm13, 0, %v2939_v51  ;;  %v1799_v33 = vadd.s32 %v1798_v12, %v1789_v1  ;;  %v403_v48 = vpop.f32.mrf.mxu0 }
 0x289   : > { %v1811_v28 = vshrl.u32 %v1806_v61, 16  ;;  %v1820_v43 = vadd.s32 %v1819_v59, %v1809_v18  ;;  %v3318_v9 = vadd.s32 4294967169, %v2973_v22  ;;  %v2977_v55 = vor.u32 8388608, %v2976_v63 }
 0x28a   : > { %v5569_v42 = vmul.f32 %v5525_v8, %v5378_v21  ;;  %v6296_v46 = vsel %vm5446_vm3, 0, %v5471_v6  ;;  %v2931_v50 = vor.u32 4788187, %v2930_v54  ;;  %v1818_v5 = vadd.s32 %v1814_v15, %v1810_v56 }
 0x28b   : > { %v1718_v16 = vadd.s32 3, %v6296_v46  ;;  %v1715_v35 = vadd.f32 1.0, %v1714_v49  ;;  %v1768_v1 = vsel %vm1762_vm11, %v5544_v19, %v1767_v11  ;;  %v1821_v61 = vadd.s32 %v1820_v43, %v1811_v28 }
 0x28c   : > { %v2979_v51 = vadd.s32 1, %v3318_v9  ;;  %v2932_v7 = vand.u32 2147483647, %v2931_v50  ;;  %v2934_v14 = vcvt.s32.f32 %v2927_v62  ;;  %v2958_v47 = vadd.s32 3, %v2941_v58  ;;  %v5587_v9 = vld [vmem:[%s6119_s5] ss:$0 sm:$0xff]  ;;  %v288_v62 = vpop.xlane.xlu0 %287 }
 0x28d   : > { %vm1824_vm7 = vc.u32 %v1799_v33, %v1818_v5  ;;  %v1825_v21 = vadd.s32 1, %v1821_v61  ;;  %v5578_v8 = vshll.u32 %v2977_v55, 8  ;;  %v773_v34 = vmul.f32 -0.001358992, %v4020_v13 }
 0x28e   : > { %vm2980_vm4 = vcmp.gt.s32.totalorder %v2979_v51, 0  ;;  %v5581_v6 = vand.u32 3, %v1718_v16  ;;  %v2935_v56 = vmul.f32 %v2934_v14, %v2932_v7  ;;  %v1822_v15 = vmul.u32 %v5504_v10, %v1768_v1 }
 0x28f   : > { %v2981_v32 = vsel %vm2980_vm4, %v2979_v51, 0  ;;  %v2807_v17 = vxor.u32 2147483648, %v5569_v42  ;;  %v5591_v19 = vmul.f32 %v1715_v35, %v5484_v25  ;;  %v1826_v11 = vsel %vm1824_vm7, %v1825_v21, %v1821_v61 }
 0x290   : > { %v2983_v63 = vand.u32 31, %v2981_v32  ;;  %v2936_v0 = vxor.u32 2147483648, %v2935_v56  ;;  %v5593_v12 = vand.u32 3, %v2958_v47  ;;  %v1827_v24 = vadd.s32 %v1826_v11, %v1822_v15 }
 0x291   : > { %v5595_v49 = vmul.f32 2.0, %v403_v48  ;;  %v5597_v10 = vadd.s32 %v1818_v5, %v1799_v33  ;;  %v5600_v59 = vand.u32 65535, %v5578_v8  ;;  %v774_v22 = vadd.f32 0.041655596, %v773_v34  ;;  %v294_v34 = vpop.xlane.xlu1 %293 }
 0x292   : > { %v2984_v18 = vsub.s32 32, %v2983_v63  ;;  %v2937_v25 = vsel %vm2816_vm12, %v2936_v0, %v2935_v56  ;;  %v1828_v54 = vadd.s32 536870912, %v1827_v24  ;;  %v5604_v58 = vshrl.u32 %v2981_v32, 5 }
 0x293   : > { %v459_v28 = vadd.f32 %v5587_v9, %v288_v62  ;;  %v5610_v43 = vsel %vm5553_vm13, %v5294_v60, %v2937_v25  ;;  %vm1731_vm3 = vcmp.lt.s32.totalorder %v5366_v38, 0  ;;  %v2989_v55 = vshll.u32 %v6237_v40, %v2983_v63 }
 0x294   : > { %v2987_v33 = vshrl.u32 %v6237_v40, %v2984_v18  ;;  %v2990_v46 = vshrl.u32 %v6224_v41, %v2984_v18  ;;  %v5618_v16 = vmul.f32 %v5610_v43, %v5610_v43  ;;  %v1829_v50 = vshrl.u32 %v1828_v54, 30 }
 0x295   : > { %v2993_v5 = vshrl.u32 %v6238_v4, %v2984_v18  ;;  %v2996_v35 = vshrl.u32 %v6225_v31, %v2984_v18  ;;  %v2992_v45 = vshll.u32 %v6224_v41, %v2983_v63  ;;  %v2995_v1 = vshll.u32 %v6238_v4, %v2983_v63 }
 0x296   : > { %v2998_v61 = vshll.u32 %v6225_v31, %v2983_v63  ;;  %v2999_v51 = vshrl.u32 %v6226_v57, %v2984_v18  ;;  %v2950_v40 = vmul.f32 -0.00019511016, %v5618_v16  ;;  %v1830_v7 = vshll.u32 %v1829_v50, 30 }
 0x297   : > { %v2986_v14 = vshll.u32 %v6236_v23, %v2983_v63  ;;  %v5629_v47 = vshrl.u32 %v5578_v8, 16  ;;  %v6297_v21 = vand.u32 2147483647, %v5366_v38  ;;  %v2991_v41 = vor.u32 %v2990_v46, %v2989_v55 }
 0x298   : > { %v2994_v4 = vor.u32 %v2993_v5, %v2992_v45  ;;  %v2997_v56 = vor.u32 %v2996_v35, %v2995_v1  ;;  %v3000_v31 = vor.u32 %v2999_v51, %v2998_v61  ;;  %v5637_v15 = vsub.s32 %v1827_v24, %v1830_v7  ;;  %v406_v45 = vpop.f32.mrf.mxu0  ;;  %v5667_v61 = vpop.xlane.xlu2 %299 }
 0x299   : > { %vm5633_vm6 = vcmp.le.f32.partialorder %v6297_v21, 0.7853982  ;;  %v1853_v57 = vsub.s32 4, %v1829_v50  ;;  %v2988_v32 = vor.u32 %v2987_v33, %v2986_v14  ;;  %v5640_v11 = vmul.f32 -0.001358992, %v4257_v39 }
 0x29a   : > { %v2951_v63 = vadd.f32 0.008332121, %v2950_v40  ;;  %vm3001_vm8 = vcmp.lt.s32.totalorder %v5604_v58, 1  ;;  %v775_v48 = vmul.f32 %v774_v22, %v4020_v13  ;;  %v491_v0 = vsub.f32 %v459_v28, %v5595_v49 }
 0x29b   : > { %vm1832_vm9 = vcmp.lt.s32.totalorder %v5637_v15, 0  ;;  %v1833_v62 = vsub.s32 0, %v5637_v15  ;;  %vm3002_vm10 = vcmp.lt.s32.totalorder %v5604_v58, 2  ;;  %vm3004_vm11 = vcmp.lt.s32.totalorder %v5604_v58, 4 }
 0x29c   : > { %vm3003_vm12 = vcmp.lt.s32.totalorder %v5604_v58, 3  ;;  %v3010_v24 = vsel %vm3004_vm11, %v2997_v56, 920167782  ;;  %v3013_v25 = vsel %vm3001_vm8, %v2991_v41, %v2994_v4  ;;  %v3014_v54 = vsel %vm3004_vm11, %v3000_v31, 1326507024 }
 0x29d   : > { %v1834_v33 = vsel %vm1832_vm9, %v1833_v62, %v5637_v15  ;;  %v5655_v49 = vsel %vm1731_vm3, %v1853_v57, %v1829_v50  ;;  %v3006_v22 = vsel %vm3004_vm11, %v2994_v4, 2102212464  ;;  %v3009_v28 = vsel %vm3001_vm8, %v2988_v32, %v2991_v41 }
 0x29e   : > { %v2952_v55 = vmul.f32 %v2951_v63, %v5618_v16  ;;  %v1835_v46 = vclz %v1834_v33  ;;  %v3011_v5 = vsel %vm3003_vm12, %v2994_v4, %v3010_v24  ;;  %v3015_v35 = vsel %vm3003_vm12, %v2997_v56, %v3014_v54 }
 0x29f   : > { %v2985_v1 = vshrl.u32 %v6236_v23, %v2984_v18  ;;  %v3016_v50 = vsel %vm3002_vm10, %v3013_v25, %v3015_v35  ;;  %v776_v51 = vadd.f32 -0.4999988, %v775_v48  ;;  %v5669_v40 = vmul.f32 2.0, %v406_v45 }
 0x2a0   : > { %v3295_v7 = vadd.s32 4294967294, %v1835_v46  ;;  %v3012_v14 = vsel %vm3002_vm10, %v3009_v28, %v3011_v5  ;;  %v3020_v21 = vand.u32 65535, %v3016_v50  ;;  %v3021_v4 = vshrl.u32 %v3016_v50, 16 }
 0x2a1   : > { %v1856_v56 = vsel %vm5633_vm6, 0, %v5655_v49  ;;  %v3005_v23 = vsel %vm3001_vm8, %v2985_v1, %v2988_v32  ;;  %v3007_v18 = vsel %vm3003_vm12, %v2991_v41, %v3006_v22  ;;  %v507_v31 = vmul.f32 -0.5, %v491_v0 }
 0x2a2   : > { %v2953_v57 = vadd.f32 -0.16666654, %v2952_v55  ;;  %vm3296_vm5 = vcmp.lt.s32.totalorder %v3295_v7, 0  ;;  %v3023_v63 = vmul.u32 %v3021_v4, %v5600_v59  ;;  %v3024_v48 = vmul.u32 %v3020_v21, %v5629_v47 }
 0x2a3   : > { %v1838_v62 = vsel %vm3296_vm5, 0, %v3295_v7  ;;  %v3042_v24 = vand.u32 65535, %v3012_v14  ;;  %v3043_v25 = vshrl.u32 %v3012_v14, 16  ;;  %v777_v54 = vmul.f32 %v776_v51, %v4020_v13 }
 0x2a4   : > { %v1839_v33 = vsub.s32 32, %v1838_v62  ;;  %v1843_v49 = vsub.s32 4294967266, %v1838_v62  ;;  %v3022_v28 = vmul.u32 %v3020_v21, %v5600_v59  ;;  %v3026_v32 = vshll.u32 %v3023_v63, 16 }
 0x2a5   : > { %v1840_v46 = vshll.u32 %v5637_v15, %v1838_v62  ;;  %v5687_v41 = vsel %vm3002_vm10, %v3005_v23, %v3007_v18  ;;  %v3025_v0 = vmul.u32 %v3021_v4, %v5629_v47  ;;  %v3028_v22 = vshll.u32 %v3024_v48, 16  ;;  %v5704_v23 = vpop.xlane.xlu2 %302 }
 0x2a6   : > { %vm791_vm13 = vcmp.eq.s32.totalorder %v4334_v53, 0  ;;  %v1841_v55 = vshrl.u32 %v5597_v10, %v1839_v33  ;;  %v1844_v5 = vadd.s32 127, %v1843_v49  ;;  %vm3030_vm1 = vc.u32 %v3022_v28, %v3026_v32  ;;  %v5699_v10 = vld [vmem:[%s6118_s4] ss:$0 sm:$0xff] }
 0x2a7   : > { %v3032_v13 = vadd.s32 %v3026_v32, %v3022_v28  ;;  %v3031_v35 = vsel %vm3030_vm1, 1, %v6241_v26  ;;  %v3045_v45 = vmul.u32 %v3043_v25, %v5600_v59  ;;  %v3046_v15 = vmul.u32 %v3042_v24, %v5629_v47 }
 0x2a8   : > { %v778_v1 = vadd.f32 1.0, %v777_v54  ;;  %vm794_vm14 = vcmp.eq.s32.totalorder %v4334_v53, 2  ;;  %v1842_v58 = vor.u32 %v1841_v55, %v1840_v46  ;;  %v1845_v50 = vshll.u32 %v1844_v5, 23 }
 0x2a9   : > { %v3033_v51 = vadd.s32 %v3031_v35, %v3025_v0  ;;  %vm3034_vm2 = vc.u32 %v3032_v13, %v3028_v22  ;;  %vm790_vm15 = vcmp.lt.s32.totalorder %v4334_v53, 2  ;;  %v3027_v7 = vshrl.u32 %v3023_v63, 16 }
 0x2aa   : > { %v3035_v14 = vsel %vm3034_vm2, 1, %v6241_v26  ;;  %v3044_v21 = vmul.u32 %v3042_v24, %v5600_v59  ;;  %v3048_v4 = vshll.u32 %v3045_v45, 16  ;;  %v1846_v18 = vor.u32 4788187, %v1845_v50 }
 0x2ab   : > { %v3037_v62 = vadd.s32 %v3035_v14, %v3033_v51  ;;  %v3047_v54 = vmul.u32 %v3043_v25, %v5629_v47  ;;  %v3050_v33 = vshll.u32 %v3046_v15, 16  ;;  %vm787_vm0 = vweird.f32 %v3720_v52 }
 0x2ac   : > { %v1849_v49 = vcvt.s32.f32 %v1842_v58  ;;  %vm3052_vm7 = vc.u32 %v3044_v21, %v3048_v4  ;;  %v3054_v28 = vadd.s32 %v3048_v4, %v3044_v21  ;;  %v795_v32 = vxor.u32 2147483648, %v778_v1 }
 0x2ad   : > { %v1847_v46 = vand.u32 2147483647, %v1846_v18  ;;  %v3038_v63 = vadd.s32 %v3037_v62, %v3027_v7  ;;  %v3053_v0 = vsel %vm3052_vm7, 1, %v6241_v26  ;;  %v527_v59 = vmul.f32 %v5699_v10, %v507_v31  ;;  %v312_v62 = vpop.xlane.xlu2 %311 }
 0x2ae   : > { %v2954_v24 = vmul.f32 %v2953_v57, %v5618_v16  ;;  %v5711_v22 = vadd.s32 3, %v1856_v56  ;;  %v3055_v55 = vadd.s32 %v3053_v0, %v3047_v54  ;;  %vm3056_vm4 = vc.u32 %v3054_v28, %v3050_v33 }
 0x2af   : > { %v1850_v47 = vmul.f32 %v1849_v49, %v1847_v46  ;;  %v3029_v25 = vshrl.u32 %v3024_v48, 16  ;;  %v3057_v5 = vsel %vm3056_vm4, 1, %v6241_v26  ;;  %v6300_v13 = vxor.u32 2147483648, %v4341_v29  ;;  %v6301_v46 = vld [vmem:[#allocation15_spill] sm:$0xff] }
 0x2b0   : > { %v3049_v58 = vshrl.u32 %v3045_v45, 16  ;;  %v3059_v50 = vadd.s32 %v3057_v5, %v3055_v55  ;;  %v3062_v31 = vmul.u32 %v5578_v8, %v5687_v41  ;;  %v543_v57 = vmul.f32 1.442695, %v527_v59  ;;  %v6303_v5 = vld [vmem:[#allocation6_spill] sm:$0xff] }
 0x2b1   : > { %v793_v35 = vsel %vm791_vm13, %v778_v1, %v6300_v13  ;;  %v1851_v56 = vxor.u32 2147483648, %v1850_v47  ;;  %v5720_v51 = vadd.s32 %v3038_v63, %v3029_v25  ;;  %v3051_v7 = vshrl.u32 %v3046_v15, 16  ;;  %v291_v1 = vpop.xlane.xlu0 %290 }
 0x2b2   : > { %v796_v48 = vsel %vm794_vm14, %v795_v32, %v4341_v29  ;;  %v3060_v26 = vadd.s32 %v3059_v50, %v3049_v58  ;;  %3386 = vpow2.f32 %v543_v57  ;;  %v929_v45 = vadd.f32 0.041655596, %v5640_v11  ;;  %v427_v29 = vpop.f32.mrf.mxu2 }
 0x2b3   : > { %v797_v14 = vsel %vm790_vm15, %v793_v35, %v796_v48  ;;  %v5729_v8 = vadd.f32 1.0, %v2954_v24  ;;  %v1852_v41 = vsel %vm1731_vm3, %v1851_v56, %v1850_v47  ;;  %v5733_v15 = vadd.s32 %v3054_v28, %v3050_v33  ;;  %v6302_v47 = vld [vmem:[#allocation18_spill] sm:$0xff]  ;;  %v409_v48 = vpop.f32.mrf.mxu0 }
 0x2b4   : > { %v460_v21 = vadd.f32 %v5587_v9, %v291_v1  ;;  %v5739_v53 = vsel %vm5633_vm6, %v5366_v38, %v1852_v41  ;;  %v3061_v4 = vadd.s32 %v3060_v26, %v3051_v7  ;;  %v930_v18 = vmul.f32 %v929_v45, %v4257_v39 }
 0x2b5   : > { %v2013_v11 = vmul.f32 -0.001358992, %v4232_v36  ;;  %v5745_v54 = vmul.f32 %v5739_v53, %v5739_v53  ;;  %vm3064_vm3 = vc.u32 %v5720_v51, %v5733_v15  ;;  %v798_v33 = vsel %vm787_vm0, nan, %v797_v14 }
 0x2b6   : > { %v492_v49 = vsub.f32 %v460_v21, %v5669_v40  ;;  %v3065_v28 = vadd.s32 1, %v3061_v4  ;;  %v931_v32 = vadd.f32 -0.4999988, %v930_v18  ;;  %vm945_vm6 = vcmp.lt.s32.totalorder %v6301_v46, 2 }
 0x2b7   : > { %v483_v63 = vmul.f32 2.0, %v427_v29  ;;  %v2014_v0 = vadd.f32 0.041655596, %v2013_v11  ;;  %v1865_v59 = vmul.f32 -0.00019511016, %v5745_v54  ;;  %v467_v55 = vadd.f32 %v5587_v9, %v312_v62  ;;  %v6304_v29 = vld [vmem:[#allocation16_spill] sm:$0xff] }
 0x2b8   : > { %v508_v24 = vmul.f32 -0.5, %v492_v49  ;;  %v1083_v25 = vmul.f32 -0.001358992, %v6302_v47  ;;  %v3387_v52 = vpop.eup %3386  ;;  %vm942_vm8 = vweird.f32 %v6303_v5  ;;  %v3066_v40 = vsel %vm3064_vm3, %v3065_v28, %v3061_v4 }
 0x2b9   : > { %v461_v13 = vadd.f32 %v5587_v9, %v294_v34  ;;  %v932_v35 = vmul.f32 %v931_v32, %v4257_v39  ;;  %v2015_v58 = vmul.f32 %v2014_v0, %v4232_v36  ;;  %v1866_v50 = vadd.f32 0.008332121, %v1865_v59 }
 0x2ba   : > { %v3067_v57 = vadd.s32 %v3066_v40, %v3062_v31  ;;  %v3124_v56 = vmul.f32 %v3387_v52, %v798_v33  ;;  %v528_v7 = vmul.f32 %v5699_v10, %v508_v24  ;;  %v499_v45 = vsub.f32 %v467_v55, %v483_v63  ;;  %v6306_v33 = vld [vmem:[#allocation5_spill] sm:$0xff]  ;;  %v6307_v52 = vld [vmem:[#allocation10_spill] sm:$0xff] }
 0x2bb   : > { %v933_v26 = vadd.f32 1.0, %v932_v35  ;;  %v2016_v14 = vadd.f32 -0.4999988, %v2015_v58  ;;  %v477_v1 = vmul.f32 2.0, %v409_v48  ;;  %vm946_vm9 = vcmp.eq.s32.totalorder %v6301_v46, 0 }
 0x2bc   : > { %v3068_v41 = vadd.s32 536870912, %v3067_v57  ;;  %3140 = vst [vmem:[%s5766_s14] sm:$0xff] %v3124_v56  ;;  %v545_v39 = vmul.f32 1.442695, %v528_v7  ;;  %v1084_v21 = vadd.f32 0.041655596, %v1083_v25  ;;  %v6305_v4 = vxor.u32 2147483648, %v6304_v29  ;;  %v297_v25 = vpop.xlane.xlu1 %296 }
 0x2bd   : > { %v950_v18 = vxor.u32 2147483648, %v933_v26  ;;  %v2017_v11 = vmul.f32 %v2016_v14, %v4232_v36  ;;  %v515_v62 = vmul.f32 -0.5, %v499_v45  ;;  %vm2027_vm10 = vweird.f32 %v6306_v33 }
 0x2be   : > { %v948_v31 = vsel %vm946_vm9, %v933_v26, %v6305_v4  ;;  %v1867_v34 = vmul.f32 %v1866_v50, %v5745_v54  ;;  %v5775_v49 = vshrl.u32 %v3068_v41, 30  ;;  %vm949_vm11 = vcmp.eq.s32.totalorder %v6301_v46, 2 }
 0x2bf   : > { %3388 = vpow2.f32 %v545_v39  ;;  %v951_v28 = vsel %vm949_vm11, %v950_v18, %v6304_v29  ;;  %v2018_v32 = vadd.f32 1.0, %v2017_v11  ;;  %v535_v63 = vmul.f32 %v5699_v10, %v515_v62  ;;  %v430_v39 = vpop.f32.mrf.mxu2  ;;  %v6310_v18 = vld [vmem:[#allocation8_spill] sm:$0xff] }
 0x2c0   : > { %v493_v0 = vsub.f32 %v461_v13, %v477_v1  ;;  %v1722_v59 = vxor.u32 2147483648, %v5591_v19  ;;  %v5782_v36 = vand.u32 3, %v5711_v22  ;;  %v3070_v24 = vshll.u32 %v5775_v49, 30  ;;  %v6308_v22 = vld [vmem:[#allocation12_spill] sm:$0xff] }
 0x2c1   : > { %v952_v55 = vsel %vm945_vm6, %v948_v31, %v951_v28  ;;  %vm2031_vm12 = vcmp.eq.s32.totalorder %v6307_v52, 0  ;;  %v2035_v40 = vxor.u32 2147483648, %v2018_v32  ;;  %v559_v35 = vmul.f32 1.442695, %v535_v63 }
 0x2c2   : > { %v1085_v58 = vmul.f32 %v1084_v21, %v6302_v47  ;;  %v1868_v50 = vadd.f32 -0.16666654, %v1867_v34  ;;  %v5789_v56 = vsub.s32 %v3067_v57, %v3070_v24  ;;  %v953_v13 = vsel %vm942_vm8, nan, %v952_v55 }
 0x2c3   : > { %v6309_v7 = vxor.u32 2147483648, %v6308_v22  ;;  %v5797_v46 = vmul.f32 %v5729_v8, %v5610_v43  ;;  %vm2034_vm5 = vcmp.eq.s32.totalorder %v6307_v52, 2  ;;  %3390 = vpow2.f32 %v559_v35  ;;  %v5805_v8 = vpop.xlane.xlu0 %305 }
 0x2c4   : > { %v509_v26 = vmul.f32 -0.5, %v493_v0  ;;  %vm3072_vm13 = vcmp.lt.s32.totalorder %v5789_v56, 0  ;;  %v3073_v57 = vsub.s32 0, %v5789_v56  ;;  %vm2030_vm1 = vcmp.lt.s32.totalorder %v6307_v52, 2  ;;  %v6311_v0 = vld [vmem:[#allocation20_spill] sm:$0xff] }
 0x2c5   : > { %v2033_v48 = vsel %vm2031_vm12, %v2018_v32, %v6309_v7  ;;  %v3389_v14 = vpop.eup %3388  ;;  %v2036_v5 = vsel %vm2034_vm5, %v2035_v40, %v6308_v22  ;;  %v1086_v43 = vadd.f32 -0.4999988, %v1085_v58  ;;  %v1869_v21 = vmul.f32 %v1868_v50, %v5745_v54  ;;  %v5828_v58 = vpop.xlane.xlu1 %308  ;;  %v6312_v7 = vld [vmem:[#allocation14_spill] sm:$0xff] }
 0x2c6   : > { %v3125_v45 = vmul.f32 %v3389_v14, %v953_v13  ;;  %v2037_v1 = vsel %vm2030_vm1, %v2033_v48, %v2036_v5  ;;  %v529_v41 = vmul.f32 %v5699_v10, %v509_v26  ;;  %v3074_v29 = vsel %vm3072_vm13, %v3073_v57, %v5789_v56  ;;  %v6313_v57 = vld [vmem:[#allocation25_spill] sm:$0xff] }
 0x2c7   : > { %v5811_v4 = vadd.f32 %v5587_v9, %v5667_v61  ;;  %v462_v31 = vadd.f32 %v5587_v9, %v297_v25  ;;  %vm1097_vm14 = vweird.f32 %v6310_v18  ;;  %v3075_v11 = vclz %v3074_v29  ;;  %v412_v61 = vpop.f32.mrf.mxu0  ;;  %v6315_v29 = vld [vmem:[#allocation29_spill] sm:$0xff] }
 0x2c8   : > { %3141 = vst [vmem:[%s5766_s14 + $0x8] sm:$0xff] %v3125_v45  ;;  %v2038_v62 = vsel %vm2027_vm10, nan, %v2037_v1  ;;  %v547_v34 = vmul.f32 1.442695, %v529_v41  ;;  %v1087_v28 = vmul.f32 %v1086_v43, %v6302_v47  ;;  %v2962_v32 = vxor.u32 2147483648, %v5797_v46 }
 0x2c9   : > { %v3063_v63 = vadd.s32 %v5733_v15, %v5720_v51  ;;  %vm1100_vm2 = vcmp.lt.s32.totalorder %v6311_v0, 2  ;;  %v1238_v24 = vmul.f32 -0.001358992, %v4824_v20  ;;  %v3391_v55 = vpop.eup %3390  ;;  %v3319_v25 = vadd.s32 4294967294, %v3075_v11 }
 0x2ca   : > { %3392 = vpow2.f32 %v547_v34  ;;  %v1088_v52 = vadd.f32 1.0, %v1087_v28  ;;  %v478_v33 = vmul.f32 2.0, %v412_v61  ;;  %v5824_v40 = vadd.f32 1.0, %v1869_v21 }
 0x2cb   : > { %vm2971_vm15 = vcmp.lt.s32.totalorder %v5534_v30, 0  ;;  %v3093_v47 = vsub.s32 4, %v5775_v49  ;;  %v3132_v35 = vmul.f32 %v3391_v55, %v2038_v62  ;;  %v1239_v51 = vadd.f32 0.041655596, %v1238_v24  ;;  %v315_v61 = vpop.xlane.xlu0 %314  ;;  %v433_v24 = vpop.f32.mrf.mxu2  ;;  %v6316_v55 = vld [vmem:[#allocation11_spill] sm:$0xff] }
 0x2cc   : > { %vm3320_vm0 = vcmp.lt.s32.totalorder %v3319_v25, 0  ;;  %vm1101_vm7 = vcmp.eq.s32.totalorder %v6311_v0, 0  ;;  %v1105_v15 = vxor.u32 2147483648, %v1088_v52  ;;  %v494_v50 = vsub.f32 %v462_v31, %v478_v33 }
 0x2cd   : > { %v3078_v13 = vsel %vm3320_vm0, 0, %v3319_v25  ;;  %3148 = vst [vmem:[%s5766_s14 + $0x40] sm:$0xff] %v3132_v35  ;;  %vm1104_vm4 = vcmp.eq.s32.totalorder %v6311_v0, 2  ;;  %v1240_v22 = vmul.f32 %v1239_v51, %v4824_v20  ;;  %v2168_v48 = vmul.f32 -0.001358992, %v6312_v7 }
 0x2ce   : > { %v3079_v26 = vsub.s32 32, %v3078_v13  ;;  %v3083_v14 = vsub.s32 4294967266, %v3078_v13  ;;  %v6314_v5 = vxor.u32 2147483648, %v6313_v57  ;;  %v484_v1 = vmul.f32 2.0, %v430_v39 }
 0x2cf   : > { %v3080_v41 = vshll.u32 %v5789_v56, %v3078_v13  ;;  %v1106_v43 = vsel %vm1104_vm4, %v1105_v15, %v6313_v57  ;;  %v510_v21 = vmul.f32 -0.5, %v494_v50  ;;  %vm1256_vm3 = vcmp.eq.s32.totalorder %v6315_v29, 0  ;;  %v415_v57 = vpop.f32.mrf.mxu0 }
 0x2d0   : > { %v1103_v45 = vsel %vm1101_vm7, %v1088_v52, %v6314_v5  ;;  %v3393_v31 = vpop.eup %3392  ;;  %v3081_v11 = vshrl.u32 %v3063_v63, %v3079_v26  ;;  %v3084_v62 = vadd.s32 127, %v3083_v14  ;;  %v1241_v28 = vadd.f32 -0.4999988, %v1240_v22  ;;  %v6320_v26 = vld [vmem:[#allocation22_spill] sm:$0xff] }
 0x2d1   : > { %v1107_v34 = vsel %vm1100_vm2, %v1103_v45, %v1106_v43  ;;  %vm1255_vm6 = vcmp.lt.s32.totalorder %v6315_v29, 2  ;;  %vm1252_vm8 = vweird.f32 %v6316_v55  ;;  %v530_v39 = vmul.f32 %v5699_v10, %v510_v21  ;;  %v318_v21 = vpop.xlane.xlu1 %317 }
 0x2d2   : > { %v1108_v56 = vsel %vm1097_vm14, nan, %v1107_v34  ;;  %vm1259_vm9 = vcmp.eq.s32.totalorder %v6315_v29, 2  ;;  %v2169_v63 = vadd.f32 0.041655596, %v2168_v48  ;;  %v3082_v25 = vor.u32 %v3081_v11, %v3080_v41  ;;  %v6321_v41 = vld [vmem:[#allocation17_spill] sm:$0xff]  ;;  %v6322_v11 = vld [vmem:[#allocation32_spill] sm:$0xff] }
 0x2d3   : > { %v3085_v52 = vshll.u32 %v3084_v62, 23  ;;  %v3126_v0 = vmul.f32 %v3393_v31, %v1108_v56  ;;  %v1242_v33 = vmul.f32 %v1241_v28, %v4824_v20  ;;  %v549_v35 = vmul.f32 1.442695, %v530_v39 }
 0x2d4   : > { %v2170_v51 = vmul.f32 %v2169_v63, %v6312_v7  ;;  %v468_v15 = vadd.f32 %v5587_v9, %v315_v61  ;;  %v485_v50 = vmul.f32 2.0, %v433_v24  ;;  %v6317_v18 = vand.u32 2147483647, %v5534_v30  ;;  %v6324_v24 = vld [vmem:[#allocation7_spill] sm:$0xff] }
 0x2d5   : > { %v3086_v22 = vor.u32 4788187, %v3085_v52  ;;  %v5860_v48 = vsel %vm2971_vm15, %v3093_v47, %v5775_v49  ;;  %3142 = vst [vmem:[%s5766_s14 + $0x10] sm:$0xff] %v3126_v0  ;;  %v1243_v20 = vadd.f32 1.0, %v1242_v33  ;;  %v2323_v14 = vmul.f32 -0.001358992, %v6320_v26 }
 0x2d6   : > { %vm5853_vm10 = vcmp.le.f32.partialorder %v6317_v18, 0.7853982  ;;  %v3089_v5 = vcvt.s32.f32 %v3082_v25  ;;  %3394 = vpow2.f32 %v549_v35  ;;  %v2171_v45 = vadd.f32 -0.4999988, %v2170_v51 }
 0x2d7   : > { %vm2185_vm11 = vcmp.lt.s32.totalorder %v6321_v41, 2  ;;  %v500_v43 = vsub.f32 %v468_v15, %v484_v1  ;;  %v3087_v31 = vand.u32 2147483647, %v3086_v22  ;;  %v6323_v62 = vxor.u32 2147483648, %v6322_v11  ;;  %v6325_v22 = vld [vmem:[#allocation21_spill] sm:$0xff] }
 0x2d8   : > { %v1260_v49 = vxor.u32 2147483648, %v1243_v20  ;;  %v2324_v47 = vadd.f32 0.041655596, %v2323_v14  ;;  %v2172_v28 = vmul.f32 %v2171_v45, %v6312_v7  ;;  %vm2186_vm12 = vcmp.eq.s32.totalorder %v6321_v41, 0 }
 0x2d9   : > { %v1258_v34 = vsel %vm1256_vm3, %v1243_v20, %v6323_v62  ;;  %vm2189_vm5 = vcmp.eq.s32.totalorder %v6321_v41, 2  ;;  %v516_v61 = vmul.f32 -0.5, %v500_v43  ;;  %vm2182_vm13 = vweird.f32 %v6324_v24  ;;  %v6332_v24 = vld [vmem:[#allocation27_spill] sm:$0xff] }
 0x2da   : > { %v3090_v56 = vmul.f32 %v3089_v5, %v3087_v31  ;;  %v1261_v1 = vsel %vm1259_vm9, %v1260_v49, %v6322_v11  ;;  %v2325_v39 = vmul.f32 %v2324_v47, %v6320_v26  ;;  %v469_v63 = vadd.f32 %v5587_v9, %v318_v21  ;;  %v6327_v31 = vld [vmem:[#allocation9_spill] sm:$0xff]  ;;  %v436_v47 = vpop.f32.mrf.mxu2 }
 0x2db   : > { %v1262_v25 = vsel %vm1255_vm6, %v1258_v34, %v1261_v1  ;;  %v2173_v7 = vadd.f32 1.0, %v2172_v28  ;;  %v536_v52 = vmul.f32 %v5699_v10, %v516_v61  ;;  %v479_v0 = vmul.f32 2.0, %v415_v57  ;;  %v418_v28 = vpop.f32.mrf.mxu0  ;;  %v6328_v1 = vld [vmem:[#allocation24_spill] sm:$0xff] }
 0x2dc   : > { %v3091_v33 = vxor.u32 2147483648, %v3090_v56  ;;  %v1263_v35 = vsel %vm1252_vm8, nan, %v1262_v25  ;;  %v2326_v51 = vadd.f32 -0.4999988, %v2325_v39  ;;  %v501_v15 = vsub.f32 %v469_v63, %v485_v50  ;;  %v3395_v18 = vpop.eup %3394  ;;  %v6329_v39 = vld [vmem:[#allocation33_spill] sm:$0xff]  ;;  %v6330_v25 = vld [vmem:[#allocation28_spill] sm:$0xff] }
 0x2dd   : > { %v6326_v20 = vxor.u32 2147483648, %v6325_v22  ;;  %v2190_v5 = vxor.u32 2147483648, %v2173_v7  ;;  %v561_v29 = vmul.f32 1.442695, %v536_v52  ;;  %v495_v45 = vsub.f32 %v5811_v4, %v479_v0 }
 0x2de   : > { %v3092_v57 = vsel %vm2971_vm15, %v3091_v33, %v3090_v56  ;;  %v3127_v43 = vmul.f32 %v3395_v18, %v1263_v35  ;;  %v2327_v55 = vmul.f32 %v2326_v51, %v6320_v26  ;;  %v517_v21 = vmul.f32 -0.5, %v501_v15 }
 0x2df   : > { %v2188_v14 = vsel %vm2186_vm12, %v2173_v7, %v6326_v20  ;;  %vm2337_vm1 = vweird.f32 %v6327_v31  ;;  %v5895_v50 = vsel %vm5853_vm10, %v5534_v30, %v3092_v57  ;;  %v2191_v11 = vsel %vm2189_vm5, %v2190_v5, %v6325_v22 }
 0x2e0   : > { %3396 = vpow2.f32 %v561_v29  ;;  %v511_v4 = vmul.f32 -0.5, %v495_v45  ;;  %v5902_v62 = vmul.f32 %v5895_v50, %v5895_v50  ;;  %3143 = vst [vmem:[%s5766_s14 + $0x18] sm:$0xff] %v3127_v43  ;;  %v2192_v26 = vsel %vm2185_vm11, %v2188_v14, %v2191_v11  ;;  %v321_v14 = vpop.xlane.xlu2 %320 }
 0x2e1   : > { %v2328_v34 = vadd.f32 1.0, %v2327_v55  ;;  %v537_v49 = vmul.f32 %v5699_v10, %v517_v21  ;;  %v5910_v61 = vmul.f32 %v5824_v40, %v5739_v53  ;;  %v3096_v56 = vsel %vm5853_vm10, 0, %v5860_v48  ;;  %v6333_v21 = vld [vmem:[#allocation36_spill] sm:$0xff] }
 0x2e2   : > { %vm2341_vm14 = vcmp.eq.s32.totalorder %v6328_v1, 0  ;;  %v1393_v63 = vmul.f32 -0.001358992, %v6329_v39  ;;  %v6331_v41 = vxor.u32 2147483648, %v6330_v25  ;;  %v531_v33 = vmul.f32 %v5699_v10, %v511_v4  ;;  %v6334_v4 = vld [vmem:[#allocation19_spill] sm:$0xff] }
 0x2e3   : > { %v2345_v52 = vxor.u32 2147483648, %v2328_v34  ;;  %v563_v0 = vmul.f32 1.442695, %v537_v49  ;;  %v3105_v35 = vmul.f32 -0.00019511016, %v5902_v62  ;;  %v2193_v53 = vsel %vm2182_vm13, nan, %v2192_v26 }
 0x2e4   : > { %v2343_v7 = vsel %vm2341_vm14, %v2328_v34, %v6331_v41  ;;  %vm2344_vm2 = vcmp.eq.s32.totalorder %v6328_v1, 2  ;;  %v1394_v40 = vadd.f32 0.041655596, %v1393_v63  ;;  %v464_v13 = vadd.f32 %v5587_v9, %v5704_v23  ;;  %v421_v41 = vpop.f32.mrf.mxu0 }
 0x2e5   : > { %vm2340_vm15 = vcmp.lt.s32.totalorder %v6328_v1, 2  ;;  %v2346_v48 = vsel %vm2344_vm2, %v2345_v52, %v6330_v25  ;;  %3398 = vpow2.f32 %v563_v0  ;;  %v5928_v15 = vadd.s32 3, %v3096_v56 }
 0x2e6   : > { %v3397_v51 = vpop.eup %3396  ;;  %v2347_v18 = vsel %vm2340_vm15, %v2343_v7, %v2346_v48  ;;  %v1395_v22 = vmul.f32 %v1394_v40, %v6329_v39  ;;  %v2478_v20 = vmul.f32 -0.001358992, %v6332_v24  ;;  %v1877_v5 = vxor.u32 2147483648, %v5910_v61  ;;  %v439_v7 = vpop.f32.mrf.mxu2  ;;  %v6336_v48 = vld [vmem:[#allocation13_spill] sm:$0xff] }
 0x2e7   : > { %v3133_v29 = vmul.f32 %v3397_v51, %v2193_v53  ;;  %v551_v45 = vmul.f32 1.442695, %v531_v33  ;;  %v486_v23 = vmul.f32 2.0, %v436_v47  ;;  %v3106_v57 = vadd.f32 0.008332121, %v3105_v35 }
 0x2e8   : > { %v465_v43 = vadd.f32 %v5587_v9, %v5805_v8  ;;  %v1396_v55 = vadd.f32 -0.4999988, %v1395_v22  ;;  %vm1410_vm0 = vcmp.lt.s32.totalorder %v6333_v21, 2  ;;  %v2479_v11 = vadd.f32 0.041655596, %v2478_v20 }
 0x2e9   : > { %vm1407_vm7 = vweird.f32 %v6334_v4  ;;  %3149 = vst [vmem:[%s5766_s14 + $0x48] sm:$0xff] %v3133_v29  ;;  %v2348_v26 = vsel %vm2337_vm1, nan, %v2347_v18  ;;  %v470_v34 = vadd.f32 %v5587_v9, %v321_v14  ;;  %v480_v49 = vmul.f32 2.0, %v418_v28 }
 0x2ea   : > { %v1548_v56 = vmul.f32 -0.001358992, %v5257_v2  ;;  %v1397_v47 = vmul.f32 %v1396_v55, %v6329_v39  ;;  %vm1411_vm4 = vcmp.eq.s32.totalorder %v6333_v21, 0  ;;  %vm1414_vm3 = vcmp.eq.s32.totalorder %v6333_v21, 2  ;;  %v6335_v39 = vld [vmem:[#allocation30_spill] sm:$0xff] }
 0x2eb   : > { %v2480_v8 = vmul.f32 %v2479_v11, %v6332_v24  ;;  %v3399_v1 = vpop.eup %3398  ;;  %3400 = vpow2.f32 %v551_v45  ;;  %v502_v63 = vsub.f32 %v470_v34, %v486_v23  ;;  %v496_v25 = vsub.f32 %v464_v13, %v480_v49  ;;  %v6338_v34 = vld [vmem:[#allocation26_spill] sm:$0xff] }
 0x2ec   : > { %v1549_v31 = vadd.f32 0.041655596, %v1548_v56  ;;  %v3107_v28 = vmul.f32 %v3106_v57, %v5902_v62  ;;  %v3134_v52 = vmul.f32 %v3399_v1, %v2348_v26  ;;  %v1398_v0 = vadd.f32 1.0, %v1397_v47 }
 0x2ed   : > { %v2481_v33 = vadd.f32 -0.4999988, %v2480_v8  ;;  %vm2495_vm6 = vcmp.lt.s32.totalorder %v6335_v39, 2  ;;  %v518_v35 = vmul.f32 -0.5, %v502_v63  ;;  %v512_v53 = vmul.f32 -0.5, %v496_v25  ;;  %v6339_v8 = vld [vmem:[#allocation37_spill] sm:$0xff] }
 0x2ee   : > { %v1550_v40 = vmul.f32 %v1549_v31, %v5257_v2  ;;  %vm2492_vm8 = vweird.f32 %v6336_v48  ;;  %3150 = vst [vmem:[%s5766_s14 + $0x50] sm:$0xff] %v3134_v52  ;;  %v6337_v51 = vxor.u32 2147483648, %v5330_v44  ;;  %v1415_v18 = vxor.u32 2147483648, %v1398_v0 }
 0x2ef   : > { %v2482_v22 = vmul.f32 %v2481_v33, %v6332_v24  ;;  %v481_v20 = vmul.f32 2.0, %v421_v41  ;;  %vm2496_vm9 = vcmp.eq.s32.totalorder %v6335_v39, 0  ;;  %v538_v14 = vmul.f32 %v5699_v10, %v518_v35 }
 0x2f0   : > { %v1413_v13 = vsel %vm1411_vm4, %v1398_v0, %v6337_v51  ;;  %v532_v29 = vmul.f32 %v5699_v10, %v512_v53  ;;  %v1551_v45 = vadd.f32 -0.4999988, %v1550_v40  ;;  %v1416_v23 = vsel %vm1414_vm3, %v1415_v18, %v5330_v44 }
 0x2f1   : > { %v2483_v57 = vadd.f32 1.0, %v2482_v22  ;;  %v497_v55 = vsub.f32 %v465_v43, %v481_v20  ;;  %v1703_v11 = vmul.f32 -0.001358992, %v5490_v27  ;;  %v3401_v26 = vpop.eup %3400  ;;  %vm1562_vm10 = vweird.f32 %v6338_v34 }
 0x2f2   : > { %v1417_v24 = vsel %vm1410_vm0, %v1413_v13, %v1416_v23  ;;  %vm2499_vm11 = vcmp.eq.s32.totalorder %v6335_v39, 2  ;;  %v565_v49 = vmul.f32 1.442695, %v538_v14  ;;  %v553_v56 = vmul.f32 1.442695, %v532_v29  ;;  %v324_v13 = vpop.xlane.xlu0 %323  ;;  %v6342_v14 = vld [vmem:[#allocation35_spill] sm:$0xff] }
 0x2f3   : > { %v1418_v47 = vsel %vm1407_vm7, nan, %v1417_v24  ;;  %v6340_v44 = vxor.u32 2147483648, %v6339_v8  ;;  %v2500_v43 = vxor.u32 2147483648, %v2483_v57  ;;  %v1552_v63 = vmul.f32 %v1551_v45, %v5257_v2  ;;  %v442_v2 = vpop.f32.mrf.mxu2  ;;  %v6343_v45 = vld [vmem:[#allocation34_spill] sm:$0xff] }
 0x2f4   : > { %v3128_v25 = vmul.f32 %v3401_v26, %v1418_v47  ;;  %3402 = vpow2.f32 %v565_v49  ;;  %v513_v31 = vmul.f32 -0.5, %v497_v55  ;;  %v1704_v41 = vadd.f32 0.041655596, %v1703_v11  ;;  %v6344_v47 = vld [vmem:[#allocation40_spill] sm:$0xff] }
 0x2f5   : > { %v2498_v1 = vsel %vm2496_vm9, %v2483_v57, %v6340_v44  ;;  %v3108_v21 = vadd.f32 -0.16666654, %v3107_v28  ;;  %v2501_v52 = vsel %vm2499_vm11, %v2500_v43, %v6339_v8  ;;  %3404 = vpow2.f32 %v553_v56  ;;  %v327_v44 = vpop.xlane.xlu1 %326 }
 0x2f6   : > { %v1553_v0 = vadd.f32 1.0, %v1552_v63  ;;  %3144 = vst [vmem:[%s5766_s14 + $0x20] sm:$0xff] %v3128_v25  ;;  %v2502_v4 = vsel %vm2495_vm6, %v2498_v1, %v2501_v52  ;;  %vm1566_vm12 = vcmp.eq.s32.totalorder %v5390_v3, 0  ;;  %v533_v33 = vmul.f32 %v5699_v10, %v513_v31  ;;  %v424_v1 = vpop.f32.mrf.mxu0 }
 0x2f7   : > { %v1705_v35 = vmul.f32 %v1704_v41, %v5490_v27  ;;  %v466_v53 = vadd.f32 %v5587_v9, %v5828_v58  ;;  %v6341_v28 = vxor.u32 2147483648, %v5396_v37  ;;  %vm1569_vm5 = vcmp.eq.s32.totalorder %v5390_v3, 2 }
 0x2f8   : > { %v1570_v51 = vxor.u32 2147483648, %v1553_v0  ;;  %v2503_v39 = vsel %vm2492_vm8, nan, %v2502_v4  ;;  %v555_v18 = vmul.f32 1.442695, %v533_v33  ;;  %v487_v20 = vmul.f32 2.0, %v439_v7  ;;  %v6346_v4 = vld [vmem:[#allocation23_spill] sm:$0xff] }
 0x2f9   : > { %v1568_v40 = vsel %vm1566_vm12, %v1553_v0, %v6341_v28  ;;  %v1706_v22 = vadd.f32 -0.4999988, %v1705_v35  ;;  %vm1717_vm13 = vweird.f32 %v6342_v14  ;;  %v5988_v29 = vmul.f32 %v3108_v21, %v5902_v62  ;;  %v6345_v21 = vld [vmem:[#allocation38_spill] sm:$0xff] }
 0x2fa   : > { %vm1565_vm1 = vcmp.lt.s32.totalorder %v5390_v3, 2  ;;  %v1571_v58 = vsel %vm1569_vm5, %v1570_v51, %v5396_v37  ;;  %v2633_v23 = vmul.f32 -0.001358992, %v6343_v45  ;;  %v3403_v57 = vpop.eup %3402  ;;  %vm1720_vm14 = vcmp.lt.s32.totalorder %v5581_v6, 2 }
 0x2fb   : > { %v1572_v55 = vsel %vm1565_vm1, %v1568_v40, %v1571_v58  ;;  %v1707_v48 = vmul.f32 %v1706_v22, %v5490_v27  ;;  %v471_v7 = vadd.f32 %v5587_v9, %v324_v13  ;;  %v3405_v11 = vpop.eup %3404  ;;  %v3135_v26 = vmul.f32 %v3403_v57, %v2503_v39 }
 0x2fc   : > { %v1573_v24 = vsel %vm1562_vm10, nan, %v1572_v55  ;;  %3406 = vpow2.f32 %v555_v18  ;;  %v2634_v3 = vadd.f32 0.041655596, %v2633_v23  ;;  %v2788_v8 = vmul.f32 -0.001358992, %v6344_v47  ;;  %v6347_v55 = vld [vmem:[#allocation31_spill] sm:$0xff] }
 0x2fd   : > { %v3129_v37 = vmul.f32 %v3405_v11, %v1573_v24  ;;  %v1708_v49 = vadd.f32 1.0, %v1707_v48  ;;  %v503_v56 = vsub.f32 %v471_v7, %v487_v20  ;;  %3151 = vst [vmem:[%s5766_s14 + $0x58] sm:$0xff] %v3135_v26  ;;  %vm1721_vm2 = vcmp.eq.s32.totalorder %v5581_v6, 0 }
 0x2fe   : > { %vm1724_vm15 = vcmp.eq.s32.totalorder %v5581_v6, 2  ;;  %v2635_v27 = vmul.f32 %v2634_v3, %v6343_v45  ;;  %v488_v43 = vmul.f32 2.0, %v442_v2  ;;  %v2789_v31 = vadd.f32 0.041655596, %v2788_v8  ;;  %v6350_v3 = vld [vmem:[#allocation41_spill] sm:$0xff] }
 0x2ff   : > { %3145 = vst [vmem:[%s5766_s14 + $0x28] sm:$0xff] %v3129_v37  ;;  %v1723_v34 = vsel %vm1721_vm2, %v1708_v49, %v1722_v59  ;;  %v1725_v63 = vxor.u32 2147483648, %v1708_v49  ;;  %v519_v25 = vmul.f32 -0.5, %v503_v56  ;;  %vm2650_vm0 = vcmp.lt.s32.totalorder %v6345_v21, 2  ;;  %v445_v59 = vpop.f32.mrf.mxu2 }
 0x300   : > { %v2636_v41 = vadd.f32 -0.4999988, %v2635_v27  ;;  %v472_v52 = vadd.f32 %v5587_v9, %v327_v44  ;;  %v482_v0 = vmul.f32 2.0, %v424_v1  ;;  %vm2647_vm7 = vweird.f32 %v6346_v4 }
 0x301   : > { %v1726_v33 = vsel %vm1724_vm15, %v1725_v63, %v5591_v19  ;;  %v539_v35 = vmul.f32 %v5699_v10, %v519_v25  ;;  %v2790_v2 = vmul.f32 %v2789_v31, %v6344_v47  ;;  %v1858_v28 = vmul.f32 -0.001358992, %v5745_v54 }
 0x302   : > { %v3407_v40 = vpop.eup %3406  ;;  %v1727_v51 = vsel %vm1720_vm14, %v1723_v34, %v1726_v33  ;;  %v2637_v13 = vmul.f32 %v2636_v41, %v6343_v45  ;;  %v504_v9 = vsub.f32 %v472_v52, %v488_v43  ;;  %v498_v39 = vsub.f32 %v466_v53, %v482_v0  ;;  %v6348_v53 = vld [vmem:[#allocation39_spill] sm:$0xff]  ;;  %v330_v34 = vpop.xlane.xlu2 %329 }
 0x303   : > { %v1728_v18 = vsel %vm1717_vm13, nan, %v1727_v51  ;;  %vm2651_vm4 = vcmp.eq.s32.totalorder %v6345_v21, 0  ;;  %v567_v19 = vmul.f32 1.442695, %v539_v35  ;;  %v2791_v22 = vadd.f32 -0.4999988, %v2790_v2 }
 0x304   : > { %v3130_v20 = vmul.f32 %v3407_v40, %v1728_v18  ;;  %v2638_v58 = vadd.f32 1.0, %v2637_v13  ;;  %v520_v23 = vmul.f32 -0.5, %v504_v9  ;;  %v514_v57 = vmul.f32 -0.5, %v498_v39  ;;  %v3422_v2 = vld [vmem:[%s6119_s5] ss:$0 sm:$0xff]  ;;  %v333_v40 = vpop.xlane.xlu0 %332 }
 0x305   : > { %vm2802_vm3 = vweird.f32 %v6347_v55  ;;  %vm2654_vm6 = vcmp.eq.s32.totalorder %v6345_v21, 2  ;;  %3408 = vpow2.f32 %v567_v19  ;;  %v2792_v6 = vmul.f32 %v2791_v22, %v6344_v47 }
 0x306   : > { %v1859_v45 = vadd.f32 0.041655596, %v1858_v28  ;;  %3146 = vst [vmem:[%s5766_s14 + $0x30] sm:$0xff] %v3130_v20  ;;  %v6349_v14 = vxor.u32 2147483648, %v6348_v53  ;;  %v2655_v7 = vxor.u32 2147483648, %v2638_v58  ;;  %v540_v11 = vmul.f32 %v5699_v10, %v520_v23 }
 0x307   : > { %v534_v26 = vmul.f32 %v5699_v10, %v514_v57  ;;  %v2793_v24 = vadd.f32 1.0, %v2792_v6  ;;  %vm2806_vm8 = vcmp.eq.s32.totalorder %v6350_v3, 0  ;;  %v2943_v49 = vmul.f32 -0.001358992, %v5618_v16  ;;  %v448_v0 = vpop.f32.mrf.mxu2 }
 0x308   : > { %v2653_v48 = vsel %vm2651_vm4, %v2638_v58, %v6349_v14  ;;  %v1860_v37 = vmul.f32 %v1859_v45, %v5745_v54  ;;  %v2656_v56 = vsel %vm2654_vm6, %v2655_v7, %v6348_v53  ;;  %vm2809_vm9 = vcmp.eq.s32.totalorder %v6350_v3, 2 }
 0x309   : > { %v569_v47 = vmul.f32 1.442695, %v540_v11  ;;  %v557_v8 = vmul.f32 1.442695, %v534_v26  ;;  %v2657_v44 = vsel %vm2650_vm0, %v2653_v48, %v2656_v56  ;;  %v2808_v1 = vsel %vm2806_vm8, %v2793_v24, %v2807_v17 }
 0x30a   : > { %v2810_v27 = vxor.u32 2147483648, %v2793_v24  ;;  %v1861_v43 = vadd.f32 -0.4999988, %v1860_v37  ;;  %vm1872_vm10 = vweird.f32 %v5366_v38  ;;  %v2658_v63 = vsel %vm2647_vm7, nan, %v2657_v44 }
 0x30b   : > { %3410 = vpow2.f32 %v569_v47  ;;  %v489_v25 = vmul.f32 2.0, %v445_v59  ;;  %v2944_v31 = vadd.f32 0.041655596, %v2943_v49  ;;  %v3409_v41 = vpop.eup %3408  ;;  %v3110_v52 = vadd.f32 1.0, %v5988_v29 }
 0x30c   : > { %vm2805_vm11 = vcmp.lt.s32.totalorder %v6350_v3, 2  ;;  %v2811_v17 = vsel %vm2809_vm9, %v2810_v27, %v5569_v42  ;;  %v1862_v21 = vmul.f32 %v1861_v43, %v5745_v54  ;;  %v3136_v33 = vmul.f32 %v3409_v41, %v2658_v63 }
 0x30d   : > { %v2812_v35 = vsel %vm2805_vm11, %v2808_v1, %v2811_v17  ;;  %v2945_v4 = vmul.f32 %v2944_v31, %v5618_v16  ;;  %v473_v28 = vadd.f32 %v3422_v2, %v330_v34  ;;  %3412 = vpow2.f32 %v557_v8 }
 0x30e   : > { %v1863_v29 = vadd.f32 1.0, %v1862_v21  ;;  %vm1876_vm12 = vcmp.eq.s32.totalorder %v5782_v36, 0  ;;  %v3098_v59 = vmul.f32 -0.001358992, %v5902_v62  ;;  %3152 = vst [vmem:[%s5766_s14 + $0x60] sm:$0xff] %v3136_v33  ;;  %v2813_v42 = vsel %vm2802_vm3, nan, %v2812_v35 }
 0x30f   : > { %v2946_v54 = vadd.f32 -0.4999988, %v2945_v4  ;;  %v505_v51 = vsub.f32 %v473_v28, %v489_v25  ;;  %v490_v13 = vmul.f32 2.0, %v448_v0  ;;  %v3111_v9 = vmul.f32 %v3110_v52, %v5895_v50 }
 0x310   : > { %v1878_v39 = vsel %vm1876_vm12, %v1863_v29, %v1877_v5  ;;  %v1880_v18 = vxor.u32 2147483648, %v1863_v29  ;;  %v3099_v19 = vadd.f32 0.041655596, %v3098_v59  ;;  %vm1879_vm5 = vcmp.eq.s32.totalorder %v5782_v36, 2 }
 0x311   : > { %v3411_v22 = vpop.eup %3410  ;;  %v2947_v20 = vmul.f32 %v2946_v54, %v5618_v16  ;;  %v521_v58 = vmul.f32 -0.5, %v505_v51  ;;  %v474_v23 = vadd.f32 %v3422_v2, %v333_v40  ;;  %vm1875_vm13 = vcmp.lt.s32.totalorder %v5782_v36, 2 }
 0x312   : > { %v3137_v57 = vmul.f32 %v3411_v22, %v2813_v42  ;;  %v1881_v55 = vsel %vm1879_vm5, %v1880_v18, %v5910_v61  ;;  %v3100_v50 = vmul.f32 %v3099_v19, %v5902_v62  ;;  %v3114_v48 = vand.u32 3, %v5928_v15 }
 0x313   : > { %v1882_v6 = vsel %vm1875_vm13, %v1878_v39, %v1881_v55  ;;  %v2948_v45 = vadd.f32 1.0, %v2947_v20  ;;  %v541_v5 = vmul.f32 %v5699_v10, %v521_v58  ;;  %v506_v53 = vsub.f32 %v474_v23, %v490_v13  ;;  %v3413_v14 = vpop.eup %3412 }
 0x314   : > { %3153 = vst [vmem:[%s5766_s14 + $0x68] sm:$0xff] %v3137_v57  ;;  %v1883_v16 = vsel %vm1872_vm10, nan, %v1882_v6  ;;  %vm2961_vm1 = vcmp.eq.s32.totalorder %v5593_v12, 0  ;;  %v3101_v36 = vadd.f32 -0.4999988, %v3100_v50  ;;  %v3117_v24 = vxor.u32 2147483648, %v3111_v9 }
 0x315   : > { %v3131_v7 = vmul.f32 %v3413_v14, %v1883_v16  ;;  %v2963_v61 = vsel %vm2961_vm1, %v2948_v45, %v2962_v32  ;;  %v2965_v11 = vxor.u32 2147483648, %v2948_v45  ;;  %v571_v26 = vmul.f32 1.442695, %v541_v5 }
 0x316   : > { %vm2964_vm14 = vcmp.eq.s32.totalorder %v5593_v12, 2  ;;  %v3102_v3 = vmul.f32 %v3101_v36, %v5902_v62  ;;  %v522_v15 = vmul.f32 -0.5, %v506_v53  ;;  %vm2960_vm2 = vcmp.lt.s32.totalorder %v5593_v12, 2 }
 0x317   : > { %3147 = vst [vmem:[%s5766_s14 + $0x38] sm:$0xff] %v3131_v7  ;;  %v2966_v38 = vsel %vm2964_vm14, %v2965_v11, %v5797_v46  ;;  %3414 = vpow2.f32 %v571_v26  ;;  %vm3116_vm15 = vcmp.eq.s32.totalorder %v3114_v48, 0  ;;  %vm2957_vm0 = vweird.f32 %v5294_v60 }
 0x318   : > { %v2967_v37 = vsel %vm2960_vm2, %v2963_v61, %v2966_v38  ;;  %v3103_v49 = vadd.f32 1.0, %v3102_v3  ;;  %v542_v56 = vmul.f32 %v5699_v10, %v522_v15  ;;  %vm3119_vm7 = vcmp.eq.s32.totalorder %v3114_v48, 2 }
 0x319   : > { %v2968_v62 = vsel %vm2957_vm0, nan, %v2967_v37  ;;  %vm3115_vm4 = vcmp.lt.s32.totalorder %v3114_v48, 2  ;;  %vm3112_vm3 = vweird.f32 %v5534_v30 }
 0x31a   : > { %v3118_v32 = vsel %vm3116_vm15, %v3103_v49, %v3117_v24  ;;  %v3120_v47 = vxor.u32 2147483648, %v3103_v49  ;;  %v573_v8 = vmul.f32 1.442695, %v542_v56 }
 0x31c   : > { %v3121_v12 = vsel %vm3119_vm7, %v3120_v47, %v3111_v9  ;;  %3416 = vpow2.f32 %v573_v8 }
 0x31d   : > { %v3415_v46 = vpop.eup %3414  ;;  %v3122_v44 = vsel %vm3115_vm4, %v3118_v32, %v3121_v12 }
 0x31e   : > { %v3138_v10 = vmul.f32 %v3415_v46, %v2968_v62  ;;  %v3123_v60 = vsel %vm3112_vm3, nan, %v3122_v44 }
 0x320   : > { %3154 = vst [vmem:[%s5766_s14 + $0x70] sm:$0xff] %v3138_v10 }
 0x322   : > { %v3417_v1 = vpop.eup %3416 }
 0x323   : > { %v3139_v27 = vmul.f32 %v3417_v1, %v3123_v60 }
 0x325   : > { %3155 = vst [vmem:[%s5766_s14 + $0x78] sm:$0xff] %v3139_v27 }
 0x326   : > { %3450 = shalt.err (!%p3447_p3)
}
 0x327   : > { %s3494_s12 = smov 128   ;;  %s3495_s14 = smov 8  }
 0x328   : > { %3335 = dma.vmem_to_hbm [thread:$0]  (%p3569_p5), %s3170_s26, 2048, %s3172_s25, %s3157_s28, %s3494_s12, %s3494_s12, %s3495_s14  }
 0x329 PF: > { %p3341_p4 = scmp.ge.s32.totalorder %s3485_s24, 2  ;;  %s3186_s17 = sand.u32 1, %s3473_s21  }
 0x32a   : > { %s3187_s18 = scalar_lea.sflag [#allocation3], %s3186_s17 }
 0x32b   : > { %p3338_p7 = pnand %p3341_p4, %p3573_p6 }
 0x32d   : > { %p3339_p8 = pneg %p3338_p7 }
 0x32f   : > { %3468 = dma.done.wait (%p3339_p8), %s3187_s18, 2048  }
 0x330   : > { %3470 = vsyncadd (%p3339_p8), %s3187_s18, 4294965248  ;;  %p16_p9 = scmp.ge.s32.totalorder %s3556_s27, 4   ;;  %s6351_s21 = smov %s3477_s22 }
 0x331   : > { %s6352_s22 = smov %s3481_s23  ;;  %s6353_s23 = smov %s3567_s30 }
 0x332   : > { %s6354_s24 = smov %s3556_s27  ;;  %18 = sbr.rel (!%p16_p9) target bundleno = 3 (0x3), region = 79 }
 0x337   :  { %3193 = vsyncpa [#allocation3], 1 }
 0x338   :  { %3195 = vsyncpa [#allocation3 + $0x1], 1 }

</bundles_post_ra>
